<compile_context>
chip_gen: v7x
topology: tpu7x:2x2x1
jax: 0.10.0
libtpu: 0.0.40
codegen_flags: <defaults>
</compile_context>

<pallas_src>
import functools

import jax
import jax.numpy as jnp
from jax.experimental import pallas as pl
from jax.experimental.pallas import tpu as pltpu


def _round_up(x, m):
    return (x + m - 1) // m * m


def _vmem_capacity_bytes():
    try:
        info = pltpu.get_tpu_info()
        cap = int(getattr(info, "vmem_capacity_bytes", 0))
        if cap > 0:
            return cap
    except Exception:
        pass
    return 64 * 1024 * 1024  # conservative default (v7x per-TensorCore)


# ---------------------------------------------------------------------------
# Kernel
# ---------------------------------------------------------------------------
def _chebbase_kernel(C, TILE_N, A_RESIDENT, OUT_RESIDENT,
                     temp_ref,                                  # SMEM (K+1,)
                     x_ref, w1_ref, b1_ref, w2_ref, a_ref,      # inputs
                     out_ref,                                   # output
                     t_store, s_acc):                           # VMEM scratch
    j = pl.program_id(0)            # order index: Chebyshev order k = j + 1
    i = pl.program_id(1)            # node-row tile index
    row0 = pl.multiple_of(i * TILE_N, TILE_N)

    # ---- one-time prologue: lin1 + ReLU into T0 (augmented hidden layout) --
    # W1/b1 are pre-padded so column H of T0 is the constant 1 (fused lin2
    # bias) and columns > H are exactly 0.
    @pl.when((j == 0) & (i == 0))
    def _setup():
        h = jnp.dot(x_ref[...], w1_ref[...],
                    preferred_element_type=jnp.float32)
        h = jnp.maximum(h + b1_ref[...], 0.0)          # (N_pad, HP) = T0 (f32)
        t_store[0] = h.astype(jnp.bfloat16)            # bf16 storage
        s_acc[...] = temp_ref[0] * h                   # temp[0] * T0 (f32)

    # ---- Chebyshev recurrence for this row panel (order k = j + 1) ----
    prev = j % 2                    # slot holding T_{k-1}
    cur = 1 - prev                  # slot receiving T_k (still holds T_{k-2})
    t_prev = t_store[prev]                                        # bf16 full
    t_cur = t_store.at[cur]

    if A_RESIDENT:
        a = a_ref[pl.ds(row0, TILE_N), :]                         # bf16 rows
    else:
        a = a_ref[...]                                            # (TILE_N, N)

    at = jnp.dot(a, t_prev, preferred_element_type=jnp.float32)  # (TILE_N, HP)

    @pl.when(j == 0)
    def _first_order():                      # T_1 = A_hat T_0
        t_cur[pl.ds(row0, TILE_N), :] = at.astype(jnp.bfloat16)
        s_acc[pl.ds(row0, TILE_N), :] = (
            s_acc[pl.ds(row0, TILE_N), :] + temp_ref[1] * at)

    @pl.when(j > 0)
    def _higher_order():                     # T_k = 2 A_hat T_{k-1} - T_{k-2}
        t_old = t_cur[pl.ds(row0, TILE_N), :].astype(jnp.float32)
        t_new = 2.0 * at - t_old
        t_cur[pl.ds(row0, TILE_N), :] = t_new.astype(jnp.bfloat16)
        s_acc[pl.ds(row0, TILE_N), :] = (
            s_acc[pl.ds(row0, TILE_N), :] + temp_ref[j + 1] * t_new)

    # ---- epilogue at the last order: lin2 ([W2; b2]) + masked log_softmax --
    @pl.when(j == pl.num_programs(0) - 1)
    def _finalize():
        s_rows = s_acc[pl.ds(row0, TILE_N), :]
        logits = jnp.dot(s_rows, w2_ref[...],
                         preferred_element_type=jnp.float32)     # (TILE_N, CP)
        lane = jax.lax.broadcasted_iota(jnp.int32, logits.shape, 1)
        logits = jnp.where(lane < C, logits, -1e30)   # mask padded class lanes
        m = jnp.max(logits, axis=1, keepdims=True)
        s = logits - m
        lse = jnp.log(jnp.sum(jnp.exp(s), axis=1, keepdims=True))
        if OUT_RESIDENT:
            out_ref[pl.ds(row0, TILE_N), :] = s - lse
        else:
            out_ref[...] = s - lse


# ---------------------------------------------------------------------------
# Wrapper
# ---------------------------------------------------------------------------
def chebbase_forward(x, w1, b1, w2, b2, adj_hat, temp, *, K):
    """x: (N, F) float32 node features. Returns (N, C) log-probabilities."""
    assert K >= 1
    N, F = x.shape
    H = w1.shape[1]
    C = w2.shape[1]

    HP = max(128, _round_up(H + 1, 128))    # hidden lanes (+1 fused-bias col)
    CP = max(128, _round_up(C, 128))        # lane-dense output slab

    f32 = jnp.float32
    bf16 = jnp.bfloat16

    vmem_cap = _vmem_capacity_bytes()
    budget = max(16 * 1024 * 1024, vmem_cap - 12 * 1024 * 1024)

    def est_vmem(tile_n, n_pad, a_res, out_res):
        e = 2 * n_pad * HP * 2                           # T ping-pong (bf16)
        e += n_pad * HP * 4                              # s_acc (f32)
        e += 2 * n_pad * F * 2                           # x bf16 (2 bufs)
        e += 2 * (F * HP * 2 + HP * 4 + HP * CP * 4)     # w1 bf16, b1, [W2;b2]
        e += 2 * (n_pad * n_pad * 2 if a_res else tile_n * n_pad * 2)
        e += 2 * (n_pad * CP * 4 if out_res else tile_n * CP * 4)
        return e

    if N >= 256:
        tile_cands = [256, 128]
    elif N >= 128:
        tile_cands = [128]
    else:
        tile_cands = [_round_up(N, 8)]

    def _choose():
        for tn in tile_cands:
            n_pad = _round_up(N, tn)
            for a_res in (True, False):          # prefer A VMEM-resident
                for out_res in (True, False):    # prefer resident output slab
                    if est_vmem(tn, n_pad, a_res, out_res) <= budget:
                        return tn, n_pad, a_res, out_res
        tn = tile_cands[-1]
        return tn, _round_up(N, tn), False, False

    TILE_N, N_pad, A_RESIDENT, OUT_RESIDENT = _choose()
    n_tiles = N_pad // TILE_N

    # Pad nodes with zero rows; zero adjacency rows/cols leave real rows exact.
    x_p = jnp.zeros((N_pad, F), bf16).at[:N].set(x.astype(bf16))
    a_p = jnp.zeros((N_pad, N_pad), bf16).at[:N, :N].set(adj_hat.astype(bf16))

    # lin1 padded to HP lanes; column H gets weight 0 / bias 1 -> constant-1
    # feature so lin2's bias commutes through the (linear) propagation.
    w1_p = jnp.zeros((F, HP), f32).at[:, :H].set(w1).astype(bf16)
    b1_p = (jnp.zeros((1, HP), f32).at[:, :H].set(b1.reshape(1, H))
            .at[0, H].set(1.0))
    # lin2 as augmented (HP, CP): rows [W2; b2; 0], class lanes padded to CP.
    w2_a = (jnp.zeros((HP, CP), f32)
            .at[:H, :C].set(w2)
            .at[H, :C].set(b2.reshape(C)))

    temp = temp.astype(f32)
    kernel = functools.partial(_chebbase_kernel, C, TILE_N,
                               A_RESIDENT, OUT_RESIDENT)

    if A_RESIDENT:
        a_spec = pl.BlockSpec((N_pad, N_pad), lambda j, i, t: (0, 0))
    else:
        a_spec = pl.BlockSpec((TILE_N, N_pad), lambda j, i, t: (i, 0))
    if OUT_RESIDENT:
        out_spec = pl.BlockSpec((N_pad, CP), lambda j, i, t: (0, 0))
    else:
        out_spec = pl.BlockSpec((TILE_N, CP), lambda j, i, t: (i, 0))

    flops = (2 * N_pad * F * HP + 2 * K * N_pad * N_pad * HP
             + 2 * N_pad * HP * CP)
    a_reads = 1 if A_RESIDENT else K
    out_writes = 1 if OUT_RESIDENT else K
    bytes_accessed = (a_reads * N_pad * N_pad * 2 + N_pad * F * 2
                      + out_writes * N_pad * CP * 4
                      + (F * HP * 2 + HP * 4 + HP * CP * 4))
    cost = pl.CostEstimate(flops=flops, transcendentals=N_pad * CP,
                           bytes_accessed=bytes_accessed)

    est = est_vmem(TILE_N, N_pad, A_RESIDENT, OUT_RESIDENT)
    vmem_limit = int(min(budget, max(16 * 1024 * 1024,
                                     est + 8 * 1024 * 1024)))

    grid_spec = pltpu.PrefetchScalarGridSpec(
        num_scalar_prefetch=1,                 # temp -> SMEM
        grid=(K, n_tiles),                     # order k outer, row tiles inner
        in_specs=[
            pl.BlockSpec((N_pad, F), lambda j, i, t: (0, 0)),   # x (bf16)
            pl.BlockSpec((F, HP), lambda j, i, t: (0, 0)),      # W1 padded
            pl.BlockSpec((1, HP), lambda j, i, t: (0, 0)),      # b1 padded
            pl.BlockSpec((HP, CP), lambda j, i, t: (0, 0)),     # [W2; b2]
            a_spec,                                             # A_hat bf16
        ],
        out_specs=out_spec,
        scratch_shapes=[
            pltpu.VMEM((2, N_pad, HP), jnp.bfloat16),  # T ping-pong (bf16)
            pltpu.VMEM((N_pad, HP), jnp.float32),      # sum_k temp[k] * T_k
        ],
    )

    out_padded = pl.pallas_call(
        kernel,
        out_shape=jax.ShapeDtypeStruct((N_pad, CP), jnp.float32),
        grid_spec=grid_spec,
        compiler_params=pltpu.CompilerParams(
            # Row axis is NOT megacore-parallel-safe: every row tile of T_k
            # reads the full T_{k-1} held in shared scratch.
            dimension_semantics=("arbitrary", "arbitrary"),
            vmem_limit_bytes=vmem_limit,
        ),
        cost_estimate=cost,
    )(temp, x_p, w1_p, b1_p, w2_a, a_p)

    return out_padded[:N, :C]


# ---------------------------------------------------------------------------
# Plain-JAX glue: gcn_norm (dense), parameter init, references
# ---------------------------------------------------------------------------
def gcn_norm_dense(edge_index, num_nodes):
    A = jnp.zeros((num_nodes, num_nodes), jnp.float32)
    A = A.at[edge_index[0], edge_index[1]].set(1.0)
    idx = jnp.arange(num_nodes)
    A = A.at[idx, idx].set(1.0)                    # self loops, no double count
    deg = jnp.sum(A, axis=1)
    dinv = jnp.where(deg > 0, jax.lax.rsqrt(deg), 0.0)   # guard deg-0 nodes
    return dinv[:, None] * A * dinv[None, :]


def init_linear(key, fan_in, fan_out):
    kw, kb = jax.random.split(key)
    bound = 1.0 / jnp.sqrt(jnp.float32(fan_in))
    w = jax.random.uniform(kw, (fan_in, fan_out), jnp.float32, -bound, bound)
    b = jax.random.uniform(kb, (1, fan_out), jnp.float32, -bound, bound)
    return w, b


_HI = jax.lax.Precision.HIGHEST


def reference_exact(x, w1, b1, w2, b2, adj_hat, temp, K):
    """Pure f32 semantics of the original module."""
    h = jnp.maximum(jnp.dot(x, w1, precision=_HI) + b1, 0.0)
    z = jnp.dot(h, w2, precision=_HI) + b2
    t0, t1 = z, jnp.dot(adj_hat, z, precision=_HI)
    out = temp[0] * t0 + temp[1] * t1
    for k in range(2, K + 1):
        t2 = 2.0 * jnp.dot(adj_hat, t1, precision=_HI) - t0
        out = out + temp[k] * t2
        t0, t1 = t1, t2
    return jax.nn.log_softmax(out, axis=1)


def reference_mirrored(x, w1, b1, w2, b2, adj_hat, temp, K):
    """Mirrors the kernel numerics: bf16 x/W1/A/T storage (f32 accumulation),
    propagation in augmented hidden space, lin2 applied after the sum."""
    N = x.shape[0]
    C = w2.shape[1]
    bf16 = jnp.bfloat16
    h = jnp.dot(x.astype(bf16), w1.astype(bf16),
                preferred_element_type=jnp.float32)
    h = jnp.maximum(h + b1, 0.0)
    h_aug = jnp.concatenate([h, jnp.ones((N, 1), jnp.float32)], axis=1)
    a16 = adj_hat.astype(bf16)
    mm = lambda t16: jnp.dot(a16, t16, preferred_element_type=jnp.float32)
    t_prev = h_aug.astype(bf16)                 # stored T0 (bf16)
    s = temp[0] * h_aug
    t1 = mm(t_prev)                             # f32
    s = s + temp[1] * t1
    t_old, t_prev = t_prev, t1.astype(bf16)
    for k in range(2, K + 1):
        tk = 2.0 * mm(t_prev) - t_old.astype(jnp.float32)
        s = s + temp[k] * tk
        t_old, t_prev = t_prev, tk.astype(bf16)
    w2_aug = jnp.concatenate([w2, b2.reshape(1, C)], axis=0)
    logits = jnp.dot(s, w2_aug, precision=_HI)
    return jax.nn.log_softmax(logits, axis=1)


if __name__ == "__main__":
    # Small but grid-exercising sizes: multiple row panels x K=3 orders.
    N_NODES = 512
    NUM_FEATURES = 16
    HIDDEN = 32
    NUM_CLASSES = 4
    K = 3

    key = jax.random.PRNGKey(0)
    kx, k1, k2 = jax.random.split(key, 3)

    x = jax.random.normal(kx, (N_NODES, NUM_FEATURES), jnp.float32)

    # Deterministic ring graph plus chords (symmetric).
    src = jnp.arange(N_NODES, dtype=jnp.int32)
    nxt = (src + 1) % N_NODES
    chord = (src + 7) % N_NODES
    edge_index = jnp.stack(
        [jnp.concatenate([src, nxt, src, chord]),
         jnp.concatenate([nxt, src, chord, src])], axis=0)

    w1, b1 = init_linear(k1, NUM_FEATURES, HIDDEN)
    w2, b2 = init_linear(k2, HIDDEN, NUM_CLASSES)
    temp = jnp.ones((K + 1,), jnp.float32)   # Chebbase_prop coefficients

    adj_hat = gcn_norm_dense(edge_index, N_NODES)

    out = chebbase_forward(x, w1, b1, w2, b2, adj_hat, temp, K=K)
    out = jax.block_until_ready(out)
    assert out.shape == (N_NODES, NUM_CLASSES)

    ref_m = reference_mirrored(x, w1, b1, w2, b2, adj_hat, temp, K)
    ref_e = reference_exact(x, w1, b1, w2, b2, adj_hat, temp, K)
    assert jnp.allclose(out, ref_m, atol=1e-2, rtol=1e-2), "mismatch vs mirrored ref"
    assert jnp.allclose(out, ref_e, atol=1.5e-1, rtol=1.5e-1), "mismatch vs f32 ref"

    print("KERNEL_OK")
</pallas_src>

<mosaic_0001>
module attributes {stable_mosaic.version = 11 : i64} {
  func.func @_chebbase_kernel(%arg0: i32, %arg1: i32, %arg2: memref<4xf32, #tpu.memory_space<smem>>, %arg3: memref<512x16xbf16, #tpu.memory_space<vmem>>, %arg4: memref<16x128xbf16, #tpu.memory_space<vmem>>, %arg5: memref<1x128xf32, #tpu.memory_space<vmem>>, %arg6: memref<128x128xf32, #tpu.memory_space<vmem>>, %arg7: memref<512x512xbf16, #tpu.memory_space<vmem>>, %arg8: memref<512x128xf32, #tpu.memory_space<vmem>>, %arg9: memref<2x512x128xbf16, #tpu.memory_space<vmem>>, %arg10: memref<512x128xf32, #tpu.memory_space<vmem>>) attributes {dimension_semantics = [#tpu.dimension_semantics<arbitrary>, #tpu.dimension_semantics<arbitrary>], iteration_bounds = array<i64: 3, 2>, scalar_prefetch = 1 : i64, scratch_operands = 2 : i64, tpu.core_type = #tpu.core_type<tc>, window_params = [{pipeline_mode = #tpu.pipeline_mode<synchronous>, transform_indices = @transform_0, window_bounds = array<i64: 512, 16>}, {pipeline_mode = #tpu.pipeline_mode<synchronous>, transform_indices = @transform_1, window_bounds = array<i64: 16, 128>}, {pipeline_mode = #tpu.pipeline_mode<synchronous>, transform_indices = @transform_2, window_bounds = array<i64: 1, 128>}, {pipeline_mode = #tpu.pipeline_mode<synchronous>, transform_indices = @transform_3, window_bounds = array<i64: 128, 128>}, {pipeline_mode = #tpu.pipeline_mode<synchronous>, transform_indices = @transform_4, window_bounds = array<i64: 512, 512>}, {pipeline_mode = #tpu.pipeline_mode<synchronous>, transform_indices = @transform_5, window_bounds = array<i64: 512, 128>}]} {
    %c256_i32 = arith.constant 256 : i32
    %0 = arith.muli %arg1, %c256_i32 : i32
    %1 = tpu.assume_multiple %0, 256 : i32
    %c0_i32 = arith.constant 0 : i32
    %2 = arith.cmpi eq, %arg0, %c0_i32 : i32
    %c0_i32_0 = arith.constant 0 : i32
    %3 = arith.cmpi eq, %arg1, %c0_i32_0 : i32
    %4 = arith.andi %2, %3 : i1
    %5 = arith.extui %4 : i1 to i32
    %c0_i32_1 = arith.constant 0 : i32
    %6 = arith.cmpi ne, %5, %c0_i32_1 : i32
    scf.if %6 {
      %c0_15 = arith.constant 0 : index
      %c0_16 = arith.constant 0 : index
      %33 = vector.load %arg3[%c0_15, %c0_16] : memref<512x16xbf16, #tpu.memory_space<vmem>>, vector<512x16xbf16>
      %c0_17 = arith.constant 0 : index
      %c0_18 = arith.constant 0 : index
      %34 = vector.load %arg4[%c0_17, %c0_18] : memref<16x128xbf16, #tpu.memory_space<vmem>>, vector<16x128xbf16>
      %cst_19 = arith.constant dense<0.000000e+00> : vector<512x128xf32>
      %35 = tpu.matmul %33, %34, %cst_19 {dimension_numbers = #tpu.dot_dimension_numbers<[1], [0], [0], [1], [0, 0, 1, 1], [], []>} : vector<512x16xbf16>, vector<16x128xbf16>, vector<512x128xf32> -> vector<512x128xf32>
      %c0_20 = arith.constant 0 : index
      %c0_21 = arith.constant 0 : index
      %36 = vector.load %arg5[%c0_20, %c0_21] : memref<1x128xf32, #tpu.memory_space<vmem>>, vector<1x128xf32>
      %37 = vector.broadcast %36 : vector<1x128xf32> to vector<512x128xf32>
      %38 = arith.addf %35, %37 : vector<512x128xf32>
      %cst_22 = arith.constant 0.000000e+00 : f32
      %39 = vector.broadcast %cst_22 : f32 to vector<512x128xf32>
      %40 = arith.maximumf %38, %39 : vector<512x128xf32>
      %41 = arith.truncf %40 : vector<512x128xf32> to vector<512x128xbf16>
      %c0_23 = arith.constant 0 : index
      %c0_24 = arith.constant 0 : index
      %c0_25 = arith.constant 0 : index
      %42 = vector.load %arg9[%c0_23, %c0_24, %c0_25] : memref<2x512x128xbf16, #tpu.memory_space<vmem>>, vector<1x512x128xbf16>
      %43 = vector.shape_cast %42 : vector<1x512x128xbf16> to vector<512x128xbf16>
      %44 = vector.shape_cast %41 : vector<512x128xbf16> to vector<1x512x128xbf16>
      tpu.vector_store %arg9[%c0_23, %c0_24, %c0_25], %44 {strides = array<i32>} : memref<2x512x128xbf16, #tpu.memory_space<vmem>>, vector<1x512x128xbf16>,
      %c0_26 = arith.constant 0 : index
      %45 = memref.load %arg2[%c0_26] : memref<4xf32, #tpu.memory_space<smem>>
      %46 = vector.broadcast %45 : f32 to vector<512x128xf32>
      %47 = arith.mulf %46, %40 : vector<512x128xf32>
      %c0_27 = arith.constant 0 : index
      %c0_28 = arith.constant 0 : index
      %48 = vector.load %arg10[%c0_27, %c0_28] : memref<512x128xf32, #tpu.memory_space<vmem>>, vector<512x128xf32>
      tpu.vector_store %arg10[%c0_27, %c0_28], %47 {strides = array<i32>} : memref<512x128xf32, #tpu.memory_space<vmem>>, vector<512x128xf32>,
    } else {
    }
    %c2_i32 = arith.constant 2 : i32
    %c0_i32_2 = arith.constant 0 : i32
    %7 = arith.cmpi eq, %c2_i32, %c0_i32_2 : i32
    %c1_i32 = arith.constant 1 : i32
    %8 = arith.select %7, %c1_i32, %c2_i32 : i32
    %9 = arith.remsi %arg0, %8 : i32
    %c0_i32_3 = arith.constant 0 : i32
    %10 = arith.cmpi ne, %9, %c0_i32_3 : i32
    %c0_i32_4 = arith.constant 0 : i32
    %11 = arith.cmpi slt, %9, %c0_i32_4 : i32
    %c0_i32_5 = arith.constant 0 : i32
    %12 = arith.cmpi slt, %8, %c0_i32_5 : i32
    %13 = arith.xori %11, %12 : i1
    %14 = arith.andi %13, %10 : i1
    %15 = arith.addi %9, %8 : i32
    %16 = arith.select %14, %15, %9 : i32
    %c1_i32_6 = arith.constant 1 : i32
    %17 = arith.subi %c1_i32_6, %16 : i32
    %18 = arith.index_cast %16 : i32 to index
    %c0 = arith.constant 0 : index
    %c0_7 = arith.constant 0 : index
    %19 = vector.load %arg9[%18, %c0, %c0_7] : memref<2x512x128xbf16, #tpu.memory_space<vmem>>, vector<1x512x128xbf16>
    %20 = vector.shape_cast %19 : vector<1x512x128xbf16> to vector<512x128xbf16>
    %21 = arith.index_cast %1 : i32 to index
    %c0_8 = arith.constant 0 : index
    %22 = vector.load %arg7[%21, %c0_8] : memref<512x512xbf16, #tpu.memory_space<vmem>>, vector<256x512xbf16>
    %cst = arith.constant dense<0.000000e+00> : vector<256x128xf32>
    %23 = tpu.matmul %22, %20, %cst {dimension_numbers = #tpu.dot_dimension_numbers<[1], [0], [0], [1], [0, 0, 1, 1], [], []>} : vector<256x512xbf16>, vector<512x128xbf16>, vector<256x128xf32> -> vector<256x128xf32>
    %c0_i32_9 = arith.constant 0 : i32
    %24 = arith.cmpi eq, %arg0, %c0_i32_9 : i32
    %25 = arith.extui %24 : i1 to i32
    %c0_i32_10 = arith.constant 0 : i32
    %26 = arith.cmpi ne, %25, %c0_i32_10 : i32
    scf.if %26 {
      %33 = arith.truncf %23 : vector<256x128xf32> to vector<256x128xbf16>
      %c0_i32_15 = arith.constant 0 : i32
      %c0_i32_16 = arith.constant 0 : i32
      %34 = tpu.memref_slice %arg9[%17, %c0_i32_15, %c0_i32_16] : memref<2x512x128xbf16, #tpu.memory_space<vmem>> -> memref<1x512x128xbf16, #tpu.memory_space<vmem>>
      %35 = tpu.memref_squeeze %34 : memref<1x512x128xbf16, #tpu.memory_space<vmem>> -> memref<512x128xbf16, #tpu.memory_space<vmem>>
      %36 = arith.index_cast %1 : i32 to index
      %c0_17 = arith.constant 0 : index
      %37 = vector.load %35[%36, %c0_17] : memref<512x128xbf16, #tpu.memory_space<vmem>>, vector<256x128xbf16>
      tpu.vector_store %35[%36, %c0_17], %33 {strides = array<i32>} : memref<512x128xbf16, #tpu.memory_space<vmem>>, vector<256x128xbf16>,
      %38 = arith.index_cast %1 : i32 to index
      %c0_18 = arith.constant 0 : index
      %39 = vector.load %arg10[%38, %c0_18] : memref<512x128xf32, #tpu.memory_space<vmem>>, vector<256x128xf32>
      %c1 = arith.constant 1 : index
      %40 = memref.load %arg2[%c1] : memref<4xf32, #tpu.memory_space<smem>>
      %41 = vector.broadcast %40 : f32 to vector<256x128xf32>
      %42 = arith.mulf %41, %23 : vector<256x128xf32>
      %43 = arith.addf %39, %42 : vector<256x128xf32>
      %44 = arith.index_cast %1 : i32 to index
      %c0_19 = arith.constant 0 : index
      %45 = vector.load %arg10[%44, %c0_19] : memref<512x128xf32, #tpu.memory_space<vmem>>, vector<256x128xf32>
      tpu.vector_store %arg10[%44, %c0_19], %43 {strides = array<i32>} : memref<512x128xf32, #tpu.memory_space<vmem>>, vector<256x128xf32>,
    } else {
    }
    %c0_i32_11 = arith.constant 0 : i32
    %27 = arith.cmpi sgt, %arg0, %c0_i32_11 : i32
    %28 = arith.extui %27 : i1 to i32
    %c0_i32_12 = arith.constant 0 : i32
    %29 = arith.cmpi ne, %28, %c0_i32_12 : i32
    scf.if %29 {
      %c0_i32_15 = arith.constant 0 : i32
      %c0_i32_16 = arith.constant 0 : i32
      %33 = tpu.memref_slice %arg9[%17, %c0_i32_15, %c0_i32_16] : memref<2x512x128xbf16, #tpu.memory_space<vmem>> -> memref<1x512x128xbf16, #tpu.memory_space<vmem>>
      %34 = tpu.memref_squeeze %33 : memref<1x512x128xbf16, #tpu.memory_space<vmem>> -> memref<512x128xbf16, #tpu.memory_space<vmem>>
      %35 = arith.index_cast %1 : i32 to index
      %c0_17 = arith.constant 0 : index
      %36 = vector.load %34[%35, %c0_17] : memref<512x128xbf16, #tpu.memory_space<vmem>>, vector<256x128xbf16>
      %37 = arith.extf %36 : vector<256x128xbf16> to vector<256x128xf32>
      %cst_18 = arith.constant 2.000000e+00 : f32
      %38 = vector.broadcast %cst_18 : f32 to vector<256x128xf32>
      %39 = arith.mulf %38, %23 : vector<256x128xf32>
      %40 = arith.subf %39, %37 : vector<256x128xf32>
      %41 = arith.truncf %40 : vector<256x128xf32> to vector<256x128xbf16>
      %c0_i32_19 = arith.constant 0 : i32
      %c0_i32_20 = arith.constant 0 : i32
      %42 = tpu.memref_slice %arg9[%17, %c0_i32_19, %c0_i32_20] : memref<2x512x128xbf16, #tpu.memory_space<vmem>> -> memref<1x512x128xbf16, #tpu.memory_space<vmem>>
      %43 = tpu.memref_squeeze %42 : memref<1x512x128xbf16, #tpu.memory_space<vmem>> -> memref<512x128xbf16, #tpu.memory_space<vmem>>
      %44 = arith.index_cast %1 : i32 to index
      %c0_21 = arith.constant 0 : index
      %45 = vector.load %43[%44, %c0_21] : memref<512x128xbf16, #tpu.memory_space<vmem>>, vector<256x128xbf16>
      tpu.vector_store %43[%44, %c0_21], %41 {strides = array<i32>} : memref<512x128xbf16, #tpu.memory_space<vmem>>, vector<256x128xbf16>,
      %46 = arith.index_cast %1 : i32 to index
      %c0_22 = arith.constant 0 : index
      %47 = vector.load %arg10[%46, %c0_22] : memref<512x128xf32, #tpu.memory_space<vmem>>, vector<256x128xf32>
      %c1_i32_23 = arith.constant 1 : i32
      %48 = arith.addi %arg0, %c1_i32_23 : i32
      %49 = arith.index_cast %48 : i32 to index
      %50 = memref.load %arg2[%49] : memref<4xf32, #tpu.memory_space<smem>>
      %51 = vector.broadcast %50 : f32 to vector<256x128xf32>
      %52 = arith.mulf %51, %40 : vector<256x128xf32>
      %53 = arith.addf %47, %52 : vector<256x128xf32>
      %54 = arith.index_cast %1 : i32 to index
      %c0_24 = arith.constant 0 : index
      %55 = vector.load %arg10[%54, %c0_24] : memref<512x128xf32, #tpu.memory_space<vmem>>, vector<256x128xf32>
      tpu.vector_store %arg10[%54, %c0_24], %53 {strides = array<i32>} : memref<512x128xf32, #tpu.memory_space<vmem>>, vector<256x128xf32>,
    } else {
    }
    %c2_i32_13 = arith.constant 2 : i32
    %30 = arith.cmpi eq, %arg0, %c2_i32_13 : i32
    %31 = arith.extui %30 : i1 to i32
    %c0_i32_14 = arith.constant 0 : i32
    %32 = arith.cmpi ne, %31, %c0_i32_14 : i32
    scf.if %32 {
      %33 = arith.index_cast %1 : i32 to index
      %c0_15 = arith.constant 0 : index
      %34 = vector.load %arg10[%33, %c0_15] : memref<512x128xf32, #tpu.memory_space<vmem>>, vector<256x128xf32>
      %c0_16 = arith.constant 0 : index
      %c0_17 = arith.constant 0 : index
      %35 = vector.load %arg6[%c0_16, %c0_17] : memref<128x128xf32, #tpu.memory_space<vmem>>, vector<128x128xf32>
      %cst_18 = arith.constant dense<0.000000e+00> : vector<256x128xf32>
      %36 = tpu.matmul %34, %35, %cst_18 {dimension_numbers = #tpu.dot_dimension_numbers<[1], [0], [0], [1], [0, 0, 1, 1], [], []>} : vector<256x128xf32>, vector<128x128xf32>, vector<256x128xf32> -> vector<256x128xf32>
      %37 = tpu.iota {dimensions = array<i32: 1>} : vector<256x128xi32>
      %c4_i32 = arith.constant 4 : i32
      %38 = vector.broadcast %c4_i32 : i32 to vector<256x128xi32>
      %39 = arith.cmpi slt, %37, %38 : vector<256x128xi32>
      %cst_19 = arith.constant -1.000000e+30 : f32
      %40 = vector.broadcast %cst_19 : f32 to vector<256x128xf32>
      %41 = arith.select %39, %36, %40 : vector<256x128xi1>, vector<256x128xf32>
      %cst_20 = arith.constant dense<0xFF800000> : vector<256xf32>
      %42 = vector.multi_reduction <maximumf>, %41, %cst_20 [1] : vector<256x128xf32> to vector<256xf32>
      %43 = vector.shape_cast %42 : vector<256xf32> to vector<256x1xf32>
      %44 = vector.broadcast %43 : vector<256x1xf32> to vector<256x128xf32>
      %45 = arith.subf %41, %44 : vector<256x128xf32>
      %46 = math.exp %45 : vector<256x128xf32>
      %cst_21 = arith.constant dense<0.000000e+00> : vector<256xf32>
      %47 = vector.multi_reduction <add>, %46, %cst_21 [1] : vector<256x128xf32> to vector<256xf32>
      %48 = vector.shape_cast %47 : vector<256xf32> to vector<256x1xf32>
      %49 = math.log %48 : vector<256x1xf32>
      %50 = vector.broadcast %49 : vector<256x1xf32> to vector<256x128xf32>
      %51 = arith.subf %45, %50 : vector<256x128xf32>
      %52 = arith.index_cast %1 : i32 to index
      %c0_22 = arith.constant 0 : index
      %53 = vector.load %arg8[%52, %c0_22] : memref<512x128xf32, #tpu.memory_space<vmem>>, vector<256x128xf32>
      tpu.vector_store %arg8[%52, %c0_22], %51 {strides = array<i32>} : memref<512x128xf32, #tpu.memory_space<vmem>>, vector<256x128xf32>,
    } else {
    }
    return
  }
  func.func @transform_0(%arg0: i32, %arg1: i32, %arg2: memref<4xf32, #tpu.memory_space<smem>>) -> (i32, i32) {
    %c0_i32 = arith.constant 0 : i32
    %c0_i32_0 = arith.constant 0 : i32
    %c0_i32_1 = arith.constant 0 : i32
    return %c0_i32, %c0_i32_0 : i32, i32
  }
  func.func @transform_1(%arg0: i32, %arg1: i32, %arg2: memref<4xf32, #tpu.memory_space<smem>>) -> (i32, i32) {
    %c0_i32 = arith.constant 0 : i32
    %c0_i32_0 = arith.constant 0 : i32
    %c0_i32_1 = arith.constant 0 : i32
    return %c0_i32, %c0_i32_0 : i32, i32
  }
  func.func @transform_2(%arg0: i32, %arg1: i32, %arg2: memref<4xf32, #tpu.memory_space<smem>>) -> (i32, i32) {
    %c0_i32 = arith.constant 0 : i32
    %c0_i32_0 = arith.constant 0 : i32
    %c0_i32_1 = arith.constant 0 : i32
    return %c0_i32, %c0_i32_0 : i32, i32
  }
  func.func @transform_3(%arg0: i32, %arg1: i32, %arg2: memref<4xf32, #tpu.memory_space<smem>>) -> (i32, i32) {
    %c0_i32 = arith.constant 0 : i32
    %c0_i32_0 = arith.constant 0 : i32
    %c0_i32_1 = arith.constant 0 : i32
    return %c0_i32, %c0_i32_0 : i32, i32
  }
  func.func @transform_4(%arg0: i32, %arg1: i32, %arg2: memref<4xf32, #tpu.memory_space<smem>>) -> (i32, i32) {
    %c0_i32 = arith.constant 0 : i32
    %c0_i32_0 = arith.constant 0 : i32
    %c0_i32_1 = arith.constant 0 : i32
    return %c0_i32, %c0_i32_0 : i32, i32
  }
  func.func @transform_5(%arg0: i32, %arg1: i32, %arg2: memref<4xf32, #tpu.memory_space<smem>>) -> (i32, i32) {
    %c0_i32 = arith.constant 0 : i32
    %c0_i32_0 = arith.constant 0 : i32
    %c0_i32_1 = arith.constant 0 : i32
    return %c0_i32, %c0_i32_0 : i32, i32
  }
}

</mosaic_0001>

<bundles_post_ra>
// kernel: tpu_custom_call.1
= control target key start
LH: loop header
LB: loop body
LE: loop exit
PB: predicated region body
PF: predicated region fallthrough
CT: control target
= control target key end

     0   :  { %s5699_s0 = inlined_call_operand.vmem [shape: f32[4], index: 0, kind: input, shape index: {}]   ;;  %s5700_s1 = inlined_call_operand.vmem [shape: bf16[512,16], index: 1, kind: input, shape index: {}]   ;;  %s5701_s2 = inlined_call_operand.vmem [shape: bf16[16,128], index: 2, kind: input, shape index: {}]   ;;  %s5702_s3 = inlined_call_operand.vmem [shape: f32[1,128], index: 3, kind: input, shape index: {}]   ;;  %s5703_s4 = inlined_call_operand.vmem [shape: f32[128,128], index: 4, kind: input, shape index: {}]   ;;  %s5704_s5 = inlined_call_operand.hbm [shape: bf16[512,512], index: 5, kind: input, shape index: {}]   ;;  %s5705_s6 = inlined_call_operand.hbm [shape: f32[512,128], index: 6, kind: output, shape index: {}]  }
   0x1   :  { %s11_s23 = sshll.u32 %s5699_s0, 4  ;;  %s12_s23 = int_to_ptr.vmem [resolvable:$true] %s11_s23 }
   0x2   :  { %s4063_s24 = scalar_lea.vmem %s12_s23, 16  ;;  %p4068_p1 = scmp.lt.s32.totalorder %s12_s23, %s12_s23 }
   0x3   :  { %p4064_p0 = scmp.ne.s32.totalorder %s12_s23, %s4063_s24  ;;  %p4069_p2 = scmp.lt.s32.totalorder %s4063_s24, %s4063_s24 }
   0x5   :  { %p4070_p3 = por %p4069_p2, %p4068_p1 }
   0x7   :  { %p4071_p4 = pnand %p4070_p3, %p4064_p0 }
   0x9   :  { %4074 = shalt.err (!%p4071_p4)  }
   0xa   :  { %s4179_s25 = smov [#allocation5]  }
   0xb   :  { %14 = dma.vmem_to_smem %s12_s23, 16, %s4179_s25, [#allocation4] }
   0xc   :  { %4149 = dma.done.wait [#allocation4], 16 }
   0xd   :  { %4150 = vsyncadd [#allocation4], 4294967280 }
   0xe   :  { %16 = sfence }
   0xf   :  { %17 = vsyncpa [#allocation7], 0 }
  0x10   :  { %18 = vsyncpa [#allocation8], 0  ;;  %s4224_s26 = smov 0   ;;  %s4226_s27 = smov 0  }
  0x11   :  { %s4228_s0 = smov 0   ;;  %s4230_s28 = smov 0  }
  0x12   :  { %s4232_s29 = smov 0  }
  0x13 LB: > { %s3081_s30 = sadd.s32 4294967295, %s4177_s29   ;;  %s33_s7 = sadd.s32 1, %s4169_s0  ;;  %s4177_s29 = sphi %s4232_s29, %s24_s29   ;;  %s4173_s28 = sphi %s4230_s28, %s5718_s28   ;;  %s4169_s0 = sphi %s4228_s0, %s5717_s0   ;;  %s4165_s27 = sphi %s4226_s27, %s5716_s27   ;;  %s4161_s26 = sphi %s4224_s26, %s5715_s26  }
  0x14   : > { %p34_p5 = scmp.ge.s32.totalorder %s33_s7, 2  ;;  %s36_s8 = sadd.s32 1, %s4173_s28 }
  0x15   : > { %p3082_p6 = scmp.ge.s32.totalorder %s4177_s29, 1  ;;  %p167_p7 = scmp.lt.s32.totalorder %s4177_s29, 7 }
  0x16   : > { %s5720_s7 = smov (%p34_p5, %s33_s7), 0  ;;  %s5722_s8 = smov (!%p34_p5, %s36_s8), %s4173_s28 }
  0x17   : > { %p4257_p8 = pnand %p3082_p6, %p167_p7  ;;  %p38_p9 = scmp.ge.s32.totalorder %s5722_s8, 3 }
  0x18   : > { %p4263_p10 = scmp.eq.s32.totalorder %s3081_s30, 0  ;;  %s4180_s11 = smov [#allocation6]  }
  0x19   : > { %s5709_s9 = scalar_select %p4257_p8, 1, 0 }
  0x1a   : > { %s5710_s10 = scalar_select %p4263_p10, 1, 0 }
  0x1b   : > { %p3751_p11 = pneg %p4257_p8  ;;  %s5724_s8 = smov (%p38_p9, %s5722_s8), 0 }
  0x1c   : > { %s191_s12 = sshll.u32 %s4180_s11, 4  ;;  %s4075_s16 = scalar_lea.hbm %s5704_s5, 16384  ;;  %s192_s12 = int_to_ptr.vmem [resolvable:$true] %s191_s12 }
  0x1d   : > { %p4273_p12 = pnand %p4263_p10, %p3751_p11  ;;  %p4076_p13 = scmp.ne.s32.totalorder %s5704_s5, %s4075_s16 }
  0x1e   : > { %p4082_p3 = scmp.lt.u32.totalorder %s4075_s16, %s5704_s5 }
  0x1f   : > { %p4077_p0 = pneg %p4273_p12 }
  0x21   : > { %p4078_p1 = pnand %p4077_p0, %p4076_p13 }
  0x23   : > { %p4079_p2 = pneg %p4078_p1 }
  0x25   : > { %p4084_p4 = pnand %p4082_p3, %p4079_p2 }
  0x27   : > { %4087 = shalt.err (!%p4084_p4)
}
  0x28   : > { %s4088_s21 = scalar_lea.vmem %s192_s12, 16384  ;;  %p4096_p9 = scmp.lt.s32.totalorder %s192_s12, %s192_s12 }
  0x29   : > { %p4089_p5 = scmp.ne.s32.totalorder %s192_s12, %s4088_s21  ;;  %p4097_p11 = scmp.lt.s32.totalorder %s4088_s21, %s4088_s21 }
  0x2b   : > { %p4091_p6 = pnand %p4089_p5, %p4077_p0  ;;  %p4098_p10 = por %p4097_p11, %p4096_p9 }
  0x2d   : > { %p4092_p7 = pneg %p4091_p6 }
  0x2f   : > { %p4099_p8 = pnand %p4098_p10, %p4092_p7 }
  0x31   : > { %4102 = shalt.err (!%p4099_p8)
}
  0x32   : > { %s4181_s22 = smov 256   ;;  %s4182_s23 = smov 16  }
  0x33   : > { %3754 = dma.hbm_to_vmem [thread:$0]  (!%p4273_p12), %s5704_s5, 16384, %s192_s12, [#allocation7], %s4181_s22, %s4181_s22, %s4182_s23  }
  0x34   : > { %p5712_p13 = scmp.ne.s32.totalorder %s5709_s9, 0 }
  0x35   : > { %p5713_p1 = scmp.ne.s32.totalorder (!%p5712_p13), %s5710_s10, 0 }
  0x36   : > { %207 = sbr.rel (%p5712_p13) target bundleno = 1463 (0x5b7), region = 40 }
  0x3d   : > { %4152 = dma.done.wait (%p5713_p1), [#allocation7], 16384  }
  0x3e   : > { %4154 = vsyncadd (%p5713_p1), [#allocation7], 4294950912  ;;  %s4300_s11 = sshll.u32 %s4161_s26, 8  ;;  %p227_p8 = scmp.eq.s32.totalorder %s4165_s27, 0 }
  0x3f   : > { %p228_p10 = scmp.eq.s32.totalorder %s4161_s26, 0 }
  0x41   : > { %p229_p0 = pnand %p228_p10, %p227_p8 }
  0x42   : > { %v3806_v0 = vld [vmem:[%s5701_s2] sm:$0xff] (!%p229_p0)   ;;  %vm472_vm0 = vcmask (!%p229_p0), 130048   ;;  %v3809_v3 = vld [vmem:[%s5700_s1 + $0x8] sm:$0xff] (!%p229_p0)   ;;  %v3811_v5 = vld [vmem:[%s5700_s1 + $0x10] sm:$0xff] (!%p229_p0)   ;;  %s986_s24 = sld [smem:[#allocation5]] (!%p229_p0) }
  0x43   : > { %232 = sbr.rel (%p229_p0) target bundleno = 352 (0x160), region = 48  ;;  %v3807_v1 = vld [vmem:[%s5700_s1] sm:$0xff] (!%p229_p0)   ;;  %3547 = vmatprep.subr.bf16.mxu0 (!%p229_p0), %v3806_v0  ;;  %3725 = vmatprep.subr.bf16.mxu1 (!%p229_p0), %v3806_v0  ;;  %v3810_v4 = vld [vmem:[%s5700_s1 + $0x88] sm:$0xff] (!%p229_p0)   ;;  %v3812_v6 = vld [vmem:[%s5700_s1 + $0x90] sm:$0xff] (!%p229_p0)  }
  0x44   : > { %v3808_v2 = vld [vmem:[%s5700_s1 + $0x80] sm:$0xff] (!%p229_p0)   ;;  %3548 = vmatpush3.bf16.msra.mxu0 (!%p229_p0), %v3806_v0  ;;  %3726 = vmatpush3.bf16.msra.mxu1 (!%p229_p0), %v3806_v0  ;;  %v3813_v7 = vld [vmem:[%s5700_s1 + $0x18] sm:$0xff] (!%p229_p0)   ;;  %v3817_v11 = vld [vmem:[%s5700_s1 + $0x28] sm:$0xff] (!%p229_p0)  }
  0x45   : > { %3549 = vmatprep.mubr.msk.bf16.mxu0 (!%p229_p0), %vm472_vm0, %v3807_v1  ;;  %3581 = vmatprep.mubr.msk.bf16.mxu1 (!%p229_p0), %vm472_vm0, %v3808_v2  ;;  %v3814_v8 = vld [vmem:[%s5700_s1 + $0x98] sm:$0xff] (!%p229_p0)   ;;  %v3815_v9 = vld [vmem:[%s5700_s1 + $0x20] sm:$0xff] (!%p229_p0)   ;;  %v3818_v12 = vld [vmem:[%s5700_s1 + $0xa8] sm:$0xff] (!%p229_p0)  }
  0x46   : > { %v3816_v10 = vld [vmem:[%s5700_s1 + $0xa0] sm:$0xff] (!%p229_p0)   ;;  %v3819_v13 = vld [vmem:[%s5700_s1 + $0x30] sm:$0xff] (!%p229_p0)   ;;  %v3821_v15 = vld [vmem:[%s5700_s1 + $0x38] sm:$0xff] (!%p229_p0)  }
  0x47   : > { %3550 = vmatmul.mubr.msk.bf16.vlgmr.msra.gmra.mrb[0].mxu0 (!%p229_p0), %vm472_vm0, %v3809_v3  ;;  %3582 = vmatmul.mubr.msk.bf16.vlgmr.msra.gmra.mrb[0].mxu1 (!%p229_p0), %vm472_vm0, %v3810_v4  ;;  %v3820_v14 = vld [vmem:[%s5700_s1 + $0xb0] sm:$0xff] (!%p229_p0)   ;;  %v3822_v16 = vld [vmem:[%s5700_s1 + $0xb8] sm:$0xff] (!%p229_p0)   ;;  %v3823_v17 = vld [vmem:[%s5700_s1 + $0x40] sm:$0xff] (!%p229_p0)  }
  0x48   : > { %3553 = vmatprep.mubr.msk.bf16.mxu0 (!%p229_p0), %vm472_vm0, %v3811_v5  ;;  %3585 = vmatprep.mubr.msk.bf16.mxu1 (!%p229_p0), %vm472_vm0, %v3812_v6  ;;  %v3824_v18 = vld [vmem:[%s5700_s1 + $0xc0] sm:$0xff] (!%p229_p0)   ;;  %v3825_v19 = vld [vmem:[%s5700_s1 + $0x48] sm:$0xff] (!%p229_p0)   ;;  %v3827_v21 = vld [vmem:[%s5700_s1 + $0x50] sm:$0xff] (!%p229_p0)   ;;  %v4442_v40 = vstv (!%p229_p0), %s986_s24 }
  0x49   : > { %v3826_v20 = vld [vmem:[%s5700_s1 + $0xc8] sm:$0xff] (!%p229_p0)   ;;  %v3828_v22 = vld [vmem:[%s5700_s1 + $0xd0] sm:$0xff] (!%p229_p0)   ;;  %v3829_v23 = vld [vmem:[%s5700_s1 + $0x58] sm:$0xff] (!%p229_p0)  }
  0x4a   : > { %v3830_v24 = vld [vmem:[%s5700_s1 + $0xd8] sm:$0xff]   ;;  %v3831_v25 = vld [vmem:[%s5700_s1 + $0x60] sm:$0xff]   ;;  %v3833_v27 = vld [vmem:[%s5700_s1 + $0x68] sm:$0xff]  }
  0x4b   : > { %v3832_v26 = vld [vmem:[%s5700_s1 + $0xe0] sm:$0xff]   ;;  %v3834_v28 = vld [vmem:[%s5700_s1 + $0xe8] sm:$0xff]   ;;  %v3835_v29 = vld [vmem:[%s5700_s1 + $0x70] sm:$0xff]  }
  0x4c   : > { %v3836_v30 = vld [vmem:[%s5700_s1 + $0xf0] sm:$0xff]   ;;  %v3837_v31 = vld [vmem:[%s5700_s1 + $0x78] sm:$0xff]   ;;  %v4438_v33 = vld [vmem:[%s5702_s3] ss:$0 sm:$0xff] }
  0x4d   : > { %v3838_v32 = vld [vmem:[%s5700_s1 + $0xf8] sm:$0xff]  }
  0x4f   : > { %3554 = vmatmul.mubr.msk.bf16.gmra.mrb[4].mxu0 %vm472_vm0, %v3813_v7  ;;  %3586 = vmatmul.mubr.msk.bf16.gmra.mrb[4].mxu1 %vm472_vm0, %v3814_v8 }
  0x50   : > { %3557 = vmatprep.mubr.msk.bf16.mxu0 %vm472_vm0, %v3815_v9  ;;  %3589 = vmatprep.mubr.msk.bf16.mxu1 %vm472_vm0, %v3816_v10 }
  0x57   : > { %3558 = vmatmul.mubr.msk.bf16.gmra.mrb[8].mxu0 %vm472_vm0, %v3817_v11  ;;  %3590 = vmatmul.mubr.msk.bf16.gmra.mrb[8].mxu1 %vm472_vm0, %v3818_v12 }
  0x58   : > { %3561 = vmatprep.mubr.msk.bf16.mxu0 %vm472_vm0, %v3819_v13  ;;  %3593 = vmatprep.mubr.msk.bf16.mxu1 %vm472_vm0, %v3820_v14 }
  0x5f   : > { %3562 = vmatmul.mubr.msk.bf16.gmra.mrb[12].mxu0 %vm472_vm0, %v3821_v15  ;;  %3594 = vmatmul.mubr.msk.bf16.gmra.mrb[12].mxu1 %vm472_vm0, %v3822_v16 }
  0x60   : > { %3565 = vmatprep.mubr.msk.bf16.mxu0 %vm472_vm0, %v3823_v17  ;;  %3597 = vmatprep.mubr.msk.bf16.mxu1 %vm472_vm0, %v3824_v18 }
  0x67   : > { %3566 = vmatmul.mubr.msk.bf16.gmra.mrb[16].mxu0 %vm472_vm0, %v3825_v19  ;;  %3598 = vmatmul.mubr.msk.bf16.gmra.mrb[16].mxu1 %vm472_vm0, %v3826_v20 }
  0x68   : > { %3569 = vmatprep.mubr.msk.bf16.mxu0 %vm472_vm0, %v3827_v21  ;;  %3601 = vmatprep.mubr.msk.bf16.mxu1 %vm472_vm0, %v3828_v22 }
  0x6f   : > { %3570 = vmatmul.mubr.msk.bf16.gmra.mrb[20].mxu0 %vm472_vm0, %v3829_v23  ;;  %3602 = vmatmul.mubr.msk.bf16.gmra.mrb[20].mxu1 %vm472_vm0, %v3830_v24 }
  0x70   : > { %3573 = vmatprep.mubr.msk.bf16.mxu0 %vm472_vm0, %v3831_v25  ;;  %3605 = vmatprep.mubr.msk.bf16.mxu1 %vm472_vm0, %v3832_v26 }
  0x77   : > { %3574 = vmatmul.mubr.msk.bf16.gmra.mrb[24].mxu0 %vm472_vm0, %v3833_v27  ;;  %3606 = vmatmul.mubr.msk.bf16.gmra.mrb[24].mxu1 %vm472_vm0, %v3834_v28 }
  0x78   : > { %3577 = vmatprep.mubr.msk.bf16.mxu0 %vm472_vm0, %v3835_v29  ;;  %3609 = vmatprep.mubr.msk.bf16.mxu1 %vm472_vm0, %v3836_v30 }
  0x7f   : > { %3578 = vmatmul.mubr.msk.bf16.gmra.mrb[28].mxu0 %vm472_vm0, %v3837_v31  ;;  %3610 = vmatmul.mubr.msk.bf16.gmra.mrb[28].mxu1 %vm472_vm0, %v3838_v32 }
 0x11a   : > { %v3551_v34 = vpop.f32.mrb[0].mxu0  ;;  %v3583_v35 = vpop.f32.mrb[0].mxu1 }
 0x11b   : > { %v612_v36 = vadd.f32 %v3551_v34, %v4438_v33  ;;  %v740_v37 = vadd.f32 %v3583_v35, %v4438_v33  ;;  %v603_v38 = vpop.f32.mrb[1].mxu0  ;;  %v731_v39 = vpop.f32.mrb[1].mxu1 }
 0x11c   : > { %v604_v41 = vadd.f32 %v4438_v33, %v603_v38  ;;  %v732_v42 = vadd.f32 %v4438_v33, %v731_v39  ;;  %v3552_v43 = vpop.f32.mrb[2].mxu0  ;;  %v3584_v44 = vpop.f32.mrb[2].mxu1 }
 0x11d   : > { %v860_v45 = vmax.f32 %v612_v36, 0.0  ;;  %v892_v46 = vmax.f32 %v740_v37, 0.0  ;;  %v615_v47 = vadd.f32 %v3552_v43, %v4438_v33  ;;  %v743_v48 = vadd.f32 %v3584_v44, %v4438_v33  ;;  %v606_v49 = vpop.f32.mrb[3].mxu0  ;;  %v734_v50 = vpop.f32.mrb[3].mxu1 }
 0x11e   : > { %v858_v51 = vmax.f32 %v604_v41, 0.0  ;;  %v890_v52 = vmax.f32 %v732_v42, 0.0  ;;  %v607_v53 = vadd.f32 %v4438_v33, %v606_v49  ;;  %v735_v54 = vadd.f32 %v4438_v33, %v734_v50 }
 0x11f   : > { %v990_v55 = vmul.f32 %v4442_v40, %v860_v45  ;;  %v1022_v56 = vmul.f32 %v4442_v40, %v892_v46  ;;  %v861_v57 = vmax.f32 %v615_v47, 0.0  ;;  %v893_v58 = vmax.f32 %v743_v48, 0.0 }
 0x120   : > { %v988_v59 = vmul.f32 %v4442_v40, %v858_v51  ;;  %v1020_v60 = vmul.f32 %v4442_v40, %v890_v52  ;;  %v859_v61 = vmax.f32 %v607_v53, 0.0  ;;  %v891_v62 = vmax.f32 %v735_v54, 0.0 }
 0x121   : > { %1054 = vst [vmem:[#allocation3 + $0x10] sm:$0xff] %v990_v55  ;;  %1086 = vst [vmem:[#allocation3 + $0x110] sm:$0xff] %v1022_v56  ;;  %v923_v63 = vpack.c.bf16 %v861_v57, %v860_v45  ;;  %v991_v0 = vmul.f32 %v4442_v40, %v861_v57  ;;  %v939_v1 = vpack.c.bf16 %v893_v58, %v892_v46 }
 0x122   : > { %v1023_v2 = vmul.f32 %v4442_v40, %v893_v58  ;;  %1052 = vst [vmem:[#allocation3] sm:$0xff] %v988_v59  ;;  %1084 = vst [vmem:[#allocation3 + $0x100] sm:$0xff] %v1020_v60  ;;  %v922_v3 = vpack.c.bf16 %v859_v61, %v858_v51  ;;  %v989_v4 = vmul.f32 %v4442_v40, %v859_v61  ;;  %v3555_v7 = vpop.f32.mrb[4].mxu0  ;;  %v3587_v8 = vpop.f32.mrb[4].mxu1 }
 0x123   : > { %v938_v5 = vpack.c.bf16 %v891_v62, %v890_v52  ;;  %v1021_v6 = vmul.f32 %v4442_v40, %v891_v62  ;;  %955 = vst [vmem:[#allocation2 + $0x8] sm:$0xff] %v923_v63  ;;  %1055 = vst [vmem:[#allocation3 + $0x18] sm:$0xff] %v991_v0  ;;  %v628_v9 = vadd.f32 %v3555_v7, %v4438_v33  ;;  %v619_v11 = vpop.f32.mrb[5].mxu0  ;;  %v747_v12 = vpop.f32.mrb[5].mxu1 }
 0x124   : > { %971 = vst [vmem:[#allocation2 + $0x88] sm:$0xff] %v939_v1  ;;  %1087 = vst [vmem:[#allocation3 + $0x118] sm:$0xff] %v1023_v2  ;;  %v756_v10 = vadd.f32 %v3587_v8, %v4438_v33  ;;  %v620_v13 = vadd.f32 %v4438_v33, %v619_v11  ;;  %v748_v14 = vadd.f32 %v4438_v33, %v747_v12  ;;  %v3556_v15 = vpop.f32.mrb[6].mxu0  ;;  %v3588_v16 = vpop.f32.mrb[6].mxu1 }
 0x125   : > { %954 = vst [vmem:[#allocation2] sm:$0xff] %v922_v3  ;;  %1053 = vst [vmem:[#allocation3 + $0x8] sm:$0xff] %v989_v4  ;;  %v864_v17 = vmax.f32 %v628_v9, 0.0  ;;  %v631_v19 = vadd.f32 %v3556_v15, %v4438_v33  ;;  %v759_v20 = vadd.f32 %v3588_v16, %v4438_v33  ;;  %v622_v21 = vpop.f32.mrb[7].mxu0  ;;  %v750_v22 = vpop.f32.mrb[7].mxu1 }
 0x126   : > { %970 = vst [vmem:[#allocation2 + $0x80] sm:$0xff] %v938_v5  ;;  %1085 = vst [vmem:[#allocation3 + $0x108] sm:$0xff] %v1021_v6  ;;  %v896_v18 = vmax.f32 %v756_v10, 0.0  ;;  %v862_v23 = vmax.f32 %v620_v13, 0.0  ;;  %v894_v24 = vmax.f32 %v748_v14, 0.0  ;;  %v623_v25 = vadd.f32 %v4438_v33, %v622_v21 }
 0x127   : > { %v751_v26 = vadd.f32 %v4438_v33, %v750_v22  ;;  %v994_v27 = vmul.f32 %v4442_v40, %v864_v17  ;;  %v865_v29 = vmax.f32 %v631_v19, 0.0  ;;  %v897_v30 = vmax.f32 %v759_v20, 0.0 }
 0x128   : > { %v1026_v28 = vmul.f32 %v4442_v40, %v896_v18  ;;  %v992_v31 = vmul.f32 %v4442_v40, %v862_v23  ;;  %v1024_v32 = vmul.f32 %v4442_v40, %v894_v24  ;;  %v863_v34 = vmax.f32 %v623_v25, 0.0 }
 0x129   : > { %v895_v35 = vmax.f32 %v751_v26, 0.0  ;;  %1058 = vst [vmem:[#allocation3 + $0x30] sm:$0xff] %v994_v27  ;;  %v925_v36 = vpack.c.bf16 %v865_v29, %v864_v17  ;;  %v995_v37 = vmul.f32 %v4442_v40, %v865_v29  ;;  %v941_v38 = vpack.c.bf16 %v897_v30, %v896_v18 }
 0x12a   : > { %1090 = vst [vmem:[#allocation3 + $0x130] sm:$0xff] %v1026_v28  ;;  %v1027_v39 = vmul.f32 %v4442_v40, %v897_v30  ;;  %1056 = vst [vmem:[#allocation3 + $0x20] sm:$0xff] %v992_v31  ;;  %v924_v41 = vpack.c.bf16 %v863_v34, %v862_v23  ;;  %v993_v42 = vmul.f32 %v4442_v40, %v863_v34  ;;  %v3559_v45 = vpop.f32.mrb[8].mxu0  ;;  %v3591_v46 = vpop.f32.mrb[8].mxu1 }
 0x12b   : > { %1088 = vst [vmem:[#allocation3 + $0x120] sm:$0xff] %v1024_v32  ;;  %v940_v43 = vpack.c.bf16 %v895_v35, %v894_v24  ;;  %v1025_v44 = vmul.f32 %v4442_v40, %v895_v35  ;;  %957 = vst [vmem:[#allocation2 + $0x18] sm:$0xff] %v925_v36  ;;  %v644_v47 = vadd.f32 %v3559_v45, %v4438_v33  ;;  %v635_v49 = vpop.f32.mrb[9].mxu0  ;;  %v763_v50 = vpop.f32.mrb[9].mxu1 }
 0x12c   : > { %1059 = vst [vmem:[#allocation3 + $0x38] sm:$0xff] %v995_v37  ;;  %973 = vst [vmem:[#allocation2 + $0x98] sm:$0xff] %v941_v38  ;;  %v772_v48 = vadd.f32 %v3591_v46, %v4438_v33  ;;  %v636_v51 = vadd.f32 %v4438_v33, %v635_v49  ;;  %v764_v52 = vadd.f32 %v4438_v33, %v763_v50  ;;  %v3560_v53 = vpop.f32.mrb[10].mxu0  ;;  %v3592_v54 = vpop.f32.mrb[10].mxu1 }
 0x12d   : > { %1091 = vst [vmem:[#allocation3 + $0x138] sm:$0xff] %v1027_v39  ;;  %956 = vst [vmem:[#allocation2 + $0x10] sm:$0xff] %v924_v41  ;;  %v868_v55 = vmax.f32 %v644_v47, 0.0  ;;  %v647_v57 = vadd.f32 %v3560_v53, %v4438_v33  ;;  %v775_v58 = vadd.f32 %v3592_v54, %v4438_v33  ;;  %v638_v59 = vpop.f32.mrb[11].mxu0  ;;  %v766_v60 = vpop.f32.mrb[11].mxu1 }
 0x12e   : > { %1057 = vst [vmem:[#allocation3 + $0x28] sm:$0xff] %v993_v42  ;;  %972 = vst [vmem:[#allocation2 + $0x90] sm:$0xff] %v940_v43  ;;  %v900_v56 = vmax.f32 %v772_v48, 0.0  ;;  %v866_v61 = vmax.f32 %v636_v51, 0.0  ;;  %v898_v62 = vmax.f32 %v764_v52, 0.0  ;;  %v639_v63 = vadd.f32 %v4438_v33, %v638_v59 }
 0x12f   : > { %1089 = vst [vmem:[#allocation3 + $0x128] sm:$0xff] %v1025_v44  ;;  %v767_v0 = vadd.f32 %v4438_v33, %v766_v60  ;;  %v998_v1 = vmul.f32 %v4442_v40, %v868_v55  ;;  %v869_v3 = vmax.f32 %v647_v57, 0.0  ;;  %v901_v4 = vmax.f32 %v775_v58, 0.0 }
 0x130   : > { %v1030_v2 = vmul.f32 %v4442_v40, %v900_v56  ;;  %v996_v5 = vmul.f32 %v4442_v40, %v866_v61  ;;  %v1028_v6 = vmul.f32 %v4442_v40, %v898_v62  ;;  %v867_v7 = vmax.f32 %v639_v63, 0.0 }
 0x131   : > { %v899_v8 = vmax.f32 %v767_v0, 0.0  ;;  %1062 = vst [vmem:[#allocation3 + $0x50] sm:$0xff] %v998_v1  ;;  %v927_v9 = vpack.c.bf16 %v869_v3, %v868_v55  ;;  %v999_v10 = vmul.f32 %v4442_v40, %v869_v3  ;;  %v943_v11 = vpack.c.bf16 %v901_v4, %v900_v56 }
 0x132   : > { %1094 = vst [vmem:[#allocation3 + $0x150] sm:$0xff] %v1030_v2  ;;  %v1031_v12 = vmul.f32 %v4442_v40, %v901_v4  ;;  %1060 = vst [vmem:[#allocation3 + $0x40] sm:$0xff] %v996_v5  ;;  %v926_v13 = vpack.c.bf16 %v867_v7, %v866_v61  ;;  %v997_v14 = vmul.f32 %v4442_v40, %v867_v7  ;;  %v3563_v17 = vpop.f32.mrb[12].mxu0  ;;  %v3595_v18 = vpop.f32.mrb[12].mxu1 }
 0x133   : > { %1092 = vst [vmem:[#allocation3 + $0x140] sm:$0xff] %v1028_v6  ;;  %v942_v15 = vpack.c.bf16 %v899_v8, %v898_v62  ;;  %v1029_v16 = vmul.f32 %v4442_v40, %v899_v8  ;;  %959 = vst [vmem:[#allocation2 + $0x28] sm:$0xff] %v927_v9  ;;  %v660_v19 = vadd.f32 %v3563_v17, %v4438_v33  ;;  %v651_v21 = vpop.f32.mrb[13].mxu0  ;;  %v779_v22 = vpop.f32.mrb[13].mxu1 }
 0x134   : > { %1063 = vst [vmem:[#allocation3 + $0x58] sm:$0xff] %v999_v10  ;;  %975 = vst [vmem:[#allocation2 + $0xa8] sm:$0xff] %v943_v11  ;;  %v788_v20 = vadd.f32 %v3595_v18, %v4438_v33  ;;  %v652_v23 = vadd.f32 %v4438_v33, %v651_v21  ;;  %v780_v24 = vadd.f32 %v4438_v33, %v779_v22  ;;  %v3564_v25 = vpop.f32.mrb[14].mxu0  ;;  %v3596_v26 = vpop.f32.mrb[14].mxu1 }
 0x135   : > { %1095 = vst [vmem:[#allocation3 + $0x158] sm:$0xff] %v1031_v12  ;;  %958 = vst [vmem:[#allocation2 + $0x20] sm:$0xff] %v926_v13  ;;  %v872_v27 = vmax.f32 %v660_v19, 0.0  ;;  %v663_v29 = vadd.f32 %v3564_v25, %v4438_v33  ;;  %v791_v30 = vadd.f32 %v3596_v26, %v4438_v33  ;;  %v654_v31 = vpop.f32.mrb[15].mxu0  ;;  %v782_v32 = vpop.f32.mrb[15].mxu1 }
 0x136   : > { %1061 = vst [vmem:[#allocation3 + $0x48] sm:$0xff] %v997_v14  ;;  %974 = vst [vmem:[#allocation2 + $0xa0] sm:$0xff] %v942_v15  ;;  %v904_v28 = vmax.f32 %v788_v20, 0.0  ;;  %v870_v34 = vmax.f32 %v652_v23, 0.0  ;;  %v902_v35 = vmax.f32 %v780_v24, 0.0  ;;  %v655_v36 = vadd.f32 %v4438_v33, %v654_v31 }
 0x137   : > { %1093 = vst [vmem:[#allocation3 + $0x148] sm:$0xff] %v1029_v16  ;;  %v783_v37 = vadd.f32 %v4438_v33, %v782_v32  ;;  %v1002_v38 = vmul.f32 %v4442_v40, %v872_v27  ;;  %v873_v41 = vmax.f32 %v663_v29, 0.0  ;;  %v905_v42 = vmax.f32 %v791_v30, 0.0 }
 0x138   : > { %v1034_v39 = vmul.f32 %v4442_v40, %v904_v28  ;;  %v1000_v43 = vmul.f32 %v4442_v40, %v870_v34  ;;  %v1032_v44 = vmul.f32 %v4442_v40, %v902_v35  ;;  %v871_v45 = vmax.f32 %v655_v36, 0.0 }
 0x139   : > { %v903_v46 = vmax.f32 %v783_v37, 0.0  ;;  %1066 = vst [vmem:[#allocation3 + $0x70] sm:$0xff] %v1002_v38  ;;  %v929_v47 = vpack.c.bf16 %v873_v41, %v872_v27  ;;  %v1003_v48 = vmul.f32 %v4442_v40, %v873_v41  ;;  %v945_v49 = vpack.c.bf16 %v905_v42, %v904_v28 }
 0x13a   : > { %1098 = vst [vmem:[#allocation3 + $0x170] sm:$0xff] %v1034_v39  ;;  %v1035_v50 = vmul.f32 %v4442_v40, %v905_v42  ;;  %1064 = vst [vmem:[#allocation3 + $0x60] sm:$0xff] %v1000_v43  ;;  %v928_v51 = vpack.c.bf16 %v871_v45, %v870_v34  ;;  %v1001_v52 = vmul.f32 %v4442_v40, %v871_v45  ;;  %v3567_v55 = vpop.f32.mrb[16].mxu0  ;;  %v3599_v56 = vpop.f32.mrb[16].mxu1 }
 0x13b   : > { %1096 = vst [vmem:[#allocation3 + $0x160] sm:$0xff] %v1032_v44  ;;  %v944_v53 = vpack.c.bf16 %v903_v46, %v902_v35  ;;  %v1033_v54 = vmul.f32 %v4442_v40, %v903_v46  ;;  %961 = vst [vmem:[#allocation2 + $0x38] sm:$0xff] %v929_v47  ;;  %v676_v57 = vadd.f32 %v3567_v55, %v4438_v33  ;;  %v667_v59 = vpop.f32.mrb[17].mxu0  ;;  %v795_v60 = vpop.f32.mrb[17].mxu1 }
 0x13c   : > { %1067 = vst [vmem:[#allocation3 + $0x78] sm:$0xff] %v1003_v48  ;;  %977 = vst [vmem:[#allocation2 + $0xb8] sm:$0xff] %v945_v49  ;;  %v804_v58 = vadd.f32 %v3599_v56, %v4438_v33  ;;  %v668_v61 = vadd.f32 %v4438_v33, %v667_v59  ;;  %v796_v62 = vadd.f32 %v4438_v33, %v795_v60  ;;  %v3568_v63 = vpop.f32.mrb[18].mxu0  ;;  %v3600_v0 = vpop.f32.mrb[18].mxu1 }
 0x13d   : > { %1099 = vst [vmem:[#allocation3 + $0x178] sm:$0xff] %v1035_v50  ;;  %960 = vst [vmem:[#allocation2 + $0x30] sm:$0xff] %v928_v51  ;;  %v876_v1 = vmax.f32 %v676_v57, 0.0  ;;  %v679_v3 = vadd.f32 %v3568_v63, %v4438_v33  ;;  %v807_v4 = vadd.f32 %v3600_v0, %v4438_v33  ;;  %v670_v5 = vpop.f32.mrb[19].mxu0  ;;  %v798_v6 = vpop.f32.mrb[19].mxu1 }
 0x13e   : > { %1065 = vst [vmem:[#allocation3 + $0x68] sm:$0xff] %v1001_v52  ;;  %976 = vst [vmem:[#allocation2 + $0xb0] sm:$0xff] %v944_v53  ;;  %v908_v2 = vmax.f32 %v804_v58, 0.0  ;;  %v874_v7 = vmax.f32 %v668_v61, 0.0  ;;  %v906_v8 = vmax.f32 %v796_v62, 0.0  ;;  %v671_v9 = vadd.f32 %v4438_v33, %v670_v5 }
 0x13f   : > { %1097 = vst [vmem:[#allocation3 + $0x168] sm:$0xff] %v1033_v54  ;;  %v799_v10 = vadd.f32 %v4438_v33, %v798_v6  ;;  %v1006_v11 = vmul.f32 %v4442_v40, %v876_v1  ;;  %v877_v13 = vmax.f32 %v679_v3, 0.0  ;;  %v909_v14 = vmax.f32 %v807_v4, 0.0 }
 0x140   : > { %v1038_v12 = vmul.f32 %v4442_v40, %v908_v2  ;;  %v1004_v15 = vmul.f32 %v4442_v40, %v874_v7  ;;  %v1036_v16 = vmul.f32 %v4442_v40, %v906_v8  ;;  %v875_v17 = vmax.f32 %v671_v9, 0.0 }
 0x141   : > { %v907_v18 = vmax.f32 %v799_v10, 0.0  ;;  %1070 = vst [vmem:[#allocation3 + $0x90] sm:$0xff] %v1006_v11  ;;  %v931_v19 = vpack.c.bf16 %v877_v13, %v876_v1  ;;  %v1007_v20 = vmul.f32 %v4442_v40, %v877_v13  ;;  %v947_v21 = vpack.c.bf16 %v909_v14, %v908_v2 }
 0x142   : > { %1102 = vst [vmem:[#allocation3 + $0x190] sm:$0xff] %v1038_v12  ;;  %v1039_v22 = vmul.f32 %v4442_v40, %v909_v14  ;;  %1068 = vst [vmem:[#allocation3 + $0x80] sm:$0xff] %v1004_v15  ;;  %v930_v23 = vpack.c.bf16 %v875_v17, %v874_v7  ;;  %v1005_v24 = vmul.f32 %v4442_v40, %v875_v17  ;;  %v3571_v27 = vpop.f32.mrb[20].mxu0  ;;  %v3603_v28 = vpop.f32.mrb[20].mxu1 }
 0x143   : > { %1100 = vst [vmem:[#allocation3 + $0x180] sm:$0xff] %v1036_v16  ;;  %v946_v25 = vpack.c.bf16 %v907_v18, %v906_v8  ;;  %v1037_v26 = vmul.f32 %v4442_v40, %v907_v18  ;;  %963 = vst [vmem:[#allocation2 + $0x48] sm:$0xff] %v931_v19  ;;  %v692_v29 = vadd.f32 %v3571_v27, %v4438_v33  ;;  %v683_v31 = vpop.f32.mrb[21].mxu0  ;;  %v811_v32 = vpop.f32.mrb[21].mxu1 }
 0x144   : > { %1071 = vst [vmem:[#allocation3 + $0x98] sm:$0xff] %v1007_v20  ;;  %979 = vst [vmem:[#allocation2 + $0xc8] sm:$0xff] %v947_v21  ;;  %v820_v30 = vadd.f32 %v3603_v28, %v4438_v33  ;;  %v684_v34 = vadd.f32 %v4438_v33, %v683_v31  ;;  %v812_v35 = vadd.f32 %v4438_v33, %v811_v32  ;;  %v3572_v36 = vpop.f32.mrb[22].mxu0  ;;  %v3604_v37 = vpop.f32.mrb[22].mxu1 }
 0x145   : > { %1103 = vst [vmem:[#allocation3 + $0x198] sm:$0xff] %v1039_v22  ;;  %962 = vst [vmem:[#allocation2 + $0x40] sm:$0xff] %v930_v23  ;;  %v880_v38 = vmax.f32 %v692_v29, 0.0  ;;  %v695_v41 = vadd.f32 %v3572_v36, %v4438_v33  ;;  %v823_v42 = vadd.f32 %v3604_v37, %v4438_v33  ;;  %v686_v43 = vpop.f32.mrb[23].mxu0  ;;  %v814_v44 = vpop.f32.mrb[23].mxu1 }
 0x146   : > { %1069 = vst [vmem:[#allocation3 + $0x88] sm:$0xff] %v1005_v24  ;;  %978 = vst [vmem:[#allocation2 + $0xc0] sm:$0xff] %v946_v25  ;;  %v912_v39 = vmax.f32 %v820_v30, 0.0  ;;  %v878_v45 = vmax.f32 %v684_v34, 0.0  ;;  %v910_v46 = vmax.f32 %v812_v35, 0.0  ;;  %v687_v47 = vadd.f32 %v4438_v33, %v686_v43 }
 0x147   : > { %1101 = vst [vmem:[#allocation3 + $0x188] sm:$0xff] %v1037_v26  ;;  %v815_v48 = vadd.f32 %v4438_v33, %v814_v44  ;;  %v1010_v49 = vmul.f32 %v4442_v40, %v880_v38  ;;  %v881_v51 = vmax.f32 %v695_v41, 0.0  ;;  %v913_v52 = vmax.f32 %v823_v42, 0.0 }
 0x148   : > { %v1042_v50 = vmul.f32 %v4442_v40, %v912_v39  ;;  %v1008_v53 = vmul.f32 %v4442_v40, %v878_v45  ;;  %v1040_v54 = vmul.f32 %v4442_v40, %v910_v46  ;;  %v879_v55 = vmax.f32 %v687_v47, 0.0 }
 0x149   : > { %v911_v56 = vmax.f32 %v815_v48, 0.0  ;;  %1074 = vst [vmem:[#allocation3 + $0xb0] sm:$0xff] %v1010_v49  ;;  %v933_v57 = vpack.c.bf16 %v881_v51, %v880_v38  ;;  %v1011_v58 = vmul.f32 %v4442_v40, %v881_v51  ;;  %v949_v59 = vpack.c.bf16 %v913_v52, %v912_v39 }
 0x14a   : > { %1106 = vst [vmem:[#allocation3 + $0x1b0] sm:$0xff] %v1042_v50  ;;  %v1043_v60 = vmul.f32 %v4442_v40, %v913_v52  ;;  %1072 = vst [vmem:[#allocation3 + $0xa0] sm:$0xff] %v1008_v53  ;;  %v932_v61 = vpack.c.bf16 %v879_v55, %v878_v45  ;;  %v1009_v62 = vmul.f32 %v4442_v40, %v879_v55  ;;  %v3575_v1 = vpop.f32.mrb[24].mxu0  ;;  %v3607_v2 = vpop.f32.mrb[24].mxu1 }
 0x14b   : > { %1104 = vst [vmem:[#allocation3 + $0x1a0] sm:$0xff] %v1040_v54  ;;  %v948_v63 = vpack.c.bf16 %v911_v56, %v910_v46  ;;  %v1041_v0 = vmul.f32 %v4442_v40, %v911_v56  ;;  %965 = vst [vmem:[#allocation2 + $0x58] sm:$0xff] %v933_v57  ;;  %v708_v3 = vadd.f32 %v3575_v1, %v4438_v33  ;;  %v699_v5 = vpop.f32.mrb[25].mxu0  ;;  %v827_v6 = vpop.f32.mrb[25].mxu1 }
 0x14c   : > { %1075 = vst [vmem:[#allocation3 + $0xb8] sm:$0xff] %v1011_v58  ;;  %981 = vst [vmem:[#allocation2 + $0xd8] sm:$0xff] %v949_v59  ;;  %v836_v4 = vadd.f32 %v3607_v2, %v4438_v33  ;;  %v700_v7 = vadd.f32 %v4438_v33, %v699_v5  ;;  %v828_v8 = vadd.f32 %v4438_v33, %v827_v6  ;;  %v3576_v9 = vpop.f32.mrb[26].mxu0  ;;  %v3608_v10 = vpop.f32.mrb[26].mxu1 }
 0x14d   : > { %1107 = vst [vmem:[#allocation3 + $0x1b8] sm:$0xff] %v1043_v60  ;;  %964 = vst [vmem:[#allocation2 + $0x50] sm:$0xff] %v932_v61  ;;  %v884_v11 = vmax.f32 %v708_v3, 0.0  ;;  %v711_v13 = vadd.f32 %v3576_v9, %v4438_v33  ;;  %v839_v14 = vadd.f32 %v3608_v10, %v4438_v33  ;;  %v702_v15 = vpop.f32.mrb[27].mxu0  ;;  %v830_v16 = vpop.f32.mrb[27].mxu1 }
 0x14e   : > { %1073 = vst [vmem:[#allocation3 + $0xa8] sm:$0xff] %v1009_v62  ;;  %980 = vst [vmem:[#allocation2 + $0xd0] sm:$0xff] %v948_v63  ;;  %v916_v12 = vmax.f32 %v836_v4, 0.0  ;;  %v882_v17 = vmax.f32 %v700_v7, 0.0  ;;  %v914_v18 = vmax.f32 %v828_v8, 0.0  ;;  %v703_v19 = vadd.f32 %v4438_v33, %v702_v15 }
 0x14f   : > { %1105 = vst [vmem:[#allocation3 + $0x1a8] sm:$0xff] %v1041_v0  ;;  %v831_v20 = vadd.f32 %v4438_v33, %v830_v16  ;;  %v1014_v21 = vmul.f32 %v4442_v40, %v884_v11  ;;  %v885_v23 = vmax.f32 %v711_v13, 0.0  ;;  %v917_v24 = vmax.f32 %v839_v14, 0.0 }
 0x150   : > { %v1046_v22 = vmul.f32 %v4442_v40, %v916_v12  ;;  %v1012_v25 = vmul.f32 %v4442_v40, %v882_v17  ;;  %v1044_v26 = vmul.f32 %v4442_v40, %v914_v18  ;;  %v883_v27 = vmax.f32 %v703_v19, 0.0 }
 0x151   : > { %v915_v28 = vmax.f32 %v831_v20, 0.0  ;;  %1078 = vst [vmem:[#allocation3 + $0xd0] sm:$0xff] %v1014_v21  ;;  %v935_v29 = vpack.c.bf16 %v885_v23, %v884_v11  ;;  %v1015_v30 = vmul.f32 %v4442_v40, %v885_v23  ;;  %v951_v31 = vpack.c.bf16 %v917_v24, %v916_v12 }
 0x152   : > { %1110 = vst [vmem:[#allocation3 + $0x1d0] sm:$0xff] %v1046_v22  ;;  %v1047_v32 = vmul.f32 %v4442_v40, %v917_v24  ;;  %1076 = vst [vmem:[#allocation3 + $0xc0] sm:$0xff] %v1012_v25  ;;  %v934_v34 = vpack.c.bf16 %v883_v27, %v882_v17  ;;  %v1013_v35 = vmul.f32 %v4442_v40, %v883_v27  ;;  %v3579_v38 = vpop.f32.mrb[28].mxu0  ;;  %v3611_v39 = vpop.f32.mrb[28].mxu1 }
 0x153   : > { %1108 = vst [vmem:[#allocation3 + $0x1c0] sm:$0xff] %v1044_v26  ;;  %v950_v36 = vpack.c.bf16 %v915_v28, %v914_v18  ;;  %v1045_v37 = vmul.f32 %v4442_v40, %v915_v28  ;;  %967 = vst [vmem:[#allocation2 + $0x68] sm:$0xff] %v935_v29  ;;  %v724_v41 = vadd.f32 %v3579_v38, %v4438_v33  ;;  %v715_v43 = vpop.f32.mrb[29].mxu0  ;;  %v843_v44 = vpop.f32.mrb[29].mxu1 }
 0x154   : > { %1079 = vst [vmem:[#allocation3 + $0xd8] sm:$0xff] %v1015_v30  ;;  %983 = vst [vmem:[#allocation2 + $0xe8] sm:$0xff] %v951_v31  ;;  %v852_v42 = vadd.f32 %v3611_v39, %v4438_v33  ;;  %v716_v45 = vadd.f32 %v4438_v33, %v715_v43  ;;  %v844_v46 = vadd.f32 %v4438_v33, %v843_v44  ;;  %v3580_v47 = vpop.f32.mrb[30].mxu0  ;;  %v3612_v48 = vpop.f32.mrb[30].mxu1 }
 0x155   : > { %1111 = vst [vmem:[#allocation3 + $0x1d8] sm:$0xff] %v1047_v32  ;;  %966 = vst [vmem:[#allocation2 + $0x60] sm:$0xff] %v934_v34  ;;  %v888_v49 = vmax.f32 %v724_v41, 0.0  ;;  %v727_v51 = vadd.f32 %v3580_v47, %v4438_v33  ;;  %v855_v52 = vadd.f32 %v3612_v48, %v4438_v33  ;;  %v718_v53 = vpop.f32.mrb[31].mxu0  ;;  %v846_v54 = vpop.f32.mrb[31].mxu1 }
 0x156   : > { %1077 = vst [vmem:[#allocation3 + $0xc8] sm:$0xff] %v1013_v35  ;;  %982 = vst [vmem:[#allocation2 + $0xe0] sm:$0xff] %v950_v36  ;;  %v920_v50 = vmax.f32 %v852_v42, 0.0  ;;  %v886_v55 = vmax.f32 %v716_v45, 0.0  ;;  %v918_v56 = vmax.f32 %v844_v46, 0.0  ;;  %v719_v57 = vadd.f32 %v4438_v33, %v718_v53 }
 0x157   : > { %1109 = vst [vmem:[#allocation3 + $0x1c8] sm:$0xff] %v1045_v37  ;;  %v847_v58 = vadd.f32 %v4438_v33, %v846_v54  ;;  %v1018_v59 = vmul.f32 %v4442_v40, %v888_v49  ;;  %v889_v61 = vmax.f32 %v727_v51, 0.0  ;;  %v921_v62 = vmax.f32 %v855_v52, 0.0 }
 0x158   : > { %v1050_v60 = vmul.f32 %v4442_v40, %v920_v50  ;;  %v1016_v63 = vmul.f32 %v4442_v40, %v886_v55  ;;  %v1048_v0 = vmul.f32 %v4442_v40, %v918_v56  ;;  %v887_v1 = vmax.f32 %v719_v57, 0.0 }
 0x159   : > { %v919_v2 = vmax.f32 %v847_v58, 0.0  ;;  %1082 = vst [vmem:[#allocation3 + $0xf0] sm:$0xff] %v1018_v59  ;;  %v937_v3 = vpack.c.bf16 %v889_v61, %v888_v49  ;;  %v1019_v4 = vmul.f32 %v4442_v40, %v889_v61  ;;  %v953_v5 = vpack.c.bf16 %v921_v62, %v920_v50 }
 0x15a   : > { %1114 = vst [vmem:[#allocation3 + $0x1f0] sm:$0xff] %v1050_v60  ;;  %v1051_v33 = vmul.f32 %v4442_v40, %v921_v62  ;;  %1080 = vst [vmem:[#allocation3 + $0xe0] sm:$0xff] %v1016_v63  ;;  %v936_v6 = vpack.c.bf16 %v887_v1, %v886_v55  ;;  %v1017_v7 = vmul.f32 %v4442_v40, %v887_v1 }
 0x15b   : > { %1112 = vst [vmem:[#allocation3 + $0x1e0] sm:$0xff] %v1048_v0  ;;  %v952_v8 = vpack.c.bf16 %v919_v2, %v918_v56  ;;  %v1049_v9 = vmul.f32 %v4442_v40, %v919_v2  ;;  %969 = vst [vmem:[#allocation2 + $0x78] sm:$0xff] %v937_v3 }
 0x15c   : > { %1083 = vst [vmem:[#allocation3 + $0xf8] sm:$0xff] %v1019_v4  ;;  %985 = vst [vmem:[#allocation2 + $0xf8] sm:$0xff] %v953_v5 }
 0x15d   : > { %1115 = vst [vmem:[#allocation3 + $0x1f8] sm:$0xff] %v1051_v33  ;;  %968 = vst [vmem:[#allocation2 + $0x70] sm:$0xff] %v936_v6 }
 0x15e   : > { %1081 = vst [vmem:[#allocation3 + $0xe8] sm:$0xff] %v1017_v7  ;;  %984 = vst [vmem:[#allocation2 + $0xf0] sm:$0xff] %v952_v8 }
 0x15f   : > { %1113 = vst [vmem:[#allocation3 + $0x1e8] sm:$0xff] %v1049_v9 }
 0x160 PF: > { %p1116_p12 = scmp.lt.s32.totalorder %s4165_s27, 0  ;;  %s1117_s12 = ssub.s32 0, %s4165_s27 }
 0x161   : > { %s3153_s9 = smin.u32 %s4165_s27, %s1117_s12  ;;  %s1164_s14 = sshra.s32 %s4300_s11, 3 }
 0x162   : > { %s1119_s10 = sand.u32 1, %s3153_s9   ;;  %s3239_s15 = sshll.u32 %s1164_s14, 4 }
 0x163   : > { %s1120_s26 = ssub.s32 0, %s1119_s10  ;;  %s4574_s16 = scalar_lea.vmem [#allocation6], %s3239_s15 }
 0x164   : > { %s5726_s26 = smov (!%p1116_p12, %s1120_s26), %s1119_s10  ;;  %v3841_v40 = vld [vmem:[%s4574_s16 + $0x4] ss:$16 sps:$4 sm:$0xff]   ;;  %v3844_v10 = vld [vmem:[%s4574_s16 + $0xc] ss:$16 sps:$4 sm:$0xff]   ;;  %v3839_v45 = vld [vmem:[%s4574_s16] ss:$16 sps:$4 sm:$0xff]  }
 0x165   : > { %p3155_p2 = scmp.lt.s32.totalorder %s5726_s26, 0  ;;  %s1126_s17 = sadd.s32 2, %s5726_s26  ;;  %1585 = vmatprep.mubr.bf16.mxu0 %v3841_v40  ;;  %1746 = vmatprep.mubr.bf16.mxu1 %v3844_v10  ;;  %v3842_v46 = vld [vmem:[%s4574_s16 + $0x8] ss:$16 sps:$4 sm:$0xff]   ;;  %v3845_v47 = vld [vmem:[%s4574_s16 + $0x24] ss:$16 sps:$4 sm:$0xff]  }
 0x166   : > { %v3847_v48 = vld [vmem:[%s4574_s16 + $0x2c] ss:$16 sps:$4 sm:$0xff]   ;;  %v3849_v49 = vld [vmem:[%s4574_s16 + $0x20] ss:$16 sps:$4 sm:$0xff]   ;;  %v3850_v50 = vld [vmem:[%s4574_s16 + $0x28] ss:$16 sps:$4 sm:$0xff]  }
 0x167   : > { %s5728_s17 = smov (!%p3155_p2, %s1126_s17), %s5726_s26  ;;  %v3851_v51 = vld [vmem:[%s4574_s16 + $0x44] ss:$16 sps:$4 sm:$0xff]   ;;  %v3853_v52 = vld [vmem:[%s4574_s16 + $0x4c] ss:$16 sps:$4 sm:$0xff]   ;;  %v3855_v53 = vld [vmem:[%s4574_s16 + $0x40] ss:$16 sps:$4 sm:$0xff]  }
 0x168   : > { %s1128_s18 = ssub.s32 1, %s5728_s17  ;;  %s3238_s19 = sshll.u32 %s5728_s17, 8  ;;  %v3856_v54 = vld [vmem:[%s4574_s16 + $0x48] ss:$16 sps:$4 sm:$0xff]   ;;  %v3857_v55 = vld [vmem:[%s4574_s16 + $0x64] ss:$16 sps:$4 sm:$0xff]  }
 0x169   : > { %s4582_s20 = scalar_lea.vmem [#allocation2], %s3238_s19  ;;  %v3859_v56 = vld [vmem:[%s4574_s16 + $0x6c] ss:$16 sps:$4 sm:$0xff]   ;;  %v3861_v57 = vld [vmem:[%s4574_s16 + $0x60] ss:$16 sps:$4 sm:$0xff]   ;;  %p3224_p3 = scmp.ne.s32.totalorder %s4165_s27, 0 }
 0x16a   : > { %v1140_v11 = vld [vmem:[%s4582_s20 + $0x40] sm:$0xff]  ;;  %v1141_v15 = vld [vmem:[%s4582_s20 + $0x48] sm:$0xff]  ;;  %v1142_v19 = vld [vmem:[%s4582_s20 + $0x50] sm:$0xff]  ;;  %s3240_s21 = sshll.u32 (!%p3224_p3), %s1128_s18, 8  ;;  %s1897_s22 = sshra.s32 (!%p3224_p3), %s4300_s11, 4 }
 0x16b   : > { %v1156_v12 = vld [vmem:[%s4582_s20 + $0xc0] sm:$0xff]  ;;  %3275 = vmatprep.subr.bf16.mxu0 %v1140_v11  ;;  %v1157_v16 = vld [vmem:[%s4582_s20 + $0xc8] sm:$0xff]  ;;  %v1158_v20 = vld [vmem:[%s4582_s20 + $0xd0] sm:$0xff]  ;;  %s3227_s23 = sshll.u32 (!%p3224_p3), %s1897_s22, 3  ;;  %s1896_s24 = scalar_lea.vmem (!%p3224_p3), [#allocation2], %s3240_s21 }
 0x16c   : > { %v1132_v13 = vld [vmem:[%s4582_s20] sm:$0xff]  ;;  %3387 = vmatprep.subr.bf16.mxu1 %v1156_v12  ;;  %v1133_v17 = vld [vmem:[%s4582_s20 + $0x8] sm:$0xff]  ;;  %v1134_v21 = vld [vmem:[%s4582_s20 + $0x10] sm:$0xff]  ;;  %s1900_s25 = scalar_lea.vmem (!%p3224_p3), %s1896_s24, %s3227_s23 [#allocation2]  ;;  %s3228_s13 = sld [smem:[#allocation5 + $0x1]] (!%p3224_p3) }
 0x16d   : > { %v1148_v14 = vld [vmem:[%s4582_s20 + $0x80] sm:$0xff]  ;;  %3276 = vmatpush3.bf16.msra.mxu0 %v1132_v13  ;;  %v1149_v18 = vld [vmem:[%s4582_s20 + $0x88] sm:$0xff]  ;;  %v1150_v22 = vld [vmem:[%s4582_s20 + $0x90] sm:$0xff]  ;;  %s4779_s12 = scalar_lea.vmem (!%p3224_p3), [#allocation3], %s4300_s11 }
 0x16e   : > { %3388 = vmatpush3.bf16.msra.mxu1 %v1148_v14  ;;  %3277 = vmatprep.subr.bf16.mxu0 %v1141_v15  ;;  %v1143_v23 = vld [vmem:[%s4582_s20 + $0x58] sm:$0xff]  ;;  %v1144_v27 = vld [vmem:[%s4582_s20 + $0x60] sm:$0xff]  ;;  %v1145_v31 = vld [vmem:[%s4582_s20 + $0x68] sm:$0xff] }
 0x16f   : > { %3389 = vmatprep.subr.bf16.mxu1 %v1157_v16  ;;  %v1159_v24 = vld [vmem:[%s4582_s20 + $0xd8] sm:$0xff]  ;;  %v1160_v28 = vld [vmem:[%s4582_s20 + $0xe0] sm:$0xff]  ;;  %v1161_v32 = vld [vmem:[%s4582_s20 + $0xe8] sm:$0xff] }
 0x170   : > { %v1135_v25 = vld [vmem:[%s4582_s20 + $0x18] sm:$0xff]  ;;  %v1136_v29 = vld [vmem:[%s4582_s20 + $0x20] sm:$0xff]  ;;  %v1137_v34 = vld [vmem:[%s4582_s20 + $0x28] sm:$0xff] }
 0x171   : > { %3278 = vmatpush3.bf16.msra.mxu0 %v1133_v17  ;;  %v1151_v26 = vld [vmem:[%s4582_s20 + $0x98] sm:$0xff]  ;;  %v1152_v30 = vld [vmem:[%s4582_s20 + $0xa0] sm:$0xff]  ;;  %v1153_v35 = vld [vmem:[%s4582_s20 + $0xa8] sm:$0xff] }
 0x172   : > { %3390 = vmatpush3.bf16.msra.mxu1 %v1149_v18  ;;  %3279 = vmatprep.subr.bf16.mxu0 %v1142_v19  ;;  %v1146_v36 = vld [vmem:[%s4582_s20 + $0x70] sm:$0xff]  ;;  %v1147_v41 = vld [vmem:[%s4582_s20 + $0x78] sm:$0xff] }
 0x173   : > { %3391 = vmatprep.subr.bf16.mxu1 %v1158_v20  ;;  %v1162_v37 = vld [vmem:[%s4582_s20 + $0xf0] sm:$0xff]  ;;  %v1163_v42 = vld [vmem:[%s4582_s20 + $0xf8] sm:$0xff] }
 0x174   : > { %v1138_v38 = vld [vmem:[%s4582_s20 + $0x30] sm:$0xff]  ;;  %v1139_v43 = vld [vmem:[%s4582_s20 + $0x38] sm:$0xff] }
 0x175   : > { %3280 = vmatpush3.bf16.msra.mxu0 %v1134_v21  ;;  %v1154_v39 = vld [vmem:[%s4582_s20 + $0xb0] sm:$0xff]  ;;  %v1155_v44 = vld [vmem:[%s4582_s20 + $0xb8] sm:$0xff] }
 0x176   : > { %3392 = vmatpush3.bf16.msra.mxu1 %v1150_v22  ;;  %3281 = vmatprep.subr.bf16.mxu0 %v1143_v23  ;;  %v3862_v58 = vld [vmem:[%s4574_s16 + $0x68] ss:$16 sps:$4 sm:$0xff]   ;;  %v3863_v59 = vld [vmem:[%s4574_s16 + $0x84] ss:$16 sps:$4 sm:$0xff]   ;;  %v3865_v60 = vld [vmem:[%s4574_s16 + $0x8c] ss:$16 sps:$4 sm:$0xff]  }
 0x177   : > { %3393 = vmatprep.subr.bf16.mxu1 %v1159_v24  ;;  %v3867_v61 = vld [vmem:[%s4574_s16 + $0x80] ss:$16 sps:$4 sm:$0xff]   ;;  %v3868_v62 = vld [vmem:[%s4574_s16 + $0x88] ss:$16 sps:$4 sm:$0xff]   ;;  %v3869_v63 = vld [vmem:[%s4574_s16 + $0xa4] ss:$16 sps:$4 sm:$0xff]  }
 0x178   : > { %v3871_v0 = vld [vmem:[%s4574_s16 + $0xac] ss:$16 sps:$4 sm:$0xff]   ;;  %v3873_v1 = vld [vmem:[%s4574_s16 + $0xa0] ss:$16 sps:$4 sm:$0xff]   ;;  %v3874_v2 = vld [vmem:[%s4574_s16 + $0xa8] ss:$16 sps:$4 sm:$0xff]  }
 0x179   : > { %3282 = vmatpush3.bf16.msra.mxu0 %v1135_v25  ;;  %v3875_v3 = vld [vmem:[%s4574_s16 + $0xc4] ss:$16 sps:$4 sm:$0xff]   ;;  %v3877_v4 = vld [vmem:[%s4574_s16 + $0xcc] ss:$16 sps:$4 sm:$0xff]   ;;  %v3879_v5 = vld [vmem:[%s4574_s16 + $0xc0] ss:$16 sps:$4 sm:$0xff]  }
 0x17a   : > { %3394 = vmatpush3.bf16.msra.mxu1 %v1151_v26  ;;  %3283 = vmatprep.subr.bf16.mxu0 %v1144_v27  ;;  %v3880_v33 = vld [vmem:[%s4574_s16 + $0xc8] ss:$16 sps:$4 sm:$0xff]   ;;  %v3881_v6 = vld [vmem:[%s4574_s16 + $0xe4] ss:$16 sps:$4 sm:$0xff]   ;;  %v3883_v7 = vld [vmem:[%s4574_s16 + $0xec] ss:$16 sps:$4 sm:$0xff]  }
 0x17b   : > { %3395 = vmatprep.subr.bf16.mxu1 %v1160_v28  ;;  %v3885_v8 = vld [vmem:[%s4574_s16 + $0xe0] ss:$16 sps:$4 sm:$0xff]   ;;  %v3886_v9 = vld [vmem:[%s4574_s16 + $0xe8] ss:$16 sps:$4 sm:$0xff]   ;;  %v3887_v40 = vld [vmem:[%s4574_s16 + $0x104] ss:$16 sps:$4 sm:$0xff]  }
 0x17c   : > { %v3889_v10 = vld [vmem:[%s4574_s16 + $0x10c] ss:$16 sps:$4 sm:$0xff]   ;;  %v3891_v11 = vld [vmem:[%s4574_s16 + $0x100] ss:$16 sps:$4 sm:$0xff]   ;;  %v3892_v12 = vld [vmem:[%s4574_s16 + $0x108] ss:$16 sps:$4 sm:$0xff]  }
 0x17d   : > { %3284 = vmatpush3.bf16.msra.mxu0 %v1136_v29  ;;  %v3893_v13 = vld [vmem:[%s4574_s16 + $0x124] ss:$16 sps:$4 sm:$0xff]   ;;  %v3895_v14 = vld [vmem:[%s4574_s16 + $0x12c] ss:$16 sps:$4 sm:$0xff]   ;;  %v3897_v15 = vld [vmem:[%s4574_s16 + $0x120] ss:$16 sps:$4 sm:$0xff]  }
 0x17e   : > { %3396 = vmatpush3.bf16.msra.mxu1 %v1152_v30  ;;  %3285 = vmatprep.subr.bf16.mxu0 %v1145_v31  ;;  %v3898_v16 = vld [vmem:[%s4574_s16 + $0x128] ss:$16 sps:$4 sm:$0xff]   ;;  %v3899_v17 = vld [vmem:[%s4574_s16 + $0x144] ss:$16 sps:$4 sm:$0xff]   ;;  %v3901_v18 = vld [vmem:[%s4574_s16 + $0x14c] ss:$16 sps:$4 sm:$0xff]  }
 0x17f   : > { %3397 = vmatprep.subr.bf16.mxu1 %v1161_v32  ;;  %v3903_v19 = vld [vmem:[%s4574_s16 + $0x140] ss:$16 sps:$4 sm:$0xff]   ;;  %v3904_v20 = vld [vmem:[%s4574_s16 + $0x148] ss:$16 sps:$4 sm:$0xff]   ;;  %v3905_v21 = vld [vmem:[%s4574_s16 + $0x164] ss:$16 sps:$4 sm:$0xff]  }
 0x180   : > { %v3907_v22 = vld [vmem:[%s4574_s16 + $0x16c] ss:$16 sps:$4 sm:$0xff]   ;;  %v3909_v23 = vld [vmem:[%s4574_s16 + $0x160] ss:$16 sps:$4 sm:$0xff]   ;;  %v3910_v24 = vld [vmem:[%s4574_s16 + $0x168] ss:$16 sps:$4 sm:$0xff]  }
 0x181   : > { %3286 = vmatpush3.bf16.msra.mxu0 %v1137_v34  ;;  %v3911_v25 = vld [vmem:[%s4574_s16 + $0x184] ss:$16 sps:$4 sm:$0xff]   ;;  %v3913_v26 = vld [vmem:[%s4574_s16 + $0x18c] ss:$16 sps:$4 sm:$0xff]   ;;  %v3915_v27 = vld [vmem:[%s4574_s16 + $0x180] ss:$16 sps:$4 sm:$0xff]  }
 0x182   : > { %3398 = vmatpush3.bf16.msra.mxu1 %v1153_v35  ;;  %3287 = vmatprep.subr.bf16.mxu0 %v1146_v36  ;;  %v3916_v28 = vld [vmem:[%s4574_s16 + $0x188] ss:$16 sps:$4 sm:$0xff]   ;;  %v3917_v29 = vld [vmem:[%s4574_s16 + $0x1a4] ss:$16 sps:$4 sm:$0xff]   ;;  %v3919_v30 = vld [vmem:[%s4574_s16 + $0x1ac] ss:$16 sps:$4 sm:$0xff]  }
 0x183   : > { %3399 = vmatprep.subr.bf16.mxu1 %v1162_v37  ;;  %v3921_v31 = vld [vmem:[%s4574_s16 + $0x1a0] ss:$16 sps:$4 sm:$0xff]   ;;  %v3922_v32 = vld [vmem:[%s4574_s16 + $0x1a8] ss:$16 sps:$4 sm:$0xff]   ;;  %v3923_v34 = vld [vmem:[%s4574_s16 + $0x1c4] ss:$16 sps:$4 sm:$0xff]  }
 0x184   : > { %v3925_v35 = vld [vmem:[%s4574_s16 + $0x1cc] ss:$16 sps:$4 sm:$0xff]   ;;  %v3927_v36 = vld [vmem:[%s4574_s16 + $0x1c0] ss:$16 sps:$4 sm:$0xff]   ;;  %v3928_v37 = vld [vmem:[%s4574_s16 + $0x1c8] ss:$16 sps:$4 sm:$0xff]  }
 0x185   : > { %3288 = vmatpush3.bf16.msra.mxu0 %v1138_v38  ;;  %v3929_v38 = vld [vmem:[%s4574_s16 + $0x1e4] ss:$16 sps:$4 sm:$0xff]  }
 0x186   : > { %3400 = vmatpush3.bf16.msra.mxu1 %v1154_v39  ;;  %3289 = vmatprep.subr.bf16.mxu0 %v1147_v41  ;;  %v3931_v39 = vld [vmem:[%s4574_s16 + $0x1ec] ss:$16 sps:$4 sm:$0xff]   ;;  %v3933_v41 = vld [vmem:[%s4574_s16 + $0x1e0] ss:$16 sps:$4 sm:$0xff]  }
 0x187   : > { %3401 = vmatprep.subr.bf16.mxu1 %v1163_v42  ;;  %v3934_v42 = vld [vmem:[%s4574_s16 + $0x1e8] ss:$16 sps:$4 sm:$0xff]  }
 0x189   : > { %3290 = vmatpush3.bf16.msra.mxu0 %v1139_v43 }
 0x18a   : > { %3402 = vmatpush3.bf16.msra.mxu1 %v1155_v44 }
 0x18c   : > { %1586 = vmatmul.mubr.bf16.vlgmr.msra.gmra.mrb[0].mxu0 %v3839_v45 }
 0x18d   : > { %1747 = vmatmul.mubr.bf16.vlgmr.msra.gmra.mrb[0].mxu1 %v3842_v46  ;;  %1593 = vmatprep.mubr.bf16.mxu0 %v3845_v47 }
 0x18e   : > { %1754 = vmatprep.mubr.bf16.mxu1 %v3847_v48 }
 0x194   : > { %1594 = vmatmul.mubr.bf16.gmra.mrb[4].mxu0 %v3849_v49 }
 0x195   : > { %1755 = vmatmul.mubr.bf16.gmra.mrb[4].mxu1 %v3850_v50  ;;  %1601 = vmatprep.mubr.bf16.mxu0 %v3851_v51 }
 0x196   : > { %1762 = vmatprep.mubr.bf16.mxu1 %v3853_v52 }
 0x19c   : > { %1602 = vmatmul.mubr.bf16.gmra.mrb[8].mxu0 %v3855_v53 }
 0x19d   : > { %1763 = vmatmul.mubr.bf16.gmra.mrb[8].mxu1 %v3856_v54  ;;  %1609 = vmatprep.mubr.bf16.mxu0 %v3857_v55 }
 0x19e   : > { %1770 = vmatprep.mubr.bf16.mxu1 %v3859_v56 }
 0x1a4   : > { %1610 = vmatmul.mubr.bf16.gmra.mrb[12].mxu0 %v3861_v57 }
 0x1a5   : > { %1771 = vmatmul.mubr.bf16.gmra.mrb[12].mxu1 %v3862_v58  ;;  %1617 = vmatprep.mubr.bf16.mxu0 %v3863_v59 }
 0x1a6   : > { %1778 = vmatprep.mubr.bf16.mxu1 %v3865_v60 }
 0x1ac   : > { %1618 = vmatmul.mubr.bf16.gmra.mrb[16].mxu0 %v3867_v61 }
 0x1ad   : > { %1779 = vmatmul.mubr.bf16.gmra.mrb[16].mxu1 %v3868_v62  ;;  %1625 = vmatprep.mubr.bf16.mxu0 %v3869_v63 }
 0x1ae   : > { %1786 = vmatprep.mubr.bf16.mxu1 %v3871_v0 }
 0x1b4   : > { %1626 = vmatmul.mubr.bf16.gmra.mrb[20].mxu0 %v3873_v1 }
 0x1b5   : > { %1787 = vmatmul.mubr.bf16.gmra.mrb[20].mxu1 %v3874_v2  ;;  %1633 = vmatprep.mubr.bf16.mxu0 %v3875_v3 }
 0x1b6   : > { %1794 = vmatprep.mubr.bf16.mxu1 %v3877_v4 }
 0x1bc   : > { %1634 = vmatmul.mubr.bf16.gmra.mrb[24].mxu0 %v3879_v5 }
 0x1bd   : > { %1795 = vmatmul.mubr.bf16.gmra.mrb[24].mxu1 %v3880_v33  ;;  %1641 = vmatprep.mubr.bf16.mxu0 %v3881_v6 }
 0x1be   : > { %1802 = vmatprep.mubr.bf16.mxu1 %v3883_v7 }
 0x1c4   : > { %1642 = vmatmul.mubr.bf16.gmra.mrb[28].mxu0 %v3885_v8 }
 0x1c5   : > { %1803 = vmatmul.mubr.bf16.gmra.mrb[28].mxu1 %v3886_v9  ;;  %1649 = vmatprep.mubr.bf16.mxu0 %v3887_v40 }
 0x1c6   : > { %1810 = vmatprep.mubr.bf16.mxu1 %v3889_v10 }
 0x1cc   : > { %1650 = vmatmul.mubr.bf16.gmra.mrb[32].mxu0 %v3891_v11 }
 0x1cd   : > { %1811 = vmatmul.mubr.bf16.gmra.mrb[32].mxu1 %v3892_v12  ;;  %1657 = vmatprep.mubr.bf16.mxu0 %v3893_v13 }
 0x1ce   : > { %1818 = vmatprep.mubr.bf16.mxu1 %v3895_v14 }
 0x1d4   : > { %1658 = vmatmul.mubr.bf16.gmra.mrb[36].mxu0 %v3897_v15 }
 0x1d5   : > { %1819 = vmatmul.mubr.bf16.gmra.mrb[36].mxu1 %v3898_v16  ;;  %1665 = vmatprep.mubr.bf16.mxu0 %v3899_v17 }
 0x1d6   : > { %1826 = vmatprep.mubr.bf16.mxu1 %v3901_v18 }
 0x1dc   : > { %1666 = vmatmul.mubr.bf16.gmra.mrb[40].mxu0 %v3903_v19 }
 0x1dd   : > { %1827 = vmatmul.mubr.bf16.gmra.mrb[40].mxu1 %v3904_v20  ;;  %1673 = vmatprep.mubr.bf16.mxu0 %v3905_v21 }
 0x1de   : > { %1834 = vmatprep.mubr.bf16.mxu1 %v3907_v22 }
 0x1e4   : > { %1674 = vmatmul.mubr.bf16.gmra.mrb[44].mxu0 %v3909_v23 }
 0x1e5   : > { %1835 = vmatmul.mubr.bf16.gmra.mrb[44].mxu1 %v3910_v24  ;;  %1681 = vmatprep.mubr.bf16.mxu0 %v3911_v25 }
 0x1e6   : > { %1842 = vmatprep.mubr.bf16.mxu1 %v3913_v26 }
 0x1ec   : > { %1682 = vmatmul.mubr.bf16.gmra.mrb[48].mxu0 %v3915_v27 }
 0x1ed   : > { %1843 = vmatmul.mubr.bf16.gmra.mrb[48].mxu1 %v3916_v28  ;;  %1689 = vmatprep.mubr.bf16.mxu0 %v3917_v29 }
 0x1ee   : > { %1850 = vmatprep.mubr.bf16.mxu1 %v3919_v30 }
 0x1f4   : > { %1690 = vmatmul.mubr.bf16.gmra.mrb[52].mxu0 %v3921_v31 }
 0x1f5   : > { %1851 = vmatmul.mubr.bf16.gmra.mrb[52].mxu1 %v3922_v32  ;;  %1697 = vmatprep.mubr.bf16.mxu0 %v3923_v34 }
 0x1f6   : > { %1858 = vmatprep.mubr.bf16.mxu1 %v3925_v35 }
 0x1fc   : > { %1698 = vmatmul.mubr.bf16.gmra.mrb[56].mxu0 %v3927_v36 }
 0x1fd   : > { %1859 = vmatmul.mubr.bf16.gmra.mrb[56].mxu1 %v3928_v37  ;;  %1705 = vmatprep.mubr.bf16.mxu0 %v3929_v38 }
 0x1fe   : > { %1866 = vmatprep.mubr.bf16.mxu1 %v3931_v39 }
 0x204   : > { %1706 = vmatmul.mubr.bf16.gmra.mrb[60].mxu0 %v3933_v41 }
 0x205   : > { %1867 = vmatmul.mubr.bf16.gmra.mrb[60].mxu1 %v3934_v42 }
 0x25f   : > { %v3291_v43 = vpop.f32.mrb[0].mxu0 }
 0x260   : > { %v3403_v44 = vpop.f32.mrb[0].mxu1  ;;  %v3292_v45 = vpop.f32.mrb[1].mxu0 }
 0x261   : > { %v3404_v46 = vpop.f32.mrb[1].mxu1  ;;  %v3293_v47 = vadd.f32 %v3292_v45, %v3291_v43  ;;  %v3294_v49 = vpop.f32.mrb[2].mxu0 }
 0x262   : > { %v3405_v48 = vadd.f32 %v3404_v46, %v3403_v44  ;;  %v3406_v50 = vpop.f32.mrb[2].mxu1  ;;  %v3295_v51 = vpop.f32.mrb[3].mxu0 }
 0x263   : > { %v3407_v52 = vpop.f32.mrb[3].mxu1  ;;  %v3296_v54 = vadd.f32 %v3295_v51, %v3294_v49 }
 0x264   : > { %v4678_v53 = vadd.f32 %v3405_v48, %v3293_v47  ;;  %v3408_v55 = vadd.f32 %v3407_v52, %v3406_v50 }
 0x266   : > { %v4680_v56 = vadd.f32 %v3408_v55, %v3296_v54 }
 0x267   : > { %v3297_v57 = vpop.f32.mrb[4].mxu0 }
 0x268   : > { %v3409_v58 = vpop.f32.mrb[4].mxu1  ;;  %v3298_v59 = vpop.f32.mrb[5].mxu0 }
 0x269   : > { %v3410_v60 = vpop.f32.mrb[5].mxu1  ;;  %v3299_v61 = vadd.f32 %v3298_v59, %v3297_v57  ;;  %v3300_v63 = vpop.f32.mrb[6].mxu0 }
 0x26a   : > { %v3411_v62 = vadd.f32 %v3410_v60, %v3409_v58  ;;  %v3412_v0 = vpop.f32.mrb[6].mxu1  ;;  %v3301_v1 = vpop.f32.mrb[7].mxu0 }
 0x26b   : > { %v3413_v2 = vpop.f32.mrb[7].mxu1  ;;  %v3302_v4 = vadd.f32 %v3301_v1, %v3300_v63 }
 0x26c   : > { %v4682_v3 = vadd.f32 %v3411_v62, %v3299_v61  ;;  %v3414_v5 = vadd.f32 %v3413_v2, %v3412_v0 }
 0x26e   : > { %v4684_v33 = vadd.f32 %v3414_v5, %v3302_v4 }
 0x26f   : > { %v3303_v6 = vpop.f32.mrb[8].mxu0 }
 0x270   : > { %v3415_v7 = vpop.f32.mrb[8].mxu1  ;;  %v3304_v8 = vpop.f32.mrb[9].mxu0 }
 0x271   : > { %v3416_v9 = vpop.f32.mrb[9].mxu1  ;;  %v3305_v40 = vadd.f32 %v3304_v8, %v3303_v6  ;;  %v3306_v11 = vpop.f32.mrb[10].mxu0 }
 0x272   : > { %v3417_v10 = vadd.f32 %v3416_v9, %v3415_v7  ;;  %v3418_v12 = vpop.f32.mrb[10].mxu1  ;;  %v3307_v13 = vpop.f32.mrb[11].mxu0 }
 0x273   : > { %v3419_v14 = vpop.f32.mrb[11].mxu1  ;;  %v3308_v16 = vadd.f32 %v3307_v13, %v3306_v11 }
 0x274   : > { %v4686_v15 = vadd.f32 %v3417_v10, %v3305_v40  ;;  %v3420_v17 = vadd.f32 %v3419_v14, %v3418_v12 }
 0x276   : > { %v4688_v18 = vadd.f32 %v3420_v17, %v3308_v16 }
 0x277   : > { %v3309_v19 = vpop.f32.mrb[12].mxu0 }
 0x278   : > { %v3421_v20 = vpop.f32.mrb[12].mxu1  ;;  %v3310_v21 = vpop.f32.mrb[13].mxu0 }
 0x279   : > { %v3422_v22 = vpop.f32.mrb[13].mxu1  ;;  %v3311_v23 = vadd.f32 %v3310_v21, %v3309_v19  ;;  %v3312_v25 = vpop.f32.mrb[14].mxu0 }
 0x27a   : > { %v3423_v24 = vadd.f32 %v3422_v22, %v3421_v20  ;;  %v3424_v26 = vpop.f32.mrb[14].mxu1  ;;  %v3313_v27 = vpop.f32.mrb[15].mxu0 }
 0x27b   : > { %v3425_v28 = vpop.f32.mrb[15].mxu1  ;;  %v3314_v30 = vadd.f32 %v3313_v27, %v3312_v25 }
 0x27c   : > { %v4690_v29 = vadd.f32 %v3423_v24, %v3311_v23  ;;  %v3426_v31 = vadd.f32 %v3425_v28, %v3424_v26 }
 0x27e   : > { %v4692_v32 = vadd.f32 %v3426_v31, %v3314_v30 }
 0x27f   : > { %v3315_v34 = vpop.f32.mrb[16].mxu0 }
 0x280   : > { %v3427_v35 = vpop.f32.mrb[16].mxu1  ;;  %v3316_v36 = vpop.f32.mrb[17].mxu0 }
 0x281   : > { %v3428_v37 = vpop.f32.mrb[17].mxu1  ;;  %v3317_v38 = vadd.f32 %v3316_v36, %v3315_v34  ;;  %v3318_v41 = vpop.f32.mrb[18].mxu0 }
 0x282   : > { %v3429_v39 = vadd.f32 %v3428_v37, %v3427_v35  ;;  %v3430_v42 = vpop.f32.mrb[18].mxu1  ;;  %v3319_v43 = vpop.f32.mrb[19].mxu0 }
 0x283   : > { %v3431_v44 = vpop.f32.mrb[19].mxu1  ;;  %v3320_v46 = vadd.f32 %v3319_v43, %v3318_v41 }
 0x284   : > { %v4694_v45 = vadd.f32 %v3429_v39, %v3317_v38  ;;  %v3432_v47 = vadd.f32 %v3431_v44, %v3430_v42 }
 0x286   : > { %v4696_v48 = vadd.f32 %v3432_v47, %v3320_v46 }
 0x287   : > { %v3321_v49 = vpop.f32.mrb[20].mxu0 }
 0x288   : > { %v3433_v50 = vpop.f32.mrb[20].mxu1  ;;  %v3322_v51 = vpop.f32.mrb[21].mxu0 }
 0x289   : > { %v3434_v52 = vpop.f32.mrb[21].mxu1  ;;  %v3323_v54 = vadd.f32 %v3322_v51, %v3321_v49  ;;  %v3324_v57 = vpop.f32.mrb[22].mxu0 }
 0x28a   : > { %v3435_v55 = vadd.f32 %v3434_v52, %v3433_v50  ;;  %v3436_v58 = vpop.f32.mrb[22].mxu1  ;;  %v3325_v59 = vpop.f32.mrb[23].mxu0 }
 0x28b   : > { %v3437_v60 = vpop.f32.mrb[23].mxu1  ;;  %v3326_v62 = vadd.f32 %v3325_v59, %v3324_v57 }
 0x28c   : > { %v4698_v61 = vadd.f32 %v3435_v55, %v3323_v54  ;;  %v3438_v63 = vadd.f32 %v3437_v60, %v3436_v58 }
 0x28e   : > { %v4700_v0 = vadd.f32 %v3438_v63, %v3326_v62 }
 0x28f   : > { %v3327_v1 = vpop.f32.mrb[24].mxu0 }
 0x290   : > { %v3439_v2 = vpop.f32.mrb[24].mxu1  ;;  %v3328_v4 = vpop.f32.mrb[25].mxu0 }
 0x291   : > { %v3440_v5 = vpop.f32.mrb[25].mxu1  ;;  %v3329_v6 = vadd.f32 %v3328_v4, %v3327_v1  ;;  %v3330_v8 = vpop.f32.mrb[26].mxu0 }
 0x292   : > { %v3441_v7 = vadd.f32 %v3440_v5, %v3439_v2  ;;  %v3442_v9 = vpop.f32.mrb[26].mxu1  ;;  %v3331_v40 = vpop.f32.mrb[27].mxu0 }
 0x293   : > { %v3443_v10 = vpop.f32.mrb[27].mxu1  ;;  %v3332_v12 = vadd.f32 %v3331_v40, %v3330_v8 }
 0x294   : > { %v4702_v11 = vadd.f32 %v3441_v7, %v3329_v6  ;;  %v3444_v13 = vadd.f32 %v3443_v10, %v3442_v9 }
 0x296   : > { %v4704_v14 = vadd.f32 %v3444_v13, %v3332_v12 }
 0x297   : > { %v3333_v16 = vpop.f32.mrb[28].mxu0 }
 0x298   : > { %v3445_v17 = vpop.f32.mrb[28].mxu1  ;;  %v3334_v19 = vpop.f32.mrb[29].mxu0 }
 0x299   : > { %v3446_v20 = vpop.f32.mrb[29].mxu1  ;;  %v3335_v21 = vadd.f32 %v3334_v19, %v3333_v16  ;;  %v3336_v23 = vpop.f32.mrb[30].mxu0 }
 0x29a   : > { %v3447_v22 = vadd.f32 %v3446_v20, %v3445_v17  ;;  %v3448_v24 = vpop.f32.mrb[30].mxu1  ;;  %v3337_v25 = vpop.f32.mrb[31].mxu0 }
 0x29b   : > { %v3449_v26 = vpop.f32.mrb[31].mxu1  ;;  %v3338_v28 = vadd.f32 %v3337_v25, %v3336_v23 }
 0x29c   : > { %v4706_v27 = vadd.f32 %v3447_v22, %v3335_v21  ;;  %v3450_v30 = vadd.f32 %v3449_v26, %v3448_v24 }
 0x29e   : > { %v4708_v31 = vadd.f32 %v3450_v30, %v3338_v28 }
 0x29f   : > { %v3339_v34 = vpop.f32.mrb[32].mxu0 }
 0x2a0   : > { %v3451_v35 = vpop.f32.mrb[32].mxu1  ;;  %v3340_v36 = vpop.f32.mrb[33].mxu0 }
 0x2a1   : > { %v3452_v37 = vpop.f32.mrb[33].mxu1  ;;  %v3341_v38 = vadd.f32 %v3340_v36, %v3339_v34  ;;  %v3342_v41 = vpop.f32.mrb[34].mxu0 }
 0x2a2   : > { %v3453_v39 = vadd.f32 %v3452_v37, %v3451_v35  ;;  %v3454_v42 = vpop.f32.mrb[34].mxu1  ;;  %v3343_v43 = vpop.f32.mrb[35].mxu0 }
 0x2a3   : > { %v3455_v44 = vpop.f32.mrb[35].mxu1  ;;  %v3344_v47 = vadd.f32 %v3343_v43, %v3342_v41 }
 0x2a4   : > { %v4710_v46 = vadd.f32 %v3453_v39, %v3341_v38  ;;  %v3456_v49 = vadd.f32 %v3455_v44, %v3454_v42 }
 0x2a6   : > { %v4712_v50 = vadd.f32 %v3456_v49, %v3344_v47 }
 0x2a7   : > { %v3345_v51 = vpop.f32.mrb[36].mxu0 }
 0x2a8   : > { %v3457_v52 = vpop.f32.mrb[36].mxu1  ;;  %v3346_v54 = vpop.f32.mrb[37].mxu0 }
 0x2a9   : > { %v3458_v55 = vpop.f32.mrb[37].mxu1  ;;  %v3347_v57 = vadd.f32 %v3346_v54, %v3345_v51  ;;  %v3348_v59 = vpop.f32.mrb[38].mxu0 }
 0x2aa   : > { %v3459_v58 = vadd.f32 %v3458_v55, %v3457_v52  ;;  %v3460_v60 = vpop.f32.mrb[38].mxu1  ;;  %v3349_v62 = vpop.f32.mrb[39].mxu0 }
 0x2ab   : > { %v3461_v63 = vpop.f32.mrb[39].mxu1  ;;  %v3350_v2 = vadd.f32 %v3349_v62, %v3348_v59 }
 0x2ac   : > { %v4714_v1 = vadd.f32 %v3459_v58, %v3347_v57  ;;  %v3462_v4 = vadd.f32 %v3461_v63, %v3460_v60 }
 0x2ae   : > { %v4716_v5 = vadd.f32 %v3462_v4, %v3350_v2 }
 0x2af   : > { %v3351_v6 = vpop.f32.mrb[40].mxu0 }
 0x2b0   : > { %v3463_v7 = vpop.f32.mrb[40].mxu1  ;;  %v3352_v8 = vpop.f32.mrb[41].mxu0 }
 0x2b1   : > { %v3464_v9 = vpop.f32.mrb[41].mxu1  ;;  %v3353_v40 = vadd.f32 %v3352_v8, %v3351_v6  ;;  %v3354_v12 = vpop.f32.mrb[42].mxu0 }
 0x2b2   : > { %v3465_v10 = vadd.f32 %v3464_v9, %v3463_v7  ;;  %v3466_v13 = vpop.f32.mrb[42].mxu1  ;;  %v3355_v16 = vpop.f32.mrb[43].mxu0 }
 0x2b3   : > { %v3467_v17 = vpop.f32.mrb[43].mxu1  ;;  %v3356_v20 = vadd.f32 %v3355_v16, %v3354_v12 }
 0x2b4   : > { %v4718_v19 = vadd.f32 %v3465_v10, %v3353_v40  ;;  %v3468_v21 = vadd.f32 %v3467_v17, %v3466_v13 }
 0x2b6   : > { %v4720_v22 = vadd.f32 %v3468_v21, %v3356_v20 }
 0x2b7   : > { %v3357_v23 = vpop.f32.mrb[44].mxu0 }
 0x2b8   : > { %v3469_v24 = vpop.f32.mrb[44].mxu1  ;;  %v3358_v25 = vpop.f32.mrb[45].mxu0 }
 0x2b9   : > { %v3470_v26 = vpop.f32.mrb[45].mxu1  ;;  %v3359_v28 = vadd.f32 %v3358_v25, %v3357_v23  ;;  %v3360_v34 = vpop.f32.mrb[46].mxu0 }
 0x2ba   : > { %v3471_v30 = vadd.f32 %v3470_v26, %v3469_v24  ;;  %v3472_v35 = vpop.f32.mrb[46].mxu1  ;;  %v3361_v36 = vpop.f32.mrb[47].mxu0 }
 0x2bb   : > { %v3473_v37 = vpop.f32.mrb[47].mxu1  ;;  %v3362_v39 = vadd.f32 %v3361_v36, %v3360_v34 }
 0x2bc   : > { %v4722_v38 = vadd.f32 %v3471_v30, %v3359_v28  ;;  %v3474_v41 = vadd.f32 %v3473_v37, %v3472_v35 }
 0x2be   : > { %v4724_v42 = vadd.f32 %v3474_v41, %v3362_v39 }
 0x2bf   : > { %v3363_v43 = vpop.f32.mrb[48].mxu0 }
 0x2c0   : > { %v3475_v44 = vpop.f32.mrb[48].mxu1  ;;  %v3364_v47 = vpop.f32.mrb[49].mxu0 }
 0x2c1   : > { %v3476_v49 = vpop.f32.mrb[49].mxu1  ;;  %v3365_v51 = vadd.f32 %v3364_v47, %v3363_v43  ;;  %v3366_v54 = vpop.f32.mrb[50].mxu0 }
 0x2c2   : > { %v3477_v52 = vadd.f32 %v3476_v49, %v3475_v44  ;;  %v3478_v55 = vpop.f32.mrb[50].mxu1  ;;  %v3367_v57 = vpop.f32.mrb[51].mxu0 }
 0x2c3   : > { %v3479_v58 = vpop.f32.mrb[51].mxu1  ;;  %v3368_v60 = vadd.f32 %v3367_v57, %v3366_v54 }
 0x2c4   : > { %v4726_v59 = vadd.f32 %v3477_v52, %v3365_v51  ;;  %v3480_v62 = vadd.f32 %v3479_v58, %v3478_v55 }
 0x2c6   : > { %v4728_v63 = vadd.f32 %v3480_v62, %v3368_v60 }
 0x2c7   : > { %v3369_v2 = vpop.f32.mrb[52].mxu0 }
 0x2c8   : > { %v3481_v4 = vpop.f32.mrb[52].mxu1  ;;  %v3370_v6 = vpop.f32.mrb[53].mxu0 }
 0x2c9   : > { %v3482_v7 = vpop.f32.mrb[53].mxu1  ;;  %v3371_v8 = vadd.f32 %v3370_v6, %v3369_v2  ;;  %v3372_v40 = vpop.f32.mrb[54].mxu0 }
 0x2ca   : > { %v3483_v9 = vadd.f32 %v3482_v7, %v3481_v4  ;;  %v3484_v10 = vpop.f32.mrb[54].mxu1  ;;  %v3373_v12 = vpop.f32.mrb[55].mxu0 }
 0x2cb   : > { %v3485_v13 = vpop.f32.mrb[55].mxu1  ;;  %v3374_v17 = vadd.f32 %v3373_v12, %v3372_v40  ;;  %v1880_v40 = vpack.c.bf16 (!%p3224_p3), %v4688_v18, %v4686_v15  ;;  %v1882_v12 = vpack.c.bf16 (!%p3224_p3), %v4696_v48, %v4694_v45 }
 0x2cc   : > { %v4730_v16 = vadd.f32 %v3483_v9, %v3371_v8  ;;  %v3486_v20 = vadd.f32 %v3485_v13, %v3484_v10  ;;  %v1878_v8 = vpack.c.bf16 (!%p3224_p3), %v4680_v56, %v4678_v53  ;;  %v1879_v9 = vpack.c.bf16 (!%p3224_p3), %v4684_v33, %v4682_v3 }
 0x2cd   : > { %v1881_v10 = vpack.c.bf16 (!%p3224_p3), %v4692_v32, %v4690_v29  ;;  %v1883_v13 = vpack.c.bf16 (!%p3224_p3), %v4700_v0, %v4698_v61  ;;  %1903 = vst [vmem:[%s1900_s25 + $0x10] sm:$0xff] (!%p3224_p3), %v1880_v40  ;;  %1905 = vst [vmem:[%s1900_s25 + $0x20] sm:$0xff] (!%p3224_p3), %v1882_v12 }
 0x2ce   : > { %v4732_v21 = vadd.f32 %v3486_v20, %v3374_v17  ;;  %v1884_v17 = vpack.c.bf16 (!%p3224_p3), %v4704_v14, %v4702_v11  ;;  %v1885_v20 = vpack.c.bf16 (!%p3224_p3), %v4708_v31, %v4706_v27  ;;  %1901 = vst [vmem:[%s1900_s25] sm:$0xff] (!%p3224_p3), %v1878_v8  ;;  %1902 = vst [vmem:[%s1900_s25 + $0x8] sm:$0xff] (!%p3224_p3), %v1879_v9 }
 0x2cf   : > { %v3375_v23 = vpop.f32.mrb[56].mxu0  ;;  %1904 = vst [vmem:[%s1900_s25 + $0x18] sm:$0xff] (!%p3224_p3), %v1881_v10  ;;  %1906 = vst [vmem:[%s1900_s25 + $0x28] sm:$0xff] (!%p3224_p3), %v1883_v13  ;;  %v1926_v13 = vld [vmem:[%s4779_s12 + $0x40] sm:$0xff] (!%p3224_p3) }
 0x2d0   : > { %v3487_v24 = vpop.f32.mrb[56].mxu1  ;;  %v3376_v25 = vpop.f32.mrb[57].mxu0  ;;  %1907 = vst [vmem:[%s1900_s25 + $0x30] sm:$0xff] (!%p3224_p3), %v1884_v17  ;;  %1908 = vst [vmem:[%s1900_s25 + $0x38] sm:$0xff] (!%p3224_p3), %v1885_v20  ;;  %v1927_v17 = vld [vmem:[%s4779_s12 + $0x48] sm:$0xff] (!%p3224_p3) }
 0x2d1   : > { %v3488_v26 = vpop.f32.mrb[57].mxu1  ;;  %v3377_v28 = vadd.f32 %v3376_v25, %v3375_v23  ;;  %v3378_v34 = vpop.f32.mrb[58].mxu0  ;;  %v1886_v23 = vpack.c.bf16 (!%p3224_p3), %v4712_v50, %v4710_v46  ;;  %v1888_v25 = vpack.c.bf16 (!%p3224_p3), %v4720_v22, %v4718_v19 }
 0x2d2   : > { %v3489_v30 = vadd.f32 %v3488_v26, %v3487_v24  ;;  %v3490_v35 = vpop.f32.mrb[58].mxu1  ;;  %v3379_v36 = vpop.f32.mrb[59].mxu0  ;;  %v1887_v24 = vpack.c.bf16 (!%p3224_p3), %v4716_v5, %v4714_v1  ;;  %v1889_v26 = vpack.c.bf16 (!%p3224_p3), %v4724_v42, %v4722_v38 }
 0x2d3   : > { %v3491_v37 = vpop.f32.mrb[59].mxu1  ;;  %v3380_v41 = vadd.f32 %v3379_v36, %v3378_v34  ;;  %1909 = vst [vmem:[%s1900_s25 + $0x40] sm:$0xff] (!%p3224_p3), %v1886_v23  ;;  %1911 = vst [vmem:[%s1900_s25 + $0x50] sm:$0xff] (!%p3224_p3), %v1888_v25  ;;  %v1918_v36 = vld [vmem:[%s4779_s12] sm:$0xff] (!%p3224_p3) }
 0x2d4   : > { %v4734_v39 = vadd.f32 %v3489_v30, %v3377_v28  ;;  %v3492_v43 = vadd.f32 %v3491_v37, %v3490_v35  ;;  %v1890_v28 = vpack.c.bf16 (!%p3224_p3), %v4728_v63, %v4726_v59  ;;  %v1891_v30 = vpack.c.bf16 (!%p3224_p3), %v4732_v21, %v4730_v16  ;;  %1910 = vst [vmem:[%s1900_s25 + $0x48] sm:$0xff] (!%p3224_p3), %v1887_v24  ;;  %v1919_v37 = vld [vmem:[%s4779_s12 + $0x8] sm:$0xff] (!%p3224_p3) }
 0x2d5   : > { %1912 = vst [vmem:[%s1900_s25 + $0x58] sm:$0xff] (!%p3224_p3), %v1889_v26  ;;  %v1928_v26 = vld [vmem:[%s4779_s12 + $0x50] sm:$0xff] (!%p3224_p3) }
 0x2d6   : > { %v4736_v44 = vadd.f32 %v3492_v43, %v3380_v41  ;;  %1913 = vst [vmem:[%s1900_s25 + $0x60] sm:$0xff] (!%p3224_p3), %v1890_v28  ;;  %1914 = vst [vmem:[%s1900_s25 + $0x68] sm:$0xff] (!%p3224_p3), %v1891_v30  ;;  %v4783_v41 = vstv (!%p3224_p3), %s3228_s13  ;;  %v1920_v43 = vld [vmem:[%s4779_s12 + $0x10] sm:$0xff] (!%p3224_p3) }
 0x2d7   : > { %v3381_v47 = vpop.f32.mrb[60].mxu0  ;;  %v1959_v8 = vmul.f32 (!%p3224_p3), %v4783_v41, %v4692_v32  ;;  %v1929_v28 = vld [vmem:[%s4779_s12 + $0x58] sm:$0xff] (!%p3224_p3)  ;;  %v1930_v30 = vld [vmem:[%s4779_s12 + $0x60] sm:$0xff] (!%p3224_p3) }
 0x2d8   : > { %v3493_v49 = vpop.f32.mrb[60].mxu1  ;;  %v3382_v51 = vpop.f32.mrb[61].mxu0  ;;  %1877 = sbr.rel (%p3224_p3) target bundleno = 754 (0x2f2), region = 52  ;;  %v1892_v34 = vpack.c.bf16 (!%p3224_p3), %v4736_v44, %v4734_v39 }
 0x2d9   : > { %v3494_v52 = vpop.f32.mrb[61].mxu1  ;;  %v3383_v54 = vadd.f32 %v3382_v51, %v3381_v47  ;;  %v3384_v57 = vpop.f32.mrb[62].mxu0  ;;  %v1921_v47 = vld [vmem:[%s4779_s12 + $0x18] sm:$0xff] (!%p3224_p3)  ;;  %v1952_v51 = vmul.f32 (!%p3224_p3), %v4783_v41, %v4678_v53 }
 0x2da   : > { %v3495_v55 = vadd.f32 %v3494_v52, %v3493_v49  ;;  %v3496_v58 = vpop.f32.mrb[62].mxu1  ;;  %v3385_v60 = vpop.f32.mrb[63].mxu0  ;;  %1915 = vst [vmem:[%s1900_s25 + $0x70] sm:$0xff] (!%p3224_p3), %v1892_v34  ;;  %v1922_v49 = vld [vmem:[%s4779_s12 + $0x20] sm:$0xff] (!%p3224_p3)  ;;  %v1953_v52 = vmul.f32 (!%p3224_p3), %v4783_v41, %v4680_v56  ;;  %v1960_v34 = vmul.f32 (!%p3224_p3), %v4783_v41, %v4694_v45 }
 0x2db   : > { %v3497_v62 = vpop.f32.mrb[63].mxu1  ;;  %v3386_v4 = vadd.f32 %v3385_v60, %v3384_v57  ;;  %v1923_v57 = vld [vmem:[%s4779_s12 + $0x28] sm:$0xff] (!%p3224_p3)  ;;  %v1925_v60 = vld [vmem:[%s4779_s12 + $0x38] sm:$0xff] (!%p3224_p3)  ;;  %v1984_v9 = vadd.f32 (!%p3224_p3), %v1952_v51, %v1918_v36  ;;  %v1962_v36 = vmul.f32 (!%p3224_p3), %v4783_v41, %v4698_v61  ;;  %v1964_v51 = vmul.f32 (!%p3224_p3), %v4783_v41, %v4702_v11 }
 0x2dc   : > { %v4738_v2 = vadd.f32 %v3495_v55, %v3383_v54  ;;  %v3498_v6 = vadd.f32 %v3497_v62, %v3496_v58  ;;  %v1954_v54 = vmul.f32 (!%p3224_p3), %v4783_v41, %v4682_v3  ;;  %v1955_v55 = vmul.f32 (!%p3224_p3), %v4783_v41, %v4684_v33  ;;  %v1924_v58 = vld [vmem:[%s4779_s12 + $0x30] sm:$0xff] (!%p3224_p3) }
 0x2dd   : > { %v1956_v62 = vmul.f32 (!%p3224_p3), %v4783_v41, %v4686_v15  ;;  %v1985_v40 = vadd.f32 (!%p3224_p3), %v1953_v52, %v1919_v37  ;;  %v1991_v25 = vadd.f32 (!%p3224_p3), %v1959_v8, %v1925_v60  ;;  %2016 = vst [vmem:[%s4779_s12] sm:$0xff] (!%p3224_p3), %v1984_v9  ;;  %v1963_v37 = vmul.f32 (!%p3224_p3), %v4783_v41, %v4700_v0 }
 0x2de   : > { %v4740_v7 = vadd.f32 %v3498_v6, %v3386_v4  ;;  %v1957_v4 = vmul.f32 (!%p3224_p3), %v4783_v41, %v4688_v18  ;;  %v1958_v6 = vmul.f32 (!%p3224_p3), %v4783_v41, %v4690_v29  ;;  %v1986_v10 = vadd.f32 (!%p3224_p3), %v1954_v54, %v1920_v43  ;;  %v1931_v43 = vld [vmem:[%s4779_s12 + $0x68] sm:$0xff] (!%p3224_p3) }
 0x2df   : > { %v1987_v12 = vadd.f32 %v1955_v55, %v1921_v47  ;;  %v1988_v20 = vadd.f32 %v1956_v62, %v1922_v49  ;;  %2017 = vst [vmem:[%s4779_s12 + $0x8] sm:$0xff] %v1985_v40  ;;  %v1932_v47 = vld [vmem:[%s4779_s12 + $0x70] sm:$0xff]  ;;  %v1933_v49 = vld [vmem:[%s4779_s12 + $0x78] sm:$0xff]  ;;  %2023 = vst [vmem:[%s4779_s12 + $0x38] sm:$0xff] %v1991_v25  ;;  %v1965_v52 = vmul.f32 %v4783_v41, %v4704_v14 }
 0x2e0   : > { %v1893_v35 = vpack.c.bf16 %v4740_v7, %v4738_v2  ;;  %v1989_v23 = vadd.f32 %v1957_v4, %v1923_v57  ;;  %v1990_v24 = vadd.f32 %v1958_v6, %v1924_v58  ;;  %2018 = vst [vmem:[%s4779_s12 + $0x10] sm:$0xff] %v1986_v10  ;;  %v1966_v54 = vmul.f32 %v4783_v41, %v4706_v27  ;;  %v1934_v4 = vld [vmem:[%s4779_s12 + $0x80] sm:$0xff]  ;;  %v1935_v6 = vld [vmem:[%s4779_s12 + $0x88] sm:$0xff] }
 0x2e1   : > { %2019 = vst [vmem:[%s4779_s12 + $0x18] sm:$0xff] %v1987_v12  ;;  %2020 = vst [vmem:[%s4779_s12 + $0x20] sm:$0xff] %v1988_v20  ;;  %v1967_v55 = vmul.f32 %v4783_v41, %v4708_v31  ;;  %v1992_v57 = vadd.f32 %v1960_v34, %v1926_v13  ;;  %v1994_v60 = vadd.f32 %v1962_v36, %v1928_v26  ;;  %v1936_v12 = vld [vmem:[%s4779_s12 + $0x90] sm:$0xff]  ;;  %v1937_v20 = vld [vmem:[%s4779_s12 + $0x98] sm:$0xff] }
 0x2e2   : > { %1916 = vst [vmem:[%s1900_s25 + $0x78] sm:$0xff] %v1893_v35  ;;  %v1961_v35 = vmul.f32 %v4783_v41, %v4696_v48  ;;  %2021 = vst [vmem:[%s4779_s12 + $0x28] sm:$0xff] %v1989_v23  ;;  %v1995_v62 = vadd.f32 %v1963_v37, %v1929_v28  ;;  %v1996_v8 = vadd.f32 %v1964_v51, %v1930_v30  ;;  %v1938_v13 = vld [vmem:[%s4779_s12 + $0xa0] sm:$0xff]  ;;  %v1939_v26 = vld [vmem:[%s4779_s12 + $0xa8] sm:$0xff] }
 0x2e3   : > { %2022 = vst [vmem:[%s4779_s12 + $0x30] sm:$0xff] %v1990_v24  ;;  %v1997_v9 = vadd.f32 %v1965_v52, %v1931_v43  ;;  %v1998_v40 = vadd.f32 %v1966_v54, %v1932_v47  ;;  %v1999_v10 = vadd.f32 %v1967_v55, %v1933_v49  ;;  %2024 = vst [vmem:[%s4779_s12 + $0x40] sm:$0xff] %v1992_v57  ;;  %v1940_v28 = vld [vmem:[%s4779_s12 + $0xb0] sm:$0xff]  ;;  %v1941_v30 = vld [vmem:[%s4779_s12 + $0xb8] sm:$0xff] }
 0x2e4   : > { %v1993_v58 = vadd.f32 %v1961_v35, %v1927_v17  ;;  %2026 = vst [vmem:[%s4779_s12 + $0x50] sm:$0xff] %v1994_v60  ;;  %2027 = vst [vmem:[%s4779_s12 + $0x58] sm:$0xff] %v1995_v62  ;;  %v1968_v17 = vmul.f32 %v4783_v41, %v4710_v46  ;;  %v1969_v23 = vmul.f32 %v4783_v41, %v4712_v50  ;;  %v1942_v52 = vld [vmem:[%s4779_s12 + $0xc0] sm:$0xff]  ;;  %v1943_v54 = vld [vmem:[%s4779_s12 + $0xc8] sm:$0xff] }
 0x2e5   : > { %v1970_v24 = vmul.f32 %v4783_v41, %v4714_v1  ;;  %v1971_v25 = vmul.f32 %v4783_v41, %v4716_v5  ;;  %2028 = vst [vmem:[%s4779_s12 + $0x60] sm:$0xff] %v1996_v8  ;;  %2029 = vst [vmem:[%s4779_s12 + $0x68] sm:$0xff] %v1997_v9  ;;  %v1972_v34 = vmul.f32 %v4783_v41, %v4718_v19  ;;  %v1944_v62 = vld [vmem:[%s4779_s12 + $0xd0] sm:$0xff]  ;;  %v1945_v8 = vld [vmem:[%s4779_s12 + $0xd8] sm:$0xff] }
 0x2e6   : > { %2025 = vst [vmem:[%s4779_s12 + $0x48] sm:$0xff] %v1993_v58  ;;  %2030 = vst [vmem:[%s4779_s12 + $0x70] sm:$0xff] %v1998_v40  ;;  %v1973_v35 = vmul.f32 %v4783_v41, %v4720_v22  ;;  %v1974_v36 = vmul.f32 %v4783_v41, %v4722_v38  ;;  %v1975_v37 = vmul.f32 %v4783_v41, %v4724_v42 }
 0x2e7   : > { %2031 = vst [vmem:[%s4779_s12 + $0x78] sm:$0xff] %v1999_v10  ;;  %v2000_v43 = vadd.f32 %v1968_v17, %v1934_v4  ;;  %v2001_v47 = vadd.f32 %v1969_v23, %v1935_v6  ;;  %v2002_v49 = vadd.f32 %v1970_v24, %v1936_v12  ;;  %v2003_v51 = vadd.f32 %v1971_v25, %v1937_v20  ;;  %v1946_v4 = vld [vmem:[%s4779_s12 + $0xe0] sm:$0xff]  ;;  %v1947_v12 = vld [vmem:[%s4779_s12 + $0xe8] sm:$0xff]  ;;  %v1948_v20 = vld [vmem:[%s4779_s12 + $0xf0] sm:$0xff] }
 0x2e8   : > { %v2004_v55 = vadd.f32 %v1972_v34, %v1938_v13  ;;  %v2005_v57 = vadd.f32 %v1973_v35, %v1939_v26  ;;  %v2006_v58 = vadd.f32 %v1974_v36, %v1940_v28  ;;  %v2007_v60 = vadd.f32 %v1975_v37, %v1941_v30  ;;  %v1949_v13 = vld [vmem:[%s4779_s12 + $0xf8] sm:$0xff] }
 0x2e9   : > { %2032 = vst [vmem:[%s4779_s12 + $0x80] sm:$0xff] %v2000_v43  ;;  %2033 = vst [vmem:[%s4779_s12 + $0x88] sm:$0xff] %v2001_v47  ;;  %v1976_v6 = vmul.f32 %v4783_v41, %v4726_v59  ;;  %v1977_v9 = vmul.f32 %v4783_v41, %v4728_v63  ;;  %v1978_v40 = vmul.f32 %v4783_v41, %v4730_v16 }
 0x2ea   : > { %2034 = vst [vmem:[%s4779_s12 + $0x90] sm:$0xff] %v2002_v49  ;;  %2035 = vst [vmem:[%s4779_s12 + $0x98] sm:$0xff] %v2003_v51  ;;  %v1979_v10 = vmul.f32 %v4783_v41, %v4732_v21  ;;  %v1980_v17 = vmul.f32 %v4783_v41, %v4734_v39  ;;  %v1981_v23 = vmul.f32 %v4783_v41, %v4736_v44 }
 0x2eb   : > { %2036 = vst [vmem:[%s4779_s12 + $0xa0] sm:$0xff] %v2004_v55  ;;  %2037 = vst [vmem:[%s4779_s12 + $0xa8] sm:$0xff] %v2005_v57  ;;  %v1982_v24 = vmul.f32 %v4783_v41, %v4738_v2  ;;  %v1983_v25 = vmul.f32 %v4783_v41, %v4740_v7  ;;  %v2008_v26 = vadd.f32 %v1976_v6, %v1942_v52 }
 0x2ec   : > { %2038 = vst [vmem:[%s4779_s12 + $0xb0] sm:$0xff] %v2006_v58  ;;  %2039 = vst [vmem:[%s4779_s12 + $0xb8] sm:$0xff] %v2007_v60  ;;  %v2009_v28 = vadd.f32 %v1977_v9, %v1943_v54  ;;  %v2010_v30 = vadd.f32 %v1978_v40, %v1944_v62  ;;  %v2011_v34 = vadd.f32 %v1979_v10, %v1945_v8 }
 0x2ed   : > { %v2012_v35 = vadd.f32 %v1980_v17, %v1946_v4  ;;  %v2013_v36 = vadd.f32 %v1981_v23, %v1947_v12  ;;  %v2014_v37 = vadd.f32 %v1982_v24, %v1948_v20  ;;  %v2015_v43 = vadd.f32 %v1983_v25, %v1949_v13  ;;  %2040 = vst [vmem:[%s4779_s12 + $0xc0] sm:$0xff] %v2008_v26 }
 0x2ee   : > { %2041 = vst [vmem:[%s4779_s12 + $0xc8] sm:$0xff] %v2009_v28  ;;  %2042 = vst [vmem:[%s4779_s12 + $0xd0] sm:$0xff] %v2010_v30 }
 0x2ef   : > { %2043 = vst [vmem:[%s4779_s12 + $0xd8] sm:$0xff] %v2011_v34  ;;  %2044 = vst [vmem:[%s4779_s12 + $0xe0] sm:$0xff] %v2012_v35 }
 0x2f0   : > { %2045 = vst [vmem:[%s4779_s12 + $0xe8] sm:$0xff] %v2013_v36  ;;  %2046 = vst [vmem:[%s4779_s12 + $0xf0] sm:$0xff] %v2014_v37 }
 0x2f1   : > { %2047 = vst [vmem:[%s4779_s12 + $0xf8] sm:$0xff] %v2015_v43 }
 0x2f2 PF: > { %p3229_p4 = scmp.le.s32.totalorder %s4165_s27, 0 }
 0x2f3   : > { %s3241_s9 = sshll.u32 (!%p3229_p4), %s1128_s18, 8  ;;  %s2055_s14 = sshra.s32 (!%p3229_p4), %s4300_s11, 4  ;;  %v2107_v41 = vmul.f32 (!%p3229_p4), 2.0, %v4678_v53  ;;  %v2108_v47 = vmul.f32 (!%p3229_p4), 2.0, %v4680_v56  ;;  %v2109_v49 = vmul.f32 (!%p3229_p4), 2.0, %v4682_v3  ;;  %v2110_v51 = vmul.f32 (!%p3229_p4), 2.0, %v4684_v33 }
 0x2f4   : > { %2051 = sbr.rel (%p3229_p4) target bundleno = 807 (0x327), region = 56  ;;  %s3232_s10 = sshll.u32 (!%p3229_p4), %s2055_s14, 3  ;;  %v2111_v52 = vmul.f32 (!%p3229_p4), 2.0, %v4686_v15  ;;  %v2112_v54 = vmul.f32 (!%p3229_p4), 2.0, %v4688_v18  ;;  %v2113_v55 = vmul.f32 (!%p3229_p4), 2.0, %v4690_v29  ;;  %v2114_v57 = vmul.f32 (!%p3229_p4), 2.0, %v4692_v32 }
 0x2f5   : > { %s2054_s15 = scalar_lea.vmem (!%p3229_p4), [#allocation2], %s3241_s9  ;;  %v2115_v53 = vmul.f32 (!%p3229_p4), 2.0, %v4694_v45  ;;  %v2116_v56 = vmul.f32 (!%p3229_p4), 2.0, %v4696_v48  ;;  %v2117_v3 = vmul.f32 (!%p3229_p4), 2.0, %v4698_v61  ;;  %v2118_v33 = vmul.f32 (!%p3229_p4), 2.0, %v4700_v0  ;;  %s2236_s16 = sadd.s32 (!%p3229_p4), 1, %s4165_s27 }
 0x2f6   : > { %s4923_s26 = scalar_lea.vmem (!%p3229_p4), %s2054_s15, %s3232_s10 [#allocation2]  ;;  %v2119_v32 = vmul.f32 (!%p3229_p4), 2.0, %v4702_v11  ;;  %v2120_v58 = vmul.f32 (!%p3229_p4), 2.0, %v4704_v14  ;;  %v2121_v60 = vmul.f32 (!%p3229_p4), 2.0, %v4706_v27  ;;  %s5026_s17 = sld [smem:[#allocation5 + %s2236_s16]] (!%p3229_p4) }
 0x2f7   : > { %v2059_v15 = vld [vmem:[%s4923_s26] sm:$0xff] (!%p3229_p4)  ;;  %v2060_v18 = vld [vmem:[%s4923_s26 + $0x8] sm:$0xff] (!%p3229_p4)  ;;  %v2061_v29 = vld [vmem:[%s4923_s26 + $0x10] sm:$0xff] (!%p3229_p4)  ;;  %s5070_s18 = scalar_lea.vmem (!%p3229_p4), [#allocation3], %s4300_s11 }
 0x2f8   : > { %v2075_v62 = vunpack.c.l.bf16 (!%p3229_p4), %v2059_v15  ;;  %v2076_v8 = vunpack.c.h.bf16 (!%p3229_p4), %v2059_v15  ;;  %v2077_v45 = vunpack.c.l.bf16 (!%p3229_p4), %v2060_v18  ;;  %v2078_v4 = vunpack.c.h.bf16 (!%p3229_p4), %v2060_v18  ;;  %v2062_v48 = vld [vmem:[%s4923_s26 + $0x18] sm:$0xff] (!%p3229_p4)  ;;  %v2063_v40 = vld [vmem:[%s4923_s26 + $0x20] sm:$0xff] (!%p3229_p4)  ;;  %v2064_v27 = vld [vmem:[%s4923_s26 + $0x28] sm:$0xff] (!%p3229_p4) }
 0x2f9   : > { %v2079_v61 = vunpack.c.l.bf16 (!%p3229_p4), %v2061_v29  ;;  %v2080_v6 = vunpack.c.h.bf16 (!%p3229_p4), %v2061_v29  ;;  %v2081_v0 = vunpack.c.l.bf16 (!%p3229_p4), %v2062_v48  ;;  %v2082_v9 = vunpack.c.h.bf16 (!%p3229_p4), %v2062_v48  ;;  %v2065_v24 = vld [vmem:[%s4923_s26 + $0x30] sm:$0xff] (!%p3229_p4)  ;;  %v2066_v34 = vld [vmem:[%s4923_s26 + $0x38] sm:$0xff] (!%p3229_p4) }
 0x2fa   : > { %v4937_v10 = vsub.f32 (!%p3229_p4), %v2107_v41, %v2075_v62  ;;  %v4939_v11 = vsub.f32 (!%p3229_p4), %v2108_v47, %v2076_v8  ;;  %v4941_v14 = vsub.f32 (!%p3229_p4), %v2109_v49, %v2077_v45  ;;  %v4943_v12 = vsub.f32 (!%p3229_p4), %v2110_v51, %v2078_v4  ;;  %v2068_v62 = vld [vmem:[%s4923_s26 + $0x48] sm:$0xff] (!%p3229_p4)  ;;  %v2069_v4 = vld [vmem:[%s4923_s26 + $0x50] sm:$0xff] (!%p3229_p4) }
 0x2fb   : > { %v4946_v20 = vsub.f32 %v2111_v52, %v2079_v61  ;;  %v4948_v13 = vsub.f32 %v2112_v54, %v2080_v6  ;;  %v4950_v17 = vsub.f32 %v2113_v55, %v2081_v0  ;;  %v4952_v23 = vsub.f32 %v2114_v57, %v2082_v9  ;;  %v2067_v52 = vld [vmem:[%s4923_s26 + $0x40] sm:$0xff]  ;;  %v2070_v9 = vld [vmem:[%s4923_s26 + $0x58] sm:$0xff] }
 0x2fc   : > { %v2171_v25 = vpack.c.bf16 %v4939_v11, %v4937_v10  ;;  %v2172_v26 = vpack.c.bf16 %v4943_v12, %v4941_v14  ;;  %v2083_v28 = vunpack.c.l.bf16 %v2063_v40  ;;  %v2084_v30 = vunpack.c.h.bf16 %v2063_v40 }
 0x2fd   : > { %v2173_v35 = vpack.c.bf16 %v4948_v13, %v4946_v20  ;;  %v2174_v36 = vpack.c.bf16 %v4952_v23, %v4950_v17  ;;  %v2085_v37 = vunpack.c.l.bf16 %v2064_v27  ;;  %v2086_v43 = vunpack.c.h.bf16 %v2064_v27 }
 0x2fe   : > { %2187 = vst [vmem:[%s4923_s26] sm:$0xff] %v2171_v25  ;;  %2188 = vst [vmem:[%s4923_s26 + $0x8] sm:$0xff] %v2172_v26  ;;  %v4966_v41 = vsub.f32 %v2115_v53, %v2083_v28  ;;  %v4968_v47 = vsub.f32 %v2116_v56, %v2084_v30  ;;  %v2087_v49 = vunpack.c.l.bf16 %v2065_v24  ;;  %v2088_v51 = vunpack.c.h.bf16 %v2065_v24  ;;  %v2071_v26 = vld [vmem:[%s4923_s26 + $0x60] sm:$0xff] }
 0x2ff   : > { %2189 = vst [vmem:[%s4923_s26 + $0x10] sm:$0xff] %v2173_v35  ;;  %2190 = vst [vmem:[%s4923_s26 + $0x18] sm:$0xff] %v2174_v36  ;;  %v4973_v54 = vsub.f32 %v2117_v3, %v2085_v37  ;;  %v4975_v55 = vsub.f32 %v2118_v33, %v2086_v43  ;;  %v2089_v57 = vunpack.c.l.bf16 %v2066_v34  ;;  %v2090_v15 = vunpack.c.h.bf16 %v2066_v34  ;;  %v2072_v36 = vld [vmem:[%s4923_s26 + $0x68] sm:$0xff] }
 0x300   : > { %v2175_v53 = vpack.c.bf16 %v4968_v47, %v4966_v41  ;;  %v4979_v18 = vsub.f32 %v2119_v32, %v2087_v49  ;;  %v4981_v56 = vsub.f32 %v2120_v58, %v2088_v51  ;;  %v2122_v29 = vmul.f32 2.0, %v4708_v31 }
 0x301   : > { %v2176_v3 = vpack.c.bf16 %v4975_v55, %v4973_v54  ;;  %v4987_v33 = vsub.f32 %v2121_v60, %v2089_v57  ;;  %v2091_v8 = vunpack.c.l.bf16 %v2067_v52  ;;  %v2092_v45 = vunpack.c.h.bf16 %v2067_v52 }
 0x302   : > { %2191 = vst [vmem:[%s4923_s26 + $0x20] sm:$0xff] %v2175_v53  ;;  %v2177_v32 = vpack.c.bf16 %v4981_v56, %v4979_v18  ;;  %v4993_v58 = vsub.f32 %v2122_v29, %v2090_v15  ;;  %v2123_v31 = vmul.f32 2.0, %v4710_v46  ;;  %v2124_v48 = vmul.f32 2.0, %v4712_v50  ;;  %v2073_v15 = vld [vmem:[%s4923_s26 + $0x70] sm:$0xff] }
 0x303   : > { %2192 = vst [vmem:[%s4923_s26 + $0x28] sm:$0xff] %v2176_v3  ;;  %v2093_v61 = vunpack.c.l.bf16 %v2068_v62  ;;  %v2094_v60 = vunpack.c.h.bf16 %v2068_v62  ;;  %v2125_v6 = vmul.f32 2.0, %v4714_v1  ;;  %v2126_v0 = vmul.f32 2.0, %v4716_v5 }
 0x304   : > { %2193 = vst [vmem:[%s4923_s26 + $0x30] sm:$0xff] %v2177_v32  ;;  %v2178_v40 = vpack.c.bf16 %v4993_v58, %v4987_v33  ;;  %v5004_v27 = vsub.f32 %v2123_v31, %v2091_v8  ;;  %v5006_v46 = vsub.f32 %v2124_v48, %v2092_v45  ;;  %v2095_v50 = vunpack.c.l.bf16 %v2069_v4 }
 0x305   : > { %v5009_v24 = vsub.f32 %v2125_v6, %v2093_v61  ;;  %v5011_v25 = vsub.f32 %v2126_v0, %v2094_v60  ;;  %v2096_v1 = vunpack.c.h.bf16 %v2069_v4  ;;  %v2127_v5 = vmul.f32 2.0, %v4718_v19 }
 0x306   : > { %2194 = vst [vmem:[%s4923_s26 + $0x38] sm:$0xff] %v2178_v40  ;;  %v2179_v28 = vpack.c.bf16 %v5006_v46, %v5004_v27  ;;  %v2128_v30 = vmul.f32 2.0, %v4720_v22  ;;  %v2097_v34 = vunpack.c.l.bf16 %v2070_v9  ;;  %v2098_v35 = vunpack.c.h.bf16 %v2070_v9 }
 0x307   : > { %v2180_v37 = vpack.c.bf16 %v5011_v25, %v5009_v24  ;;  %v5022_v43 = vsub.f32 %v2127_v5, %v2095_v50  ;;  %v2129_v49 = vmul.f32 2.0, %v4722_v38  ;;  %v2130_v19 = vmul.f32 2.0, %v4724_v42 }
 0x308   : > { %2195 = vst [vmem:[%s4923_s26 + $0x40] sm:$0xff] %v2179_v28  ;;  %v5029_v51 = vsub.f32 %v2128_v30, %v2096_v1  ;;  %v2099_v52 = vunpack.c.l.bf16 %v2071_v26  ;;  %v2100_v22 = vunpack.c.h.bf16 %v2071_v26  ;;  %v2131_v57 = vmul.f32 2.0, %v4726_v59  ;;  %v2074_v59 = vld [vmem:[%s4923_s26 + $0x78] sm:$0xff] }
 0x309   : > { %2196 = vst [vmem:[%s4923_s26 + $0x48] sm:$0xff] %v2180_v37  ;;  %v5034_v53 = vsub.f32 %v2129_v49, %v2097_v34  ;;  %v5036_v29 = vsub.f32 %v2130_v19, %v2098_v35  ;;  %v2132_v38 = vmul.f32 2.0, %v4728_v63  ;;  %v2101_v42 = vunpack.c.l.bf16 %v2072_v36  ;;  %v2206_v35 = vld [vmem:[%s5070_s18 + $0x10] sm:$0xff]  ;;  %v2208_v37 = vld [vmem:[%s5070_s18 + $0x20] sm:$0xff] }
 0x30a   : > { %v2181_v62 = vpack.c.bf16 %v5029_v51, %v5022_v43  ;;  %v5041_v3 = vsub.f32 %v2131_v57, %v2099_v52  ;;  %v2102_v8 = vunpack.c.h.bf16 %v2072_v36  ;;  %v2133_v45 = vmul.f32 2.0, %v4730_v16  ;;  %v2207_v36 = vld [vmem:[%s5070_s18 + $0x18] sm:$0xff]  ;;  %v2210_v57 = vld [vmem:[%s5070_s18 + $0x30] sm:$0xff] }
 0x30b   : > { %v2182_v4 = vpack.c.bf16 %v5036_v29, %v5034_v53  ;;  %v5047_v32 = vsub.f32 %v2132_v38, %v2100_v22  ;;  %v2134_v31 = vmul.f32 2.0, %v4732_v21  ;;  %v2103_v63 = vunpack.c.l.bf16 %v2073_v15  ;;  %v2209_v22 = vld [vmem:[%s5070_s18 + $0x28] sm:$0xff] }
 0x30c   : > { %2197 = vst [vmem:[%s4923_s26 + $0x50] sm:$0xff] %v2181_v62  ;;  %v5051_v48 = vsub.f32 %v2133_v45, %v2101_v42  ;;  %v2104_v61 = vunpack.c.h.bf16 %v2073_v15  ;;  %v2135_v60 = vmul.f32 2.0, %v4734_v39  ;;  %v2136_v16 = vmul.f32 2.0, %v4736_v44  ;;  %v2204_v44 = vld [vmem:[%s5070_s18] sm:$0xff] }
 0x30d   : > { %2198 = vst [vmem:[%s4923_s26 + $0x58] sm:$0xff] %v2182_v4  ;;  %v2183_v6 = vpack.c.bf16 %v5047_v32, %v5041_v3  ;;  %v5058_v0 = vsub.f32 %v2134_v31, %v2102_v8  ;;  %v2105_v9 = vunpack.c.l.bf16 %v2074_v59  ;;  %v2106_v21 = vunpack.c.h.bf16 %v2074_v59  ;;  %v2211_v8 = vld [vmem:[%s5070_s18 + $0x38] sm:$0xff]  ;;  %v2212_v45 = vld [vmem:[%s5070_s18 + $0x40] sm:$0xff]  ;;  %v2213_v59 = vld [vmem:[%s5070_s18 + $0x48] sm:$0xff] }
 0x30e   : > { %v5060_v40 = vsub.f32 %v2135_v60, %v2103_v63  ;;  %v5062_v50 = vsub.f32 %v2136_v16, %v2104_v61  ;;  %v2137_v1 = vmul.f32 2.0, %v4738_v2  ;;  %v2138_v5 = vmul.f32 2.0, %v4740_v7  ;;  %v2205_v2 = vld [vmem:[%s5070_s18 + $0x8] sm:$0xff]  ;;  %v2214_v63 = vld [vmem:[%s5070_s18 + $0x50] sm:$0xff]  ;;  %v2215_v61 = vld [vmem:[%s5070_s18 + $0x58] sm:$0xff] }
 0x30f   : > { %2199 = vst [vmem:[%s4923_s26 + $0x60] sm:$0xff] %v2183_v6  ;;  %v2184_v39 = vpack.c.bf16 %v5058_v0, %v5051_v48  ;;  %v5074_v26 = vstv %s5026_s17  ;;  %v2216_v60 = vld [vmem:[%s5070_s18 + $0x60] sm:$0xff] }
 0x310   : > { %v2185_v7 = vpack.c.bf16 %v5062_v50, %v5060_v40  ;;  %v5079_v28 = vsub.f32 %v2137_v1, %v2105_v9  ;;  %v5081_v30 = vsub.f32 %v2138_v5, %v2106_v21  ;;  %v2239_v34 = vmul.f32 %v5074_v26, %v4937_v10  ;;  %v2217_v9 = vld [vmem:[%s5070_s18 + $0x68] sm:$0xff]  ;;  %v2218_v21 = vld [vmem:[%s5070_s18 + $0x70] sm:$0xff] }
 0x311   : > { %2200 = vst [vmem:[%s4923_s26 + $0x68] sm:$0xff] %v2184_v39  ;;  %v2240_v49 = vmul.f32 %v5074_v26, %v4939_v11  ;;  %v2241_v19 = vmul.f32 %v5074_v26, %v4941_v14  ;;  %v2242_v52 = vmul.f32 %v5074_v26, %v4943_v12  ;;  %v2243_v10 = vmul.f32 %v5074_v26, %v4946_v20 }
 0x312   : > { %2201 = vst [vmem:[%s4923_s26 + $0x70] sm:$0xff] %v2185_v7  ;;  %v2186_v15 = vpack.c.bf16 %v5081_v30, %v5079_v28  ;;  %v2271_v11 = vadd.f32 %v2239_v34, %v2204_v44  ;;  %v2244_v14 = vmul.f32 %v5074_v26, %v4948_v13  ;;  %v2245_v12 = vmul.f32 %v5074_v26, %v4950_v17  ;;  %v2220_v7 = vld [vmem:[%s5070_s18 + $0x80] sm:$0xff]  ;;  %v2221_v34 = vld [vmem:[%s5070_s18 + $0x88] sm:$0xff] }
 0x313   : > { %v2272_v38 = vadd.f32 %v2240_v49, %v2205_v2  ;;  %v2273_v20 = vadd.f32 %v2241_v19, %v2206_v35  ;;  %v2274_v42 = vadd.f32 %v2242_v52, %v2207_v36  ;;  %v2275_v62 = vadd.f32 %v2243_v10, %v2208_v37  ;;  %v2219_v2 = vld [vmem:[%s5070_s18 + $0x78] sm:$0xff]  ;;  %v2222_v37 = vld [vmem:[%s5070_s18 + $0x90] sm:$0xff]  ;;  %v2224_v19 = vld [vmem:[%s5070_s18 + $0xa0] sm:$0xff] }
 0x314   : > { %2202 = vst [vmem:[%s4923_s26 + $0x78] sm:$0xff] %v2186_v15  ;;  %2303 = vst [vmem:[%s5070_s18] sm:$0xff] %v2271_v11  ;;  %v2276_v13 = vadd.f32 %v2244_v14, %v2209_v22  ;;  %v2277_v4 = vadd.f32 %v2245_v12, %v2210_v57  ;;  %v2246_v17 = vmul.f32 %v5074_v26, %v4952_v23  ;;  %v2223_v49 = vld [vmem:[%s5070_s18 + $0x98] sm:$0xff]  ;;  %v2225_v22 = vld [vmem:[%s5070_s18 + $0xa8] sm:$0xff] }
 0x315   : > { %v2247_v31 = vmul.f32 %v5074_v26, %v4966_v41  ;;  %2304 = vst [vmem:[%s5070_s18 + $0x8] sm:$0xff] %v2272_v38  ;;  %2305 = vst [vmem:[%s5070_s18 + $0x10] sm:$0xff] %v2273_v20  ;;  %v2248_v16 = vmul.f32 %v5074_v26, %v4968_v47  ;;  %v2249_v6 = vmul.f32 %v5074_v26, %v4973_v54  ;;  %v2226_v57 = vld [vmem:[%s5070_s18 + $0xb0] sm:$0xff]  ;;  %v2227_v38 = vld [vmem:[%s5070_s18 + $0xb8] sm:$0xff] }
 0x316   : > { %2306 = vst [vmem:[%s5070_s18 + $0x18] sm:$0xff] %v2274_v42  ;;  %2307 = vst [vmem:[%s5070_s18 + $0x20] sm:$0xff] %v2275_v62  ;;  %v2250_v23 = vmul.f32 %v5074_v26, %v4975_v55  ;;  %v2251_v41 = vmul.f32 %v5074_v26, %v4979_v18  ;;  %v2278_v1 = vadd.f32 %v2246_v17, %v2211_v8  ;;  %v2228_v20 = vld [vmem:[%s5070_s18 + $0xc0] sm:$0xff]  ;;  %v2229_v42 = vld [vmem:[%s5070_s18 + $0xc8] sm:$0xff] }
 0x317   : > { %2308 = vst [vmem:[%s5070_s18 + $0x28] sm:$0xff] %v2276_v13  ;;  %2309 = vst [vmem:[%s5070_s18 + $0x30] sm:$0xff] %v2277_v4  ;;  %v2279_v47 = vadd.f32 %v2247_v31, %v2212_v45  ;;  %v2252_v54 = vmul.f32 %v5074_v26, %v4981_v56  ;;  %v2253_v55 = vmul.f32 %v5074_v26, %v4987_v33  ;;  %v2230_v45 = vld [vmem:[%s5070_s18 + $0xd0] sm:$0xff]  ;;  %v2232_v13 = vld [vmem:[%s5070_s18 + $0xe0] sm:$0xff] }
 0x318   : > { %v2280_v5 = vadd.f32 %v2248_v16, %v2213_v59  ;;  %v2281_v18 = vadd.f32 %v2249_v6, %v2214_v63  ;;  %v2282_v39 = vadd.f32 %v2250_v23, %v2215_v61  ;;  %v2283_v44 = vadd.f32 %v2251_v41, %v2216_v60  ;;  %2310 = vst [vmem:[%s5070_s18 + $0x38] sm:$0xff] %v2278_v1  ;;  %v2231_v59 = vld [vmem:[%s5070_s18 + $0xd8] sm:$0xff]  ;;  %v2233_v31 = vld [vmem:[%s5070_s18 + $0xe8] sm:$0xff]  ;;  %v2234_v63 = vld [vmem:[%s5070_s18 + $0xf0] sm:$0xff] }
 0x319   : > { %2311 = vst [vmem:[%s5070_s18 + $0x40] sm:$0xff] %v2279_v47  ;;  %v2284_v56 = vadd.f32 %v2252_v54, %v2217_v9  ;;  %v2285_v35 = vadd.f32 %v2253_v55, %v2218_v21  ;;  %v2254_v33 = vmul.f32 %v5074_v26, %v4993_v58  ;;  %v2255_v36 = vmul.f32 %v5074_v26, %v5004_v27  ;;  %v2235_v23 = vld [vmem:[%s5070_s18 + $0xf8] sm:$0xff] }
 0x31a   : > { %2312 = vst [vmem:[%s5070_s18 + $0x48] sm:$0xff] %v2280_v5  ;;  %2313 = vst [vmem:[%s5070_s18 + $0x50] sm:$0xff] %v2281_v18  ;;  %v2256_v52 = vmul.f32 %v5074_v26, %v5006_v46  ;;  %v2257_v10 = vmul.f32 %v5074_v26, %v5009_v24  ;;  %v2258_v58 = vmul.f32 %v5074_v26, %v5011_v25 }
 0x31b   : > { %2314 = vst [vmem:[%s5070_s18 + $0x58] sm:$0xff] %v2282_v39  ;;  %2315 = vst [vmem:[%s5070_s18 + $0x60] sm:$0xff] %v2283_v44  ;;  %v2259_v27 = vmul.f32 %v5074_v26, %v5022_v43  ;;  %v2286_v15 = vadd.f32 %v2254_v33, %v2219_v2  ;;  %v2287_v46 = vadd.f32 %v2255_v36, %v2220_v7 }
 0x31c   : > { %2316 = vst [vmem:[%s5070_s18 + $0x68] sm:$0xff] %v2284_v56  ;;  %2317 = vst [vmem:[%s5070_s18 + $0x70] sm:$0xff] %v2285_v35  ;;  %v2260_v24 = vmul.f32 %v5074_v26, %v5029_v51  ;;  %v2261_v25 = vmul.f32 %v5074_v26, %v5034_v53  ;;  %v2288_v11 = vadd.f32 %v2256_v52, %v2221_v34 }
 0x31d   : > { %v2289_v43 = vadd.f32 %v2257_v10, %v2222_v37  ;;  %v2290_v14 = vadd.f32 %v2258_v58, %v2223_v49  ;;  %v2291_v12 = vadd.f32 %v2259_v27, %v2224_v19  ;;  %2318 = vst [vmem:[%s5070_s18 + $0x78] sm:$0xff] %v2286_v15  ;;  %2319 = vst [vmem:[%s5070_s18 + $0x80] sm:$0xff] %v2287_v46 }
 0x31e   : > { %v2292_v51 = vadd.f32 %v2260_v24, %v2225_v22  ;;  %v2293_v62 = vadd.f32 %v2261_v25, %v2226_v57  ;;  %v2262_v53 = vmul.f32 %v5074_v26, %v5036_v29  ;;  %v2263_v8 = vmul.f32 %v5074_v26, %v5041_v3  ;;  %2320 = vst [vmem:[%s5070_s18 + $0x88] sm:$0xff] %v2288_v11 }
 0x31f   : > { %2321 = vst [vmem:[%s5070_s18 + $0x90] sm:$0xff] %v2289_v43  ;;  %2322 = vst [vmem:[%s5070_s18 + $0x98] sm:$0xff] %v2290_v14  ;;  %v2264_v4 = vmul.f32 %v5074_v26, %v5047_v32  ;;  %v2265_v17 = vmul.f32 %v5074_v26, %v5051_v48  ;;  %v2266_v29 = vmul.f32 %v5074_v26, %v5058_v0 }
 0x320   : > { %2323 = vst [vmem:[%s5070_s18 + $0xa0] sm:$0xff] %v2291_v12  ;;  %v2267_v3 = vmul.f32 %v5074_v26, %v5060_v40  ;;  %2324 = vst [vmem:[%s5070_s18 + $0xa8] sm:$0xff] %v2292_v51  ;;  %v2294_v61 = vadd.f32 %v2262_v53, %v2227_v38  ;;  %v2295_v32 = vadd.f32 %v2263_v8, %v2228_v20 }
 0x321   : > { %2325 = vst [vmem:[%s5070_s18 + $0xb0] sm:$0xff] %v2293_v62  ;;  %v2268_v48 = vmul.f32 %v5074_v26, %v5062_v50  ;;  %v2269_v0 = vmul.f32 %v5074_v26, %v5079_v28  ;;  %v2296_v60 = vadd.f32 %v2264_v4, %v2229_v42  ;;  %v2297_v40 = vadd.f32 %v2265_v17, %v2230_v45 }
 0x322   : > { %v2298_v16 = vadd.f32 %v2266_v29, %v2231_v59  ;;  %v2299_v6 = vadd.f32 %v2267_v3, %v2232_v13  ;;  %2326 = vst [vmem:[%s5070_s18 + $0xb8] sm:$0xff] %v2294_v61  ;;  %2327 = vst [vmem:[%s5070_s18 + $0xc0] sm:$0xff] %v2295_v32  ;;  %v2270_v21 = vmul.f32 %v5074_v26, %v5081_v30 }
 0x323   : > { %v2300_v41 = vadd.f32 %v2268_v48, %v2233_v31  ;;  %v2301_v9 = vadd.f32 %v2269_v0, %v2234_v63  ;;  %2328 = vst [vmem:[%s5070_s18 + $0xc8] sm:$0xff] %v2296_v60  ;;  %2329 = vst [vmem:[%s5070_s18 + $0xd0] sm:$0xff] %v2297_v40 }
 0x324   : > { %2330 = vst [vmem:[%s5070_s18 + $0xd8] sm:$0xff] %v2298_v16  ;;  %2331 = vst [vmem:[%s5070_s18 + $0xe0] sm:$0xff] %v2299_v6  ;;  %v2302_v50 = vadd.f32 %v2270_v21, %v2235_v23 }
 0x325   : > { %2332 = vst [vmem:[%s5070_s18 + $0xe8] sm:$0xff] %v2300_v41  ;;  %2333 = vst [vmem:[%s5070_s18 + $0xf0] sm:$0xff] %v2301_v9 }
 0x326   : > { %2334 = vst [vmem:[%s5070_s18 + $0xf8] sm:$0xff] %v2302_v50 }
 0x327 PF: > { %p3233_p5 = scmp.ne.s32.totalorder %s4165_s27, 2 }
 0x328   : > { %v2372_v28 = vld [vmem:[%s5703_s4] sm:$0xff] (!%p3233_p5)  ;;  %v2373_v26 = vld [vmem:[%s5703_s4 + $0x8] sm:$0xff] (!%p3233_p5)  ;;  %v2374_v30 = vld [vmem:[%s5703_s4 + $0x10] sm:$0xff] (!%p3233_p5)  ;;  %s5234_s10 = scalar_lea.vmem (!%p3233_p5), [#allocation3], %s4300_s11  ;;  %v2613_v40 = vlaneseq (!%p3233_p5) }
 0x329   : > { %2338 = sbr.rel (%p3233_p5) target bundleno = 1437 (0x59d), region = 60  ;;  %v3693_v1 = vpack.c.bf16 (!%p3233_p5), %v2373_v26, %v2372_v28  ;;  %v2375_v47 = vld [vmem:[%s5703_s4 + $0x18] sm:$0xff] (!%p3233_p5)  ;;  %v2376_v55 = vld [vmem:[%s5703_s4 + $0x20] sm:$0xff] (!%p3233_p5)  ;;  %v2377_v5 = vld [vmem:[%s5703_s4 + $0x28] sm:$0xff] (!%p3233_p5) }
 0x32a   : > { %v3697_v54 = vpack.c.bf16 (!%p3233_p5), %v2375_v47, %v2374_v30  ;;  %v3701_v18 = vpack.c.bf16 (!%p3233_p5), %v2377_v5, %v2376_v55  ;;  %v2378_v2 = vld [vmem:[%s5703_s4 + $0x30] sm:$0xff] (!%p3233_p5)  ;;  %v2379_v7 = vld [vmem:[%s5703_s4 + $0x38] sm:$0xff] (!%p3233_p5)  ;;  %v2380_v56 = vld [vmem:[%s5703_s4 + $0x40] sm:$0xff] (!%p3233_p5)  ;;  %v5298_v16 = vand.u32 (!%p3233_p5), 127, %v2613_v40 }
 0x32b   : > { %3694 = vmatprep.subr.bf16.mxu0 (!%p3233_p5), %v3693_v1  ;;  %3727 = vmatprep.subr.bf16.mxu1 (!%p3233_p5), %v3693_v1  ;;  %v3705_v34 = vpack.c.bf16 (!%p3233_p5), %v2379_v7, %v2378_v2  ;;  %v2381_v35 = vld [vmem:[%s5703_s4 + $0x48] sm:$0xff] (!%p3233_p5)  ;;  %v2382_v36 = vld [vmem:[%s5703_s4 + $0x50] sm:$0xff] (!%p3233_p5)  ;;  %v2383_v37 = vld [vmem:[%s5703_s4 + $0x58] sm:$0xff] (!%p3233_p5) }
 0x32c   : > { %3696 = vmatpush3.bf16.msra.mxu0 (!%p3233_p5), %v3693_v1  ;;  %3735 = vmatpush3.bf16.msra.mxu1 (!%p3233_p5), %v3693_v1  ;;  %v3709_v33 = vpack.c.bf16 (!%p3233_p5), %v2381_v35, %v2380_v56  ;;  %v3713_v49 = vpack.c.bf16 (!%p3233_p5), %v2383_v37, %v2382_v36  ;;  %v2384_v19 = vld [vmem:[%s5703_s4 + $0x60] sm:$0xff] (!%p3233_p5)  ;;  %v2385_v52 = vld [vmem:[%s5703_s4 + $0x68] sm:$0xff] (!%p3233_p5)  ;;  %v2386_v58 = vld [vmem:[%s5703_s4 + $0x70] sm:$0xff] (!%p3233_p5)  ;;  %vm2615_vm1 = vcmp.lt.s32.totalorder (!%p3233_p5), %v5298_v16, 4 }
 0x32d   : > { %3698 = vmatprep.subr.bf16.mxu0 (!%p3233_p5), %v3697_v54  ;;  %3728 = vmatprep.subr.bf16.mxu1 (!%p3233_p5), %v3697_v54  ;;  %v2340_v39 = vld [vmem:[%s5234_s10] sm:$0xff] (!%p3233_p5)  ;;  %v3717_v10 = vpack.c.bf16 (!%p3233_p5), %v2385_v52, %v2384_v19  ;;  %v2387_v27 = vld [vmem:[%s5703_s4 + $0x78] sm:$0xff] (!%p3233_p5)  ;;  %v2341_v57 = vld [vmem:[%s5234_s10 + $0x8] sm:$0xff] (!%p3233_p5) }
 0x32e   : > { %v2356_v44 = vld [vmem:[%s5234_s10 + $0x80] sm:$0xff] (!%p3233_p5)  ;;  %3645 = vmatprep.mubr.f32.mxu0 (!%p3233_p5), %v2340_v39  ;;  %v3721_v22 = vpack.c.bf16 (!%p3233_p5), %v2387_v27, %v2386_v58  ;;  %v2357_v15 = vld [vmem:[%s5234_s10 + $0x88] sm:$0xff] (!%p3233_p5)  ;;  %v2342_v46 = vld [vmem:[%s5234_s10 + $0x10] sm:$0xff] (!%p3233_p5) }
 0x32f   : > { %3669 = vmatprep.mubr.f32.mxu1 (!%p3233_p5), %v2356_v44  ;;  %v2358_v24 = vld [vmem:[%s5234_s10 + $0x90] sm:$0xff] (!%p3233_p5)  ;;  %v2343_v25 = vld [vmem:[%s5234_s10 + $0x18] sm:$0xff] (!%p3233_p5)  ;;  %v2344_v43 = vld [vmem:[%s5234_s10 + $0x20] sm:$0xff] (!%p3233_p5) }
 0x330   : > { %3700 = vmatpush3.bf16.msra.mxu0 %v3697_v54  ;;  %3736 = vmatpush3.bf16.msra.mxu1 %v3697_v54  ;;  %v2359_v11 = vld [vmem:[%s5234_s10 + $0x98] sm:$0xff]  ;;  %v2360_v14 = vld [vmem:[%s5234_s10 + $0xa0] sm:$0xff]  ;;  %v2345_v12 = vld [vmem:[%s5234_s10 + $0x28] sm:$0xff] }
 0x331   : > { %3702 = vmatprep.subr.bf16.mxu0 %v3701_v18  ;;  %3729 = vmatprep.subr.bf16.mxu1 %v3701_v18  ;;  %v2361_v38 = vld [vmem:[%s5234_s10 + $0xa8] sm:$0xff]  ;;  %v2346_v20 = vld [vmem:[%s5234_s10 + $0x30] sm:$0xff]  ;;  %v2347_v51 = vld [vmem:[%s5234_s10 + $0x38] sm:$0xff] }
 0x332   : > { %v2362_v42 = vld [vmem:[%s5234_s10 + $0xb0] sm:$0xff]  ;;  %v2363_v62 = vld [vmem:[%s5234_s10 + $0xb8] sm:$0xff]  ;;  %v2348_v53 = vld [vmem:[%s5234_s10 + $0x40] sm:$0xff] }
 0x333   : > { %v2364_v8 = vld [vmem:[%s5234_s10 + $0xc0] sm:$0xff]  ;;  %v2349_v45 = vld [vmem:[%s5234_s10 + $0x48] sm:$0xff]  ;;  %v2350_v13 = vld [vmem:[%s5234_s10 + $0x50] sm:$0xff] }
 0x334   : > { %3704 = vmatpush3.bf16.msra.mxu0 %v3701_v18  ;;  %3737 = vmatpush3.bf16.msra.mxu1 %v3701_v18  ;;  %v2365_v59 = vld [vmem:[%s5234_s10 + $0xc8] sm:$0xff]  ;;  %v2366_v4 = vld [vmem:[%s5234_s10 + $0xd0] sm:$0xff]  ;;  %v2351_v17 = vld [vmem:[%s5234_s10 + $0x58] sm:$0xff] }
 0x335   : > { %3706 = vmatprep.subr.bf16.mxu0 %v3705_v34  ;;  %3730 = vmatprep.subr.bf16.mxu1 %v3705_v34  ;;  %v2367_v29 = vld [vmem:[%s5234_s10 + $0xd8] sm:$0xff]  ;;  %v2352_v3 = vld [vmem:[%s5234_s10 + $0x60] sm:$0xff]  ;;  %v2353_v63 = vld [vmem:[%s5234_s10 + $0x68] sm:$0xff] }
 0x336   : > { %v2368_v31 = vld [vmem:[%s5234_s10 + $0xe0] sm:$0xff]  ;;  %v2369_v61 = vld [vmem:[%s5234_s10 + $0xe8] sm:$0xff]  ;;  %v2354_v32 = vld [vmem:[%s5234_s10 + $0x70] sm:$0xff] }
 0x337   : > { %v2370_v48 = vld [vmem:[%s5234_s10 + $0xf0] sm:$0xff]  ;;  %v2355_v0 = vld [vmem:[%s5234_s10 + $0x78] sm:$0xff] }
 0x338   : > { %3708 = vmatpush3.bf16.msra.mxu0 %v3705_v34  ;;  %3738 = vmatpush3.bf16.msra.mxu1 %v3705_v34  ;;  %v2371_v60 = vld [vmem:[%s5234_s10 + $0xf8] sm:$0xff]  ;;  %s5591_s10 = scalar_lea.vmem [#allocation9], %s4300_s11 }
 0x339   : > { %3710 = vmatprep.subr.bf16.mxu0 %v3709_v33  ;;  %3731 = vmatprep.subr.bf16.mxu1 %v3709_v33 }
 0x33c   : > { %3712 = vmatpush3.bf16.msra.mxu0 %v3709_v33  ;;  %3739 = vmatpush3.bf16.msra.mxu1 %v3709_v33 }
 0x33d   : > { %3714 = vmatprep.subr.bf16.mxu0 %v3713_v49  ;;  %3732 = vmatprep.subr.bf16.mxu1 %v3713_v49 }
 0x340   : > { %3716 = vmatpush3.bf16.msra.mxu0 %v3713_v49  ;;  %3740 = vmatpush3.bf16.msra.mxu1 %v3713_v49 }
 0x341   : > { %3718 = vmatprep.subr.bf16.mxu0 %v3717_v10  ;;  %3733 = vmatprep.subr.bf16.mxu1 %v3717_v10 }
 0x344   : > { %3720 = vmatpush3.bf16.msra.mxu0 %v3717_v10  ;;  %3741 = vmatpush3.bf16.msra.mxu1 %v3717_v10 }
 0x345   : > { %3722 = vmatprep.subr.bf16.mxu0 %v3721_v22  ;;  %3734 = vmatprep.subr.bf16.mxu1 %v3721_v22 }
 0x348   : > { %3724 = vmatpush3.bf16.msra.mxu0 %v3721_v22  ;;  %3742 = vmatpush3.bf16.msra.mxu1 %v3721_v22 }
 0x34b   : > { %3646 = vmatmul.mubr.f32.vlgmr.msra.gmra.mrb[0].mxu0 %v2341_v57  ;;  %3670 = vmatmul.mubr.f32.vlgmr.msra.gmra.mrb[0].mxu1 %v2357_v15 }
 0x34c   : > { %3648 = vmatprep.mubr.f32.mxu0 %v2342_v46  ;;  %3672 = vmatprep.mubr.f32.mxu1 %v2358_v24 }
 0x34f   : > { %3649 = vmatmul.mubr.f32.gmra.mrb[2].mxu0 %v2343_v25  ;;  %3673 = vmatmul.mubr.f32.gmra.mrb[2].mxu1 %v2359_v11 }
 0x350   : > { %3651 = vmatprep.mubr.f32.mxu0 %v2344_v43  ;;  %3675 = vmatprep.mubr.f32.mxu1 %v2360_v14 }
 0x353   : > { %3652 = vmatmul.mubr.f32.gmra.mrb[4].mxu0 %v2345_v12  ;;  %3676 = vmatmul.mubr.f32.gmra.mrb[4].mxu1 %v2361_v38 }
 0x354   : > { %3654 = vmatprep.mubr.f32.mxu0 %v2346_v20  ;;  %3678 = vmatprep.mubr.f32.mxu1 %v2362_v42 }
 0x357   : > { %3655 = vmatmul.mubr.f32.gmra.mrb[6].mxu0 %v2347_v51  ;;  %3679 = vmatmul.mubr.f32.gmra.mrb[6].mxu1 %v2363_v62 }
 0x358   : > { %3657 = vmatprep.mubr.f32.mxu0 %v2348_v53  ;;  %3681 = vmatprep.mubr.f32.mxu1 %v2364_v8 }
 0x35b   : > { %3658 = vmatmul.mubr.f32.gmra.mrb[8].mxu0 %v2349_v45  ;;  %3682 = vmatmul.mubr.f32.gmra.mrb[8].mxu1 %v2365_v59 }
 0x35c   : > { %3660 = vmatprep.mubr.f32.mxu0 %v2350_v13  ;;  %3684 = vmatprep.mubr.f32.mxu1 %v2366_v4 }
 0x35f   : > { %3661 = vmatmul.mubr.f32.gmra.mrb[10].mxu0 %v2351_v17  ;;  %3685 = vmatmul.mubr.f32.gmra.mrb[10].mxu1 %v2367_v29 }
 0x360   : > { %3663 = vmatprep.mubr.f32.mxu0 %v2352_v3  ;;  %3687 = vmatprep.mubr.f32.mxu1 %v2368_v31 }
 0x363   : > { %3664 = vmatmul.mubr.f32.gmra.mrb[12].mxu0 %v2353_v63  ;;  %3688 = vmatmul.mubr.f32.gmra.mrb[12].mxu1 %v2369_v61 }
 0x364   : > { %3666 = vmatprep.mubr.f32.mxu0 %v2354_v32  ;;  %3690 = vmatprep.mubr.f32.mxu1 %v2370_v48 }
 0x367   : > { %3667 = vmatmul.mubr.f32.gmra.mrb[14].mxu0 %v2355_v0  ;;  %3691 = vmatmul.mubr.f32.gmra.mrb[14].mxu1 %v2371_v60 }
 0x41e   : > { %v3647_v6 = vpop.f32.mrb[0].mxu0  ;;  %v3671_v23 = vpop.f32.mrb[0].mxu1 }
 0x41f   : > { %v2454_v41 = vpop.f32.mrb[1].mxu0  ;;  %v2534_v9 = vpop.f32.mrb[1].mxu1  ;;  %v5303_v21 = vsel %vm2615_vm1, %v3671_v23, -1e+30  ;;  %v5307_v50 = vsel %vm2615_vm1, %v3647_v6, -1e+30 }
 0x420   : > { %2682 = vmax.xlane.f32.xlu1 %v5303_v21  ;;  %2650 = vmax.xlane.f32.xlu0 %v5307_v50  ;;  %v5313_v1 = vsel %vm2615_vm1, %v2454_v41, -1e+30  ;;  %v5327_v39 = vsel %vm2615_vm1, %v2534_v9, -1e+30 }
 0x422   : > { %v3650_v28 = vpop.f32.mrb[2].mxu0  ;;  %v3674_v26 = vpop.f32.mrb[2].mxu1 }
 0x423   : > { %v2464_v30 = vpop.f32.mrb[3].mxu0  ;;  %v5317_v47 = vsel %vm2615_vm1, %v3650_v28, -1e+30  ;;  %v2544_v54 = vpop.f32.mrb[3].mxu1  ;;  %v5323_v55 = vsel %vm2615_vm1, %v3674_v26, -1e+30 }
 0x424   : > { %2648 = vmax.xlane.f32.xlu0 %v5313_v1  ;;  %2654 = vmax.xlane.f32.xlu1 %v5317_v47  ;;  %v5333_v56 = vsel %vm2615_vm1, %v2544_v54, -1e+30  ;;  %v5337_v35 = vsel %vm2615_vm1, %v2464_v30, -1e+30 }
 0x426   : > { %v3653_v5 = vpop.f32.mrb[4].mxu0  ;;  %v3677_v18 = vpop.f32.mrb[4].mxu1 }
 0x427   : > { %v2474_v44 = vpop.f32.mrb[5].mxu0  ;;  %v2554_v2 = vpop.f32.mrb[5].mxu1  ;;  %v5343_v37 = vsel %vm2615_vm1, %v3653_v5, -1e+30  ;;  %v5353_v27 = vsel %vm2615_vm1, %v3677_v18, -1e+30 }
 0x428   : > { %2680 = vmax.xlane.f32.xlu0 %v5327_v39  ;;  %2686 = vmax.xlane.f32.xlu1 %v5323_v55  ;;  %v5347_v49 = vsel %vm2615_vm1, %v2474_v44, -1e+30  ;;  %v5357_v22 = vsel %vm2615_vm1, %v2554_v2, -1e+30 }
 0x42a   : > { %v3656_v7 = vpop.f32.mrb[6].mxu0  ;;  %v3680_v34 = vpop.f32.mrb[6].mxu1 }
 0x42b   : > { %v2484_v33 = vpop.f32.mrb[7].mxu0  ;;  %v2564_v36 = vpop.f32.mrb[7].mxu1  ;;  %v5363_v25 = vsel %vm2615_vm1, %v3656_v7, -1e+30  ;;  %v5373_v20 = vsel %vm2615_vm1, %v3680_v34, -1e+30 }
 0x42c   : > { %2684 = vmax.xlane.f32.xlu0 %v5333_v56  ;;  %2652 = vmax.xlane.f32.xlu1 %v5337_v35  ;;  %v5367_v11 = vsel %vm2615_vm1, %v2484_v33, -1e+30  ;;  %v5377_v42 = vsel %vm2615_vm1, %v2564_v36, -1e+30 }
 0x42e   : > { %v3659_v19 = vpop.f32.mrb[8].mxu0  ;;  %v3683_v52 = vpop.f32.mrb[8].mxu1 }
 0x42f   : > { %v2494_v10 = vpop.f32.mrb[9].mxu0  ;;  %v2574_v58 = vpop.f32.mrb[9].mxu1  ;;  %v5383_v45 = vsel %vm2615_vm1, %v3659_v19, -1e+30  ;;  %v5393_v13 = vsel %vm2615_vm1, %v3683_v52, -1e+30 }
 0x430   : > { %2658 = vmax.xlane.f32.xlu1 %v5343_v37  ;;  %2656 = vmax.xlane.f32.xlu0 %v5347_v49  ;;  %v5387_v59 = vsel %vm2615_vm1, %v2494_v10, -1e+30  ;;  %v5397_v4 = vsel %vm2615_vm1, %v2574_v58, -1e+30 }
 0x432   : > { %v3662_v57 = vpop.f32.mrb[10].mxu0  ;;  %v3686_v15 = vpop.f32.mrb[10].mxu1 }
 0x433   : > { %v2504_v46 = vpop.f32.mrb[11].mxu0  ;;  %v2584_v24 = vpop.f32.mrb[11].mxu1  ;;  %v5403_v17 = vsel %vm2615_vm1, %v3662_v57, -1e+30  ;;  %v5413_v3 = vsel %vm2615_vm1, %v3686_v15, -1e+30 }
 0x434   : > { %2690 = vmax.xlane.f32.xlu1 %v5353_v27  ;;  %2688 = vmax.xlane.f32.xlu0 %v5357_v22  ;;  %v5407_v29 = vsel %vm2615_vm1, %v2504_v46, -1e+30  ;;  %v5417_v31 = vsel %vm2615_vm1, %v2584_v24, -1e+30 }
 0x436   : > { %v3665_v43 = vpop.f32.mrb[12].mxu0  ;;  %v3689_v14 = vpop.f32.mrb[12].mxu1 }
 0x437   : > { %v2514_v12 = vpop.f32.mrb[13].mxu0  ;;  %v2594_v38 = vpop.f32.mrb[13].mxu1  ;;  %v5423_v63 = vsel %vm2615_vm1, %v3665_v43, -1e+30  ;;  %v5433_v32 = vsel %vm2615_vm1, %v3689_v14, -1e+30 }
 0x438   : > { %2662 = vmax.xlane.f32.xlu1 %v5363_v25  ;;  %2660 = vmax.xlane.f32.xlu0 %v5367_v11  ;;  %v5427_v61 = vsel %vm2615_vm1, %v2514_v12, -1e+30  ;;  %v5437_v48 = vsel %vm2615_vm1, %v2594_v38, -1e+30 }
 0x43a   : > { %v3668_v51 = vpop.f32.mrb[14].mxu0  ;;  %v3692_v62 = vpop.f32.mrb[14].mxu1 }
 0x43b   : > { %v2524_v53 = vpop.f32.mrb[15].mxu0  ;;  %v2604_v8 = vpop.f32.mrb[15].mxu1  ;;  %v5443_v0 = vsel %vm2615_vm1, %v3668_v51, -1e+30  ;;  %v5453_v40 = vsel %vm2615_vm1, %v3692_v62, -1e+30 }
 0x43c   : > { %2694 = vmax.xlane.f32.xlu1 %v5373_v20  ;;  %2692 = vmax.xlane.f32.xlu0 %v5377_v42  ;;  %v5447_v60 = vsel %vm2615_vm1, %v2524_v53, -1e+30  ;;  %v5457_v6 = vsel %vm2615_vm1, %v2604_v8, -1e+30 }
 0x440   : > { %2666 = vmax.xlane.f32.xlu1 %v5383_v45  ;;  %2664 = vmax.xlane.f32.xlu0 %v5387_v59 }
 0x444   : > { %2698 = vmax.xlane.f32.xlu1 %v5393_v13  ;;  %2696 = vmax.xlane.f32.xlu0 %v5397_v4 }
 0x448   : > { %2670 = vmax.xlane.f32.xlu1 %v5403_v17  ;;  %2668 = vmax.xlane.f32.xlu0 %v5407_v29 }
 0x44c   : > { %2702 = vmax.xlane.f32.xlu1 %v5413_v3  ;;  %2700 = vmax.xlane.f32.xlu0 %v5417_v31 }
 0x450   : > { %2674 = vmax.xlane.f32.xlu1 %v5423_v63  ;;  %2672 = vmax.xlane.f32.xlu0 %v5427_v61 }
 0x454   : > { %2706 = vmax.xlane.f32.xlu1 %v5433_v32  ;;  %2704 = vmax.xlane.f32.xlu0 %v5437_v48 }
 0x458   : > { %2678 = vmax.xlane.f32.xlu1 %v5443_v0  ;;  %2676 = vmax.xlane.f32.xlu0 %v5447_v60 }
 0x45c   : > { %2710 = vmax.xlane.f32.xlu1 %v5453_v40  ;;  %2708 = vmax.xlane.f32.xlu0 %v5457_v6 }
 0x4ad   : > { %v2683_v23 = vpop.xlane.xlu1 %2682  ;;  %v2651_v41 = vpop.xlane.xlu0 %2650 }
 0x4ae   : > { %v5462_v9 = vsub.f32 %v5307_v50, %v2651_v41  ;;  %v5465_v28 = vsub.f32 %v5303_v21, %v2683_v23 }
 0x4b0   : > { %v2746_v26 = vmul.f32 1.442695, %v5462_v9  ;;  %v2778_v5 = vmul.f32 1.442695, %v5465_v28 }
 0x4b1   : > { %v2649_v30 = vpop.xlane.xlu0 %2648  ;;  %v2655_v54 = vpop.xlane.xlu1 %2654 }
 0x4b2   : > { %v5469_v16 = vsub.f32 %v5313_v1, %v2649_v30  ;;  %3935 = vpow2.f32 %v2746_v26  ;;  %v5473_v18 = vsub.f32 %v5317_v47, %v2655_v54 }
 0x4b4   : > { %v2744_v44 = vmul.f32 1.442695, %v5469_v16  ;;  %v2750_v1 = vmul.f32 1.442695, %v5473_v18 }
 0x4b5   : > { %v2681_v50 = vpop.xlane.xlu0 %2680  ;;  %v2687_v2 = vpop.xlane.xlu1 %2686 }
 0x4b6   : > { %3937 = vpow2.f32 %v2744_v44  ;;  %v5477_v21 = vsub.f32 %v5327_v39, %v2681_v50  ;;  %v5480_v7 = vsub.f32 %v5323_v55, %v2687_v2 }
 0x4b7   : > { %3939 = vpow2.f32 %v2778_v5 }
 0x4b8   : > { %v2776_v34 = vmul.f32 1.442695, %v5477_v21  ;;  %v2782_v47 = vmul.f32 1.442695, %v5480_v7 }
 0x4b9   : > { %v2685_v33 = vpop.xlane.xlu0 %2684  ;;  %v2653_v36 = vpop.xlane.xlu1 %2652 }
 0x4ba   : > { %3941 = vpow2.f32 %v2776_v34  ;;  %v5486_v19 = vsub.f32 %v5337_v35, %v2653_v36  ;;  %v5489_v39 = vsub.f32 %v5333_v56, %v2685_v33 }
 0x4bb   : > { %3943 = vpow2.f32 %v2750_v1 }
 0x4bc   : > { %v2748_v55 = vmul.f32 1.442695, %v5486_v19  ;;  %v3936_v52 = vpop.eup %3935  ;;  %3945 = vpow2.f32 %v2782_v47  ;;  %v2780_v15 = vmul.f32 1.442695, %v5489_v39 }
 0x4bd   : > { %v2659_v10 = vpop.xlane.xlu1 %2658  ;;  %v2657_v58 = vpop.xlane.xlu0 %2656  ;;  %2810 = vadd.xlane.f32.xlu1 %v3936_v52 }
 0x4be   : > { %v5493_v57 = vsub.f32 %v5343_v37, %v2659_v10  ;;  %3947 = vpow2.f32 %v2748_v55  ;;  %v5497_v35 = vsub.f32 %v5347_v49, %v2657_v58 }
 0x4c0   : > { %v3938_v46 = vpop.eup %3937  ;;  %v2754_v56 = vmul.f32 1.442695, %v5493_v57  ;;  %v2752_v37 = vmul.f32 1.442695, %v5497_v35 }
 0x4c1   : > { %v3940_v24 = vpop.eup %3939  ;;  %v2691_v43 = vpop.xlane.xlu1 %2690  ;;  %2808 = vadd.xlane.f32.xlu0 %v3938_v46 }
 0x4c2   : > { %v2689_v14 = vpop.xlane.xlu0 %2688  ;;  %3949 = vpow2.f32 %v2754_v56  ;;  %v5501_v12 = vsub.f32 %v5353_v27, %v2691_v43  ;;  %2842 = vadd.xlane.f32.xlu1 %v3940_v24 }
 0x4c3   : > { %3951 = vpow2.f32 %v2780_v15  ;;  %v5505_v38 = vsub.f32 %v5357_v22, %v2689_v14 }
 0x4c4   : > { %v3942_v49 = vpop.eup %3941  ;;  %v2786_v51 = vmul.f32 1.442695, %v5501_v12 }
 0x4c5   : > { %v3944_v62 = vpop.eup %3943  ;;  %v2663_v53 = vpop.xlane.xlu1 %2662  ;;  %2840 = vadd.xlane.f32.xlu0 %v3942_v49  ;;  %v2784_v27 = vmul.f32 1.442695, %v5505_v38 }
 0x4c6   : > { %v2661_v8 = vpop.xlane.xlu0 %2660  ;;  %3953 = vpow2.f32 %v2786_v51  ;;  %v5509_v23 = vsub.f32 %v5363_v25, %v2663_v53  ;;  %2814 = vadd.xlane.f32.xlu1 %v3944_v62  ;;  %v3946_v22 = vpop.eup %3945 }
 0x4c7   : > { %3955 = vpow2.f32 %v2752_v37  ;;  %v5513_v41 = vsub.f32 %v5367_v11, %v2661_v8 }
 0x4c8   : > { %v2758_v26 = vmul.f32 1.442695, %v5509_v23  ;;  %v3948_v30 = vpop.eup %3947 }
 0x4c9   : > { %v2695_v54 = vpop.xlane.xlu1 %2694  ;;  %2812 = vadd.xlane.f32.xlu0 %v3948_v30  ;;  %v2756_v25 = vmul.f32 1.442695, %v5513_v41 }
 0x4ca   : > { %v2693_v5 = vpop.xlane.xlu0 %2692  ;;  %3957 = vpow2.f32 %v2758_v26  ;;  %v5517_v44 = vsub.f32 %v5373_v20, %v2695_v54  ;;  %2846 = vadd.xlane.f32.xlu1 %v3946_v22 }
 0x4cb   : > { %3959 = vpow2.f32 %v2784_v27  ;;  %v5521_v50 = vsub.f32 %v5377_v42, %v2693_v5 }
 0x4cc   : > { %v3950_v11 = vpop.eup %3949  ;;  %v2790_v2 = vmul.f32 1.442695, %v5517_v44 }
 0x4cd   : > { %v3952_v1 = vpop.eup %3951  ;;  %v2667_v34 = vpop.xlane.xlu1 %2666  ;;  %v2788_v20 = vmul.f32 1.442695, %v5521_v50 }
 0x4ce   : > { %v2665_v33 = vpop.xlane.xlu0 %2664  ;;  %3961 = vpow2.f32 %v2790_v2  ;;  %v5525_v36 = vsub.f32 %v5383_v45, %v2667_v34  ;;  %2818 = vadd.xlane.f32.xlu1 %v3950_v11  ;;  %2844 = vadd.xlane.f32.xlu0 %v3952_v1 }
 0x4cf   : > { %3963 = vpow2.f32 %v2756_v25  ;;  %v5529_v47 = vsub.f32 %v5387_v59, %v2665_v33 }
 0x4d0   : > { %v3954_v42 = vpop.eup %3953  ;;  %v2762_v55 = vmul.f32 1.442695, %v5525_v36 }
 0x4d1   : > { %v3956_v52 = vpop.eup %3955  ;;  %v2699_v10 = vpop.xlane.xlu1 %2698  ;;  %v2760_v45 = vmul.f32 1.442695, %v5529_v47 }
 0x4d2   : > { %v2697_v58 = vpop.xlane.xlu0 %2696  ;;  %3965 = vpow2.f32 %v2762_v55  ;;  %v5533_v15 = vsub.f32 %v5393_v13, %v2699_v10  ;;  %2850 = vadd.xlane.f32.xlu1 %v3954_v42  ;;  %2816 = vadd.xlane.f32.xlu0 %v3956_v52 }
 0x4d3   : > { %3967 = vpow2.f32 %v2788_v20  ;;  %v5537_v46 = vsub.f32 %v5397_v4, %v2697_v58 }
 0x4d4   : > { %v3958_v59 = vpop.eup %3957  ;;  %v2794_v56 = vmul.f32 1.442695, %v5533_v15 }
 0x4d5   : > { %v3960_v24 = vpop.eup %3959  ;;  %v2671_v43 = vpop.xlane.xlu1 %2670  ;;  %v2792_v13 = vmul.f32 1.442695, %v5537_v46 }
 0x4d6   : > { %v2669_v14 = vpop.xlane.xlu0 %2668  ;;  %3969 = vpow2.f32 %v2794_v56  ;;  %v5541_v37 = vsub.f32 %v5403_v17, %v2671_v43  ;;  %2822 = vadd.xlane.f32.xlu1 %v3958_v59  ;;  %2848 = vadd.xlane.f32.xlu0 %v3960_v24 }
 0x4d7   : > { %3971 = vpow2.f32 %v2760_v45  ;;  %v5545_v49 = vsub.f32 %v5407_v29, %v2669_v14 }
 0x4d8   : > { %v3962_v4 = vpop.eup %3961  ;;  %v2766_v51 = vmul.f32 1.442695, %v5541_v37 }
 0x4d9   : > { %v3964_v62 = vpop.eup %3963  ;;  %v2703_v53 = vpop.xlane.xlu1 %2702  ;;  %v2764_v17 = vmul.f32 1.442695, %v5545_v49 }
 0x4da   : > { %v2701_v8 = vpop.xlane.xlu0 %2700  ;;  %3973 = vpow2.f32 %v2766_v51  ;;  %v5549_v27 = vsub.f32 %v5413_v3, %v2703_v53  ;;  %2854 = vadd.xlane.f32.xlu1 %v3962_v4  ;;  %2820 = vadd.xlane.f32.xlu0 %v3964_v62 }
 0x4db   : > { %3975 = vpow2.f32 %v2792_v13  ;;  %v5553_v22 = vsub.f32 %v5417_v31, %v2701_v8 }
 0x4dc   : > { %v3966_v29 = vpop.eup %3965  ;;  %v2798_v26 = vmul.f32 1.442695, %v5549_v27 }
 0x4dd   : > { %v3968_v30 = vpop.eup %3967  ;;  %v2675_v54 = vpop.xlane.xlu1 %2674  ;;  %v2796_v3 = vmul.f32 1.442695, %v5553_v22 }
 0x4de   : > { %v2673_v5 = vpop.xlane.xlu0 %2672  ;;  %3977 = vpow2.f32 %v2798_v26  ;;  %v5557_v25 = vsub.f32 %v5423_v63, %v2675_v54  ;;  %2826 = vadd.xlane.f32.xlu1 %v3966_v29  ;;  %2852 = vadd.xlane.f32.xlu0 %v3968_v30 }
 0x4df   : > { %3979 = vpow2.f32 %v2764_v17  ;;  %v5561_v11 = vsub.f32 %v5427_v61, %v2673_v5 }
 0x4e0   : > { %v3970_v31 = vpop.eup %3969  ;;  %v2770_v2 = vmul.f32 1.442695, %v5557_v25 }
 0x4e1   : > { %v3972_v1 = vpop.eup %3971  ;;  %v2707_v34 = vpop.xlane.xlu1 %2706  ;;  %v2768_v63 = vmul.f32 1.442695, %v5561_v11 }
 0x4e2   : > { %v2705_v33 = vpop.xlane.xlu0 %2704  ;;  %3981 = vpow2.f32 %v2770_v2  ;;  %v5565_v20 = vsub.f32 %v5433_v32, %v2707_v34  ;;  %2858 = vadd.xlane.f32.xlu1 %v3970_v31  ;;  %2824 = vadd.xlane.f32.xlu0 %v3972_v1 }
 0x4e3   : > { %3983 = vpow2.f32 %v2796_v3  ;;  %v5569_v42 = vsub.f32 %v5437_v48, %v2705_v33 }
 0x4e4   : > { %v3974_v61 = vpop.eup %3973  ;;  %v2802_v55 = vmul.f32 1.442695, %v5565_v20 }
 0x4e5   : > { %v3976_v52 = vpop.eup %3975  ;;  %v2679_v10 = vpop.xlane.xlu1 %2678  ;;  %v2800_v32 = vmul.f32 1.442695, %v5569_v42 }
 0x4e6   : > { %v2677_v58 = vpop.xlane.xlu0 %2676  ;;  %3985 = vpow2.f32 %v2802_v55  ;;  %2830 = vadd.xlane.f32.xlu1 %v3974_v61  ;;  %v5573_v45 = vsub.f32 %v5443_v0, %v2679_v10  ;;  %2856 = vadd.xlane.f32.xlu0 %v3976_v52 }
 0x4e7   : > { %3987 = vpow2.f32 %v2768_v63  ;;  %v5577_v59 = vsub.f32 %v5447_v60, %v2677_v58 }
 0x4e8   : > { %v3978_v48 = vpop.eup %3977  ;;  %v2774_v56 = vmul.f32 1.442695, %v5573_v45 }
 0x4e9   : > { %v3980_v24 = vpop.eup %3979  ;;  %v2711_v43 = vpop.xlane.xlu1 %2710  ;;  %v2772_v0 = vmul.f32 1.442695, %v5577_v59 }
 0x4ea   : > { %v2709_v14 = vpop.xlane.xlu0 %2708  ;;  %3989 = vpow2.f32 %v2774_v56  ;;  %2862 = vadd.xlane.f32.xlu1 %v3978_v48  ;;  %v5581_v13 = vsub.f32 %v5453_v40, %v2711_v43  ;;  %2828 = vadd.xlane.f32.xlu0 %v3980_v24 }
 0x4eb   : > { %3991 = vpow2.f32 %v2800_v32  ;;  %v5585_v4 = vsub.f32 %v5457_v6, %v2709_v14 }
 0x4ec   : > { %v3982_v60 = vpop.eup %3981  ;;  %v2806_v51 = vmul.f32 1.442695, %v5581_v13 }
 0x4ed   : > { %v3984_v62 = vpop.eup %3983  ;;  %v2804_v53 = vmul.f32 1.442695, %v5585_v4 }
 0x4ee   : > { %3993 = vpow2.f32 %v2806_v51  ;;  %2834 = vadd.xlane.f32.xlu1 %v3982_v60  ;;  %2860 = vadd.xlane.f32.xlu0 %v3984_v62 }
 0x4ef   : > { %3995 = vpow2.f32 %v2772_v0 }
 0x4f0   : > { %v3986_v8 = vpop.eup %3985  ;;  %3997 = vpow2.f32 %v2804_v53 }
 0x4f1   : > { %v3988_v40 = vpop.eup %3987 }
 0x4f2   : > { %2866 = vadd.xlane.f32.xlu1 %v3986_v8  ;;  %2832 = vadd.xlane.f32.xlu0 %v3988_v40 }
 0x4f4   : > { %v3990_v17 = vpop.eup %3989 }
 0x4f5   : > { %v3992_v29 = vpop.eup %3991 }
 0x4f6   : > { %2838 = vadd.xlane.f32.xlu1 %v3990_v17  ;;  %2864 = vadd.xlane.f32.xlu0 %v3992_v29 }
 0x4f8   : > { %v3994_v6 = vpop.eup %3993 }
 0x4f9   : > { %v3996_v26 = vpop.eup %3995 }
 0x4fa   : > { %2870 = vadd.xlane.f32.xlu1 %v3994_v6  ;;  %2836 = vadd.xlane.f32.xlu0 %v3996_v26  ;;  %v3998_v30 = vpop.eup %3997 }
 0x4fe   : > { %2868 = vadd.xlane.f32.xlu0 %v3998_v30 }
 0x54a   : > { %v2811_v54 = vpop.xlane.xlu1 %2810 }
 0x54b   : > { %3999 = vlog2.f32 %v2811_v54 }
 0x54e   : > { %v2809_v5 = vpop.xlane.xlu0 %2808 }
 0x54f   : > { %v2843_v3 = vpop.xlane.xlu1 %2842  ;;  %4001 = vlog2.f32 %v2809_v5 }
 0x550   : > { %4003 = vlog2.f32 %v2843_v3 }
 0x552   : > { %v2841_v31 = vpop.xlane.xlu0 %2840 }
 0x553   : > { %v2815_v2 = vpop.xlane.xlu1 %2814  ;;  %4005 = vlog2.f32 %v2841_v31 }
 0x554   : > { %4007 = vlog2.f32 %v2815_v2 }
 0x555   : > { %v4000_v1 = vpop.eup %3999 }
 0x556   : > { %v2875_v34 = vmul.f32 0.6931472, %v4000_v1  ;;  %v2813_v63 = vpop.xlane.xlu0 %2812 }
 0x557   : > { %v2847_v33 = vpop.xlane.xlu1 %2846 }
 0x558   : > { %4009 = vlog2.f32 %v2847_v33  ;;  %v2937_v55 = vsub.f32 %v5462_v9, %v2875_v34 }
 0x559   : > { %v4002_v61 = vpop.eup %4001  ;;  %4011 = vlog2.f32 %v2813_v63 }
 0x55a   : > { %v4004_v52 = vpop.eup %4003  ;;  %v2873_v10 = vmul.f32 0.6931472, %v4002_v61  ;;  %2970 = vst [vmem:[%s5591_s10 + $0x8] sm:$0xff] %v2937_v55 }
 0x55b   : > { %v2907_v58 = vmul.f32 0.6931472, %v4004_v52  ;;  %v2819_v32 = vpop.xlane.xlu1 %2818  ;;  %v2845_v48 = vpop.xlane.xlu0 %2844 }
 0x55c   : > { %v2936_v56 = vsub.f32 %v5469_v16, %v2873_v10  ;;  %4013 = vlog2.f32 %v2819_v32 }
 0x55d   : > { %v4006_v24 = vpop.eup %4005  ;;  %v2953_v43 = vsub.f32 %v5465_v28, %v2907_v58  ;;  %4015 = vlog2.f32 %v2845_v48 }
 0x55e   : > { %v4008_v9 = vpop.eup %4007  ;;  %2969 = vst [vmem:[%s5591_s10] sm:$0xff] %v2936_v56  ;;  %v2905_v14 = vmul.f32 0.6931472, %v4006_v24 }
 0x55f   : > { %2986 = vst [vmem:[%s5591_s10 + $0x88] sm:$0xff] %v2953_v43  ;;  %v2879_v0 = vmul.f32 0.6931472, %v4008_v9  ;;  %v2851_v60 = vpop.xlane.xlu1 %2850  ;;  %v2817_v51 = vpop.xlane.xlu0 %2816 }
 0x560   : > { %v2952_v62 = vsub.f32 %v5477_v21, %v2905_v14  ;;  %4017 = vlog2.f32 %v2851_v60 }
 0x561   : > { %v2939_v53 = vsub.f32 %v5473_v18, %v2879_v0  ;;  %4019 = vlog2.f32 %v2817_v51 }
 0x562   : > { %v4010_v16 = vpop.eup %4009  ;;  %2985 = vst [vmem:[%s5591_s10 + $0x80] sm:$0xff] %v2952_v62 }
 0x563   : > { %v4012_v8 = vpop.eup %4011  ;;  %2972 = vst [vmem:[%s5591_s10 + $0x18] sm:$0xff] %v2939_v53  ;;  %v2911_v28 = vmul.f32 0.6931472, %v4010_v16  ;;  %v2823_v40 = vpop.xlane.xlu1 %2822 }
 0x564   : > { %v2849_v17 = vpop.xlane.xlu0 %2848  ;;  %v2877_v29 = vmul.f32 0.6931472, %v4012_v8  ;;  %4021 = vlog2.f32 %v2823_v40 }
 0x565   : > { %v2955_v6 = vsub.f32 %v5480_v7, %v2911_v28  ;;  %4023 = vlog2.f32 %v2849_v17 }
 0x566   : > { %v4014_v21 = vpop.eup %4013  ;;  %v2938_v26 = vsub.f32 %v5486_v19, %v2877_v29 }
 0x567   : > { %v4016_v18 = vpop.eup %4015  ;;  %2988 = vst [vmem:[%s5591_s10 + $0x98] sm:$0xff] %v2955_v6  ;;  %v2883_v30 = vmul.f32 0.6931472, %v4014_v21  ;;  %v2855_v54 = vpop.xlane.xlu1 %2854 }
 0x568   : > { %v2821_v5 = vpop.xlane.xlu0 %2820  ;;  %2971 = vst [vmem:[%s5591_s10 + $0x10] sm:$0xff] %v2938_v26  ;;  %v2909_v3 = vmul.f32 0.6931472, %v4016_v18  ;;  %4025 = vlog2.f32 %v2855_v54 }
 0x569   : > { %v2941_v31 = vsub.f32 %v5493_v57, %v2883_v30  ;;  %4027 = vlog2.f32 %v2821_v5 }
 0x56a   : > { %v4018_v2 = vpop.eup %4017  ;;  %v2954_v7 = vsub.f32 %v5489_v39, %v2909_v3 }
 0x56b   : > { %v4020_v1 = vpop.eup %4019  ;;  %2974 = vst [vmem:[%s5591_s10 + $0x28] sm:$0xff] %v2941_v31  ;;  %v2915_v19 = vmul.f32 0.6931472, %v4018_v2  ;;  %v2827_v34 = vpop.xlane.xlu1 %2826 }
 0x56c   : > { %v2853_v33 = vpop.xlane.xlu0 %2852  ;;  %2987 = vst [vmem:[%s5591_s10 + $0x90] sm:$0xff] %v2954_v7  ;;  %v2881_v63 = vmul.f32 0.6931472, %v4020_v1  ;;  %4029 = vlog2.f32 %v2827_v34 }
 0x56d   : > { %v2957_v61 = vsub.f32 %v5501_v12, %v2915_v19  ;;  %4031 = vlog2.f32 %v2853_v33 }
 0x56e   : > { %v4022_v55 = vpop.eup %4021  ;;  %v2940_v57 = vsub.f32 %v5497_v35, %v2881_v63 }
 0x56f   : > { %v4024_v52 = vpop.eup %4023  ;;  %2990 = vst [vmem:[%s5591_s10 + $0xa8] sm:$0xff] %v2957_v61  ;;  %v2887_v39 = vmul.f32 0.6931472, %v4022_v55  ;;  %v2859_v10 = vpop.xlane.xlu1 %2858 }
 0x570   : > { %v2825_v58 = vpop.xlane.xlu0 %2824  ;;  %2973 = vst [vmem:[%s5591_s10 + $0x20] sm:$0xff] %v2940_v57  ;;  %v2913_v32 = vmul.f32 0.6931472, %v4024_v52  ;;  %4033 = vlog2.f32 %v2859_v10 }
 0x571   : > { %v2943_v48 = vsub.f32 %v5509_v23, %v2887_v39  ;;  %4035 = vlog2.f32 %v2825_v58 }
 0x572   : > { %v4026_v56 = vpop.eup %4025  ;;  %v2956_v12 = vsub.f32 %v5505_v38, %v2913_v32 }
 0x573   : > { %v4028_v24 = vpop.eup %4027  ;;  %2976 = vst [vmem:[%s5591_s10 + $0x38] sm:$0xff] %v2943_v48  ;;  %v2919_v35 = vmul.f32 0.6931472, %v4026_v56  ;;  %v2831_v43 = vpop.xlane.xlu1 %2830 }
 0x574   : > { %v2857_v9 = vpop.xlane.xlu0 %2856  ;;  %2989 = vst [vmem:[%s5591_s10 + $0xa0] sm:$0xff] %v2956_v12  ;;  %v2885_v14 = vmul.f32 0.6931472, %v4028_v24  ;;  %4037 = vlog2.f32 %v2831_v43 }
 0x575   : > { %v2959_v0 = vsub.f32 %v5517_v44, %v2919_v35  ;;  %4039 = vlog2.f32 %v2857_v9 }
 0x576   : > { %v4030_v60 = vpop.eup %4029  ;;  %v2942_v23 = vsub.f32 %v5513_v41, %v2885_v14 }
 0x577   : > { %v4032_v51 = vpop.eup %4031  ;;  %2992 = vst [vmem:[%s5591_s10 + $0xb8] sm:$0xff] %v2959_v0  ;;  %v2891_v38 = vmul.f32 0.6931472, %v4030_v60  ;;  %v2863_v62 = vpop.xlane.xlu1 %2862 }
 0x578   : > { %v2829_v53 = vpop.xlane.xlu0 %2828  ;;  %2975 = vst [vmem:[%s5591_s10 + $0x30] sm:$0xff] %v2942_v23  ;;  %v2917_v16 = vmul.f32 0.6931472, %v4032_v51  ;;  %4041 = vlog2.f32 %v2863_v62 }
 0x579   : > { %v2945_v8 = vsub.f32 %v5525_v36, %v2891_v38  ;;  %4043 = vlog2.f32 %v2829_v53 }
 0x57a   : > { %v4034_v28 = vpop.eup %4033  ;;  %v2958_v44 = vsub.f32 %v5521_v50, %v2917_v16 }
 0x57b   : > { %v4036_v40 = vpop.eup %4035  ;;  %2978 = vst [vmem:[%s5591_s10 + $0x48] sm:$0xff] %v2945_v8  ;;  %v2923_v41 = vmul.f32 0.6931472, %v4034_v28  ;;  %v2835_v17 = vpop.xlane.xlu1 %2834 }
 0x57c   : > { %v2861_v29 = vpop.xlane.xlu0 %2860  ;;  %2991 = vst [vmem:[%s5591_s10 + $0xb0] sm:$0xff] %v2958_v44  ;;  %v2889_v6 = vmul.f32 0.6931472, %v4036_v40  ;;  %4045 = vlog2.f32 %v2835_v17 }
 0x57d   : > { %v2961_v21 = vsub.f32 %v5533_v15, %v2923_v41  ;;  %4047 = vlog2.f32 %v2861_v29 }
 0x57e   : > { %v4038_v26 = vpop.eup %4037  ;;  %v2944_v36 = vsub.f32 %v5529_v47, %v2889_v6 }
 0x57f   : > { %v4040_v18 = vpop.eup %4039  ;;  %2994 = vst [vmem:[%s5591_s10 + $0xc8] sm:$0xff] %v2961_v21  ;;  %v2895_v50 = vmul.f32 0.6931472, %v4038_v26  ;;  %v2867_v30 = vpop.xlane.xlu1 %2866 }
 0x580   : > { %v2833_v54 = vpop.xlane.xlu0 %2832  ;;  %2977 = vst [vmem:[%s5591_s10 + $0x40] sm:$0xff] %v2944_v36  ;;  %v2921_v5 = vmul.f32 0.6931472, %v4040_v18  ;;  %4049 = vlog2.f32 %v2867_v30 }
 0x581   : > { %v2947_v3 = vsub.f32 %v5541_v37, %v2895_v50  ;;  %4051 = vlog2.f32 %v2833_v54 }
 0x582   : > { %v4042_v31 = vpop.eup %4041  ;;  %v2960_v15 = vsub.f32 %v5537_v46, %v2921_v5 }
 0x583   : > { %v4044_v2 = vpop.eup %4043  ;;  %2980 = vst [vmem:[%s5591_s10 + $0x58] sm:$0xff] %v2947_v3  ;;  %v2927_v47 = vmul.f32 0.6931472, %v4042_v31  ;;  %v2839_v7 = vpop.xlane.xlu1 %2838 }
 0x584   : > { %v2865_v1 = vpop.xlane.xlu0 %2864  ;;  %2993 = vst [vmem:[%s5591_s10 + $0xc0] sm:$0xff] %v2960_v15  ;;  %v2893_v19 = vmul.f32 0.6931472, %v4044_v2  ;;  %4053 = vlog2.f32 %v2839_v7 }
 0x585   : > { %v2963_v34 = vsub.f32 %v5549_v27, %v2927_v47  ;;  %4055 = vlog2.f32 %v2865_v1 }
 0x586   : > { %v4046_v33 = vpop.eup %4045  ;;  %v2946_v37 = vsub.f32 %v5545_v49, %v2893_v19 }
 0x587   : > { %v4048_v63 = vpop.eup %4047  ;;  %2996 = vst [vmem:[%s5591_s10 + $0xd8] sm:$0xff] %v2963_v34  ;;  %v2899_v46 = vmul.f32 0.6931472, %v4046_v33  ;;  %v2871_v61 = vpop.xlane.xlu1 %2870 }
 0x588   : > { %v2837_v55 = vpop.xlane.xlu0 %2836  ;;  %2979 = vst [vmem:[%s5591_s10 + $0x50] sm:$0xff] %v2946_v37  ;;  %v2925_v57 = vmul.f32 0.6931472, %v4048_v63  ;;  %4057 = vlog2.f32 %v2871_v61 }
 0x589   : > { %v2949_v52 = vsub.f32 %v5557_v25, %v2899_v46  ;;  %4059 = vlog2.f32 %v2837_v55 }
 0x58a   : > { %v4050_v27 = vpop.eup %4049  ;;  %v2962_v39 = vsub.f32 %v5553_v22, %v2925_v57 }
 0x58b   : > { %v4052_v10 = vpop.eup %4051  ;;  %2982 = vst [vmem:[%s5591_s10 + $0x68] sm:$0xff] %v2949_v52  ;;  %v2931_v49 = vmul.f32 0.6931472, %v4050_v27 }
 0x58c   : > { %v2869_v58 = vpop.xlane.xlu0 %2868  ;;  %2995 = vst [vmem:[%s5591_s10 + $0xd0] sm:$0xff] %v2962_v39  ;;  %v2897_v32 = vmul.f32 0.6931472, %v4052_v10 }
 0x58d   : > { %4061 = vlog2.f32 %v2869_v58  ;;  %v2965_v48 = vsub.f32 %v5565_v20, %v2931_v49 }
 0x58e   : > { %v4054_v56 = vpop.eup %4053  ;;  %v2948_v12 = vsub.f32 %v5561_v11, %v2897_v32 }
 0x58f   : > { %v4056_v25 = vpop.eup %4055  ;;  %2998 = vst [vmem:[%s5591_s10 + $0xe8] sm:$0xff] %v2965_v48  ;;  %v2903_v24 = vmul.f32 0.6931472, %v4054_v56 }
 0x590   : > { %2981 = vst [vmem:[%s5591_s10 + $0x60] sm:$0xff] %v2948_v12  ;;  %v2929_v22 = vmul.f32 0.6931472, %v4056_v25 }
 0x591   : > { %v2951_v35 = vsub.f32 %v5573_v45, %v2903_v24 }
 0x592   : > { %v4058_v43 = vpop.eup %4057  ;;  %v2964_v9 = vsub.f32 %v5569_v42, %v2929_v22 }
 0x593   : > { %v4060_v14 = vpop.eup %4059  ;;  %2984 = vst [vmem:[%s5591_s10 + $0x78] sm:$0xff] %v2951_v35  ;;  %v2935_v0 = vmul.f32 0.6931472, %v4058_v43 }
 0x594   : > { %2997 = vst [vmem:[%s5591_s10 + $0xe0] sm:$0xff] %v2964_v9  ;;  %v2901_v20 = vmul.f32 0.6931472, %v4060_v14 }
 0x595   : > { %v2967_v11 = vsub.f32 %v5581_v13, %v2935_v0 }
 0x596   : > { %v2950_v23 = vsub.f32 %v5577_v59, %v2901_v20 }
 0x597   : > { %v4062_v60 = vpop.eup %4061  ;;  %3000 = vst [vmem:[%s5591_s10 + $0xf8] sm:$0xff] %v2967_v11 }
 0x598   : > { %v2933_v51 = vmul.f32 0.6931472, %v4062_v60  ;;  %2983 = vst [vmem:[%s5591_s10 + $0x70] sm:$0xff] %v2950_v23 }
 0x59a   : > { %v2966_v38 = vsub.f32 %v5585_v4, %v2933_v51 }
 0x59c   : > { %2999 = vst [vmem:[%s5591_s10 + $0xf0] sm:$0xff] %v2966_v38 }
 0x59d PF: > { %p5658_p6 = scmp.eq.s32.totalorder %s3081_s30, 5  ;;  %s4183_s17 = smov [#allocation9]  }
 0x59e   : > { %s3007_s18 = sshll.u32 %s4183_s17, 4  ;;  %s3008_s18 = int_to_ptr.vmem [resolvable:$true] %s3007_s18 }
 0x59f   : > { %s4103_s19 = scalar_lea.vmem %s3008_s18, 8192  ;;  %p4110_p13 = scmp.lt.s32.totalorder %s3008_s18, %s3008_s18 }
 0x5a0   : > { %p4104_p7 = scmp.ne.s32.totalorder %s3008_s18, %s4103_s19  ;;  %p4111_p1 = scmp.lt.s32.totalorder %s4103_s19, %s4103_s19 }
 0x5a2   : > { %p4105_p9 = pnand %p4104_p7, %p5658_p6  ;;  %p4112_p8 = por %p4111_p1, %p4110_p13 }
 0x5a4   : > { %p4106_p11 = pneg %p4105_p9 }
 0x5a6   : > { %p4113_p10 = pnand %p4112_p8, %p4106_p11 }
 0x5a8   : > { %4116 = shalt.err (!%p4113_p10)
}
 0x5a9   : > { %s4117_s30 = scalar_lea.hbm %s5705_s6, 8192 }
 0x5aa   : > { %p4118_p0 = scmp.ne.s32.totalorder %s5705_s6, %s4117_s30  ;;  %p4123_p3 = scmp.lt.u32.totalorder %s4117_s30, %s5705_s6 }
 0x5ac   : > { %p4119_p12 = pnand %p4118_p0, %p5658_p6 }
 0x5ae   : > { %p4120_p2 = pneg %p4119_p12 }
 0x5b0   : > { %p4125_p4 = pnand %p4123_p3, %p4120_p2 }
 0x5b2   : > { %4128 = shalt.err (!%p4125_p4)
}
 0x5b3   : > { %s4184_s13 = smov 128   ;;  %s4185_s27 = smov 8  }
 0x5b4   : > { %3748 = dma.vmem_to_hbm [thread:$0]  (%p5658_p6), %s3008_s18, 8192, %s5705_s6, [#allocation8], %s4184_s13, %s4184_s13, %s4185_s27  }
 0x5b5   : > { %4156 = dma.done.wait (%p5658_p6), [#allocation8], 8192  }
 0x5b6   : > { %4158 = vsyncadd (%p5658_p6), [#allocation8], 4294959104 }
 0x5b7 PF: > { %s24_s29 = sadd.s32 1, %s4177_s29   ;;  %s5715_s26 = smov %s4169_s0 }
 0x5b8   : > { %p21_p5 = scmp.ge.s32.totalorder %s24_s29, 8   ;;  %s5716_s27 = smov %s4173_s28 }
 0x5b9   : > { %s5717_s0 = smov %s5720_s7  ;;  %s5718_s28 = smov %s5724_s8 }
 0x5ba   :  { %23 = sbr.rel (!%p21_p5) target bundleno = 19 (0x13), region = 95 }
 0x5c1   :  { %3023 = vsyncpa [#allocation7], 1 }
 0x5c2   :  { %3025 = vsyncpa [#allocation7 + $0x1], 1 }
 0x5c3   :  { %3026 = vsyncpa [#allocation8], 1 }
 0x5c4   :  { %3028 = vsyncpa [#allocation8 + $0x1], 1 }

</bundles_post_ra>
